<compile_context>
chip_gen: v7x
topology: tpu7x:2x2x1
jax: 0.10.0
libtpu: 0.0.40
codegen_flags: <defaults>
</compile_context>

<pallas_src>
import functools

import jax
import jax.numpy as jnp
import numpy as np
from jax.experimental import pallas as pl
from jax.experimental.pallas import tpu as pltpu


# ----------------------------- Pallas kernels -----------------------------

def _bilstm_kernel(x_ref, w_ih_ref, w_hh_ref, b_ref, h0_ref, c0_ref,
                   mask_ref, out_ref, pre_ref):
    """Fused bidirectional masked (packed-sequence) LSTM layer.

    Packed-sequence semantics: steps with t >= lens[b] (mask[t,b]==0) do not
    update (h, c) and their outputs are zero (matches pad_packed_sequence).
    Running the backward direction from T-1 down to 0 under this mask is
    exactly PyTorch's backward pass over a packed sequence (it starts from h0
    at the last *valid* token of each sequence).
    """
    T, B, E = x_ref.shape
    H = h0_ref.shape[-1]
    G = 4 * H

    # ---- Phase 1: hoisted input projection for BOTH directions ------------
    # pre[t, b] = x[t, b] @ [w_ih_fwd | w_ih_bwd] + bias, gate order (i,f,o,g)
    # per direction.  One big bf16 MXU matmul, f32 accumulation.
    x2 = x_ref[...].reshape(T * B, E)                        # bf16
    pre = jnp.dot(x2, w_ih_ref[...], preferred_element_type=jnp.float32)
    pre_ref[...] = (pre + b_ref[...]).reshape(T, B, 2 * G)
    # TODO(synk): on v7x (64 MiB VMEM) at realistic (T,B,H), time-chunk this
    # scratch (or store it bf16) and add a batch-tile grid axis.

    w_hh_f = w_hh_ref[0]                                     # (H, 4H) bf16
    w_hh_b = w_hh_ref[1]

    h_f = h0_ref[0]
    c_f = c0_ref[0]
    h_b = h0_ref[1]
    c_b = c0_ref[1]

    def cell(pre_g, h, c, w_hh):
        gates = pre_g + jnp.dot(h.astype(jnp.bfloat16), w_hh,
                                preferred_element_type=jnp.float32)
        # Gate order (i, f, o, g): one wide sigmoid + one tanh (EUP pushes).
        sig = jax.nn.sigmoid(gates[:, :3 * H])
        i = sig[:, 0:H]
        f = sig[:, H:2 * H]
        o = sig[:, 2 * H:3 * H]
        g = jnp.tanh(gates[:, 3 * H:])
        c_new = f * c + i * g
        h_new = o * jnp.tanh(c_new)
        return h_new, c_new

    # ---- Phase 2: the recurrence, fwd and bwd fused per step --------------
    # Static Python unroll -> static time indices (aligned loads/stores on
    # pre_ref / out_ref, no per-step scalar select for the bwd index).
    # TODO(synk): for realistic (large) T use lax.fori_loop(..., unroll=4..8)
    # instead of a full unroll.
    for s in range(T):
        t_f = s
        t_b = T - 1 - s

        # forward direction at time t_f
        hf_new, cf_new = cell(pre_ref[t_f, :, :G], h_f, c_f, w_hh_f)
        m = mask_ref[t_f]                                    # (B, 1) in {0,1}
        out_ref[t_f, :, :H] = (hf_new * m).astype(out_ref.dtype)
        h_f = h_f + m * (hf_new - h_f)
        c_f = c_f + m * (cf_new - c_f)

        # backward direction at time t_b
        hb_new, cb_new = cell(pre_ref[t_b, :, G:], h_b, c_b, w_hh_b)
        m = mask_ref[t_b]
        out_ref[t_b, :, H:] = (hb_new * m).astype(out_ref.dtype)
        h_b = h_b + m * (hb_new - h_b)
        c_b = c_b + m * (cb_new - c_b)
    # TODO(synk): H=32 makes every gate slice and the (B, <128) output store
    # sub-lane; realistic H should be a multiple of 128 for unmasked vst.


def _linear_kernel(x_ref, w_ref, b_ref, o_ref):
    o_ref[...] = (jnp.dot(x_ref[...], w_ref[...],
                          preferred_element_type=jnp.float32) + b_ref[...])


# ------------------------------ Pallas wrappers -----------------------------

def masked_bilstm_pallas(x_tbe, w_ih_cat, w_hh2, b_cat, h02, c02, mask_tb1):
    """Fused bidirectional masked LSTM layer.

    x_tbe   : (T, B, E)     bf16 time-major input
    w_ih_cat: (E, 8H)       bf16, columns = [fwd (i,f,o,g) | bwd (i,f,o,g)]
    w_hh2   : (2, H, 4H)    bf16, gate order (i,f,o,g)
    b_cat   : (1, 8H)       f32, b_ih + b_hh, same column layout as w_ih_cat
    h02/c02 : (2, B, H)     f32 initial states, [0]=fwd, [1]=bwd
    mask_tb1: (T, B, 1)     f32 validity mask (t < lens[b])
    returns : (T, B, 2H)    bf16, [:, :, :H]=forward, [:, :, H:]=backward
    """
    T, B, E = x_tbe.shape
    H = h02.shape[-1]
    G = 4 * H

    return pl.pallas_call(
        _bilstm_kernel,
        out_shape=jax.ShapeDtypeStruct((T, B, 2 * H), jnp.bfloat16),
        grid_spec=pltpu.PrefetchScalarGridSpec(
            num_scalar_prefetch=0,
            grid=(1,),
            in_specs=[
                pl.BlockSpec((T, B, E), lambda i: (0, 0, 0)),      # x
                pl.BlockSpec((E, 2 * G), lambda i: (0, 0)),        # w_ih cat
                pl.BlockSpec((2, H, G), lambda i: (0, 0, 0)),      # w_hh
                pl.BlockSpec((1, 2 * G), lambda i: (0, 0)),        # bias
                pl.BlockSpec((2, B, H), lambda i: (0, 0, 0)),      # h0
                pl.BlockSpec((2, B, H), lambda i: (0, 0, 0)),      # c0
                pl.BlockSpec((T, B, 1), lambda i: (0, 0, 0)),      # mask
            ],
            out_specs=pl.BlockSpec((T, B, 2 * H), lambda i: (0, 0, 0)),
            scratch_shapes=[pltpu.VMEM((T, B, 2 * G), jnp.float32)],
        ),
        compiler_params=pltpu.CompilerParams(
            dimension_semantics=("arbitrary",),
            vmem_limit_bytes=32 * 1024 * 1024),
    )(x_tbe, w_ih_cat, w_hh2, b_cat, h02, c02, mask_tb1)
    # TODO(synk): at realistic B add a "parallel" batch-tile grid axis, and on
    # v7x consider CORE_PARALLEL with one direction per TensorCore (needs
    # per-core pre_ref scratch).  TODO(synk): pipeline_mode=pl.Buffered(1) on
    # grid-constant blocks once a real grid exists (VMEM headroom on v7x).


def linear_pallas(x, w, b):
    """Tiled vocab projection: (M, D) bf16 @ (D, Vp) bf16 + b, Vp % 128 == 0.

    Rows tiled (outer, parallel), vocab tiled (inner, parallel).  Vp is the
    lane-padded vocab size, so output stores are unmasked full-lane vst.
    """
    M, D = x.shape
    Vp = w.shape[1]
    bm = 256 if (M % 256 == 0) else M            # toy M falls back to full M
    if Vp % 512 == 0:
        bn = 512
    elif Vp % 256 == 0:
        bn = 256
    else:
        bn = 128 if Vp % 128 == 0 else Vp
    return pl.pallas_call(
        _linear_kernel,
        out_shape=jax.ShapeDtypeStruct((M, Vp), jnp.float32),
        grid_spec=pltpu.PrefetchScalarGridSpec(
            num_scalar_prefetch=0,
            grid=(M // bm, Vp // bn),
            in_specs=[pl.BlockSpec((bm, D), lambda i, j: (i, 0)),
                      pl.BlockSpec((D, bn), lambda i, j: (0, j)),
                      pl.BlockSpec((1, bn), lambda i, j: (0, j))],
            out_specs=pl.BlockSpec((bm, bn), lambda i, j: (i, j)),
        ),
        compiler_params=pltpu.CompilerParams(
            dimension_semantics=("parallel", "parallel")),
    )(x, w, b)


# ------------------------------ parameter init ------------------------------

def init_params(key, vocab_size, embedding_dim, hidden_dim, num_layers,
                dropout, pad_idx=1):
    """Raw (PyTorch-layout, f32) parameters.  Gate order (i, f, g, o)."""
    H = hidden_dim
    k_emb, k_lstm, k_out = jax.random.split(key, 3)

    emb = jax.random.normal(k_emb, (vocab_size, embedding_dim), jnp.float32)
    emb = emb.at[pad_idx].set(0.0)   # nn.Embedding(padding_idx=1) zero row

    scale = 1.0 / np.sqrt(H)
    layers = []
    lk = k_lstm
    for l in range(num_layers):
        in_dim = embedding_dim if l == 0 else 2 * H
        layer = {}
        for dname in ("fwd", "bwd"):
            lk, k1, k2, k3, k4 = jax.random.split(lk, 5)
            w_ih = jax.random.uniform(k1, (in_dim, 4 * H), jnp.float32,
                                      -scale, scale)
            w_hh = jax.random.uniform(k2, (H, 4 * H), jnp.float32,
                                      -scale, scale)
            b_ih = jax.random.uniform(k3, (4 * H,), jnp.float32, -scale, scale)
            b_hh = jax.random.uniform(k4, (4 * H,), jnp.float32, -scale, scale)
            layer[dname] = {"w_ih": w_ih, "w_hh": w_hh,
                            "b": (b_ih + b_hh).reshape(1, 4 * H)}
        layers.append(layer)

    out_scale = 1.0 / np.sqrt(2 * H)
    k_w, k_b = jax.random.split(k_out)
    w_out = jax.random.uniform(k_w, (2 * H, vocab_size), jnp.float32,
                               -out_scale, out_scale)
    b_out = jax.random.uniform(k_b, (vocab_size,), jnp.float32,
                               -out_scale, out_scale)

    return {"embedding": emb, "lstm": layers, "w_out": w_out, "b_out": b_out,
            "dropout": dropout}


def pack_params(params, hidden_dim):
    """One-time (per model, not per call) kernel-ready packing:
    gate permutation (i,f,g,o)->(i,f,o,g), fwd/bwd concat, bf16 casts,
    and vocab padding to a multiple of 128 lanes."""
    H = hidden_dim
    perm = np.concatenate([np.arange(0, 2 * H),
                           np.arange(3 * H, 4 * H),
                           np.arange(2 * H, 3 * H)])
    layers = []
    for layer in params["lstm"]:
        w_ih = jnp.concatenate([layer["fwd"]["w_ih"][:, perm],
                                layer["bwd"]["w_ih"][:, perm]],
                               axis=1).astype(jnp.bfloat16)          # (E, 8H)
        w_hh = jnp.stack([layer["fwd"]["w_hh"][:, perm],
                          layer["bwd"]["w_hh"][:, perm]]
                         ).astype(jnp.bfloat16)                      # (2,H,4H)
        b = jnp.concatenate([layer["fwd"]["b"][:, perm],
                             layer["bwd"]["b"][:, perm]], axis=1)    # (1, 8H)
        layers.append({"w_ih": w_ih, "w_hh": w_hh, "b": b})

    D, V = params["w_out"].shape
    Vp = ((V + 127) // 128) * 128
    w_out = jnp.zeros((D, Vp), jnp.bfloat16)
    w_out = w_out.at[:, :V].set(params["w_out"].astype(jnp.bfloat16))
    b_out = jnp.zeros((1, Vp), jnp.float32)
    b_out = b_out.at[:, :V].set(params["b_out"])

    return {"embedding": params["embedding"], "lstm": layers,
            "w_out": w_out, "b_out": b_out}


# ------------------------------- model glue --------------------------------

def lstm_lm_forward_pallas(packed, text, h0_all, c0_all, *, pad_idx,
                           vocab_size):
    B, T = text.shape
    # lens = number of non-pad tokens per sequence (as in the PyTorch module)
    lens = jnp.sum(text != pad_idx, axis=1).astype(jnp.int32)       # (B,)
    # Validity mask computed ONCE per forward, shared by all layers.
    mask = (jnp.arange(T, dtype=jnp.int32)[:, None, None]
            < lens[None, :, None]).astype(jnp.float32)              # (T, B, 1)

    emb = packed["embedding"][text]                                 # (B, T, E)
    x = jnp.transpose(emb, (1, 0, 2)).astype(jnp.bfloat16)          # (T, B, E)

    for l, layer in enumerate(packed["lstm"]):
        h02 = h0_all[2 * l:2 * l + 2]
        c02 = c0_all[2 * l:2 * l + 2]
        # Kernel emits (T, B, 2H) bf16 directly: next layer consumes as-is.
        x = masked_bilstm_pallas(x, layer["w_ih"], layer["w_hh"], layer["b"],
                                 h02, c02, mask)

    # pad_packed_sequence returns length max(lens); the example is built so
    # max(lens) == T, hence no trim is needed here.
    # TODO(synk): nn.Dropout is identity in eval mode; training-mode dropout
    # is not implemented.
    feats = jnp.transpose(x, (1, 0, 2))                             # (B, T, 2H)
    D = feats.shape[-1]
    logits_p = linear_pallas(feats.reshape(B * T, D),
                             packed["w_out"], packed["b_out"])
    return logits_p[:, :vocab_size].reshape(B, T, vocab_size)


# ------------------------------ pure-JAX ref --------------------------------
# Structurally different formulation (f32 everywhere, explicit per-sequence
# reversal, PyTorch gate order, un-hoisted input projection).

def _reverse_valid(x_tbe, lens):
    T = x_tbe.shape[0]
    t = jnp.arange(T, dtype=jnp.int32)[:, None]
    l = lens.astype(jnp.int32)[None, :]
    idx = jnp.where(t < l, l - 1 - t, t)
    idx = jnp.broadcast_to(idx[:, :, None], x_tbe.shape)
    return jnp.take_along_axis(x_tbe, idx, axis=0)


def lstm_lm_forward_ref(params, text, h0_all, c0_all, pad_idx):
    lens = jnp.sum(text != pad_idx, axis=1).astype(jnp.int32)
    lens_b1 = lens[:, None]
    emb = params["embedding"][text]
    x = jnp.transpose(emb, (1, 0, 2))
    T, B = x.shape[0], x.shape[1]
    H = params["lstm"][0]["fwd"]["w_hh"].shape[0]

    def run(x, w_ih, w_hh, b, h, c):
        outs = []
        for t in range(x.shape[0]):
            gates = x[t] @ w_ih + h @ w_hh + b
            i = jax.nn.sigmoid(gates[:, :H])
            f = jax.nn.sigmoid(gates[:, H:2 * H])
            g = jnp.tanh(gates[:, 2 * H:3 * H])
            o = jax.nn.sigmoid(gates[:, 3 * H:])
            c_new = f * c + i * g
            h_new = o * jnp.tanh(c_new)
            valid = t < lens_b1
            h = jnp.where(valid, h_new, h)
            c = jnp.where(valid, c_new, c)
            outs.append(jnp.where(valid, h_new, 0.0))
        return jnp.stack(outs)

    for l, layer in enumerate(params["lstm"]):
        out_f = run(x, layer["fwd"]["w_ih"], layer["fwd"]["w_hh"],
                    layer["fwd"]["b"], h0_all[2 * l], c0_all[2 * l])
        x_rev = _reverse_valid(x, lens)
        out_b_rev = run(x_rev, layer["bwd"]["w_ih"], layer["bwd"]["w_hh"],
                        layer["bwd"]["b"], h0_all[2 * l + 1], c0_all[2 * l + 1])
        out_b = _reverse_valid(out_b_rev, lens)
        x = jnp.concatenate([out_f, out_b], axis=-1)

    feats = jnp.transpose(x, (1, 0, 2))
    logits = feats.reshape(B * T, -1) @ params["w_out"] + params["b_out"][None]
    return logits.reshape(B, T, -1)


# ----------------------------------- main -----------------------------------

if __name__ == "__main__":
    vocab_size, embedding_dim, hidden_dim = 50, 32, 32
    num_layers, dropout, pad_idx = 2, 0.3, 1
    B, T, H = 2, 8, hidden_dim

    key = jax.random.PRNGKey(0)
    k_params, k_text, k_h, k_c = jax.random.split(key, 4)

    params = init_params(k_params, vocab_size, embedding_dim, hidden_dim,
                         num_layers, dropout, pad_idx)
    packed = pack_params(params, hidden_dim)        # one-time packing

    # Tokens in [2, vocab) so pad_idx only appears where we place it.
    # Lengths sorted descending (pack_padded_sequence enforce_sorted=True),
    # first sequence full-length so max(lens) == T.
    text = jax.random.randint(k_text, (B, T), 2, vocab_size, dtype=jnp.int32)
    text = text.at[1, 5:].set(pad_idx)              # lens = [8, 5]

    # init_hidden: torch.randn -> deterministic jax.random.normal here.
    h0_all = jax.random.normal(k_h, (num_layers * 2, B, H), jnp.float32)
    c0_all = jax.random.normal(k_c, (num_layers * 2, B, H), jnp.float32)

    fwd = jax.jit(functools.partial(lstm_lm_forward_pallas, pad_idx=pad_idx,
                                    vocab_size=vocab_size))
    out = fwd(packed, text, h0_all, c0_all)
    out = jax.block_until_ready(out)

    ref = lstm_lm_forward_ref(params, text, h0_all, c0_all, pad_idx)

    assert out.shape == (B, T, vocab_size), out.shape
    # bf16 MXU operands vs the f32 reference: tolerance loosened accordingly;
    # real semantic errors (gate order / masking / reversal) are O(0.1-1).
    np.testing.assert_allclose(np.asarray(out), np.asarray(ref),
                               rtol=5e-2, atol=5e-2)
    print("KERNEL_OK")
</pallas_src>

<mosaic_0001>
module attributes {stable_mosaic.version = 11 : i64} {
  func.func @_bilstm_kernel(%arg0: i32, %arg1: memref<8x2x32xbf16, #tpu.memory_space<vmem>>, %arg2: memref<32x256xbf16, #tpu.memory_space<vmem>>, %arg3: memref<2x32x128xbf16, #tpu.memory_space<vmem>>, %arg4: memref<1x256xf32, #tpu.memory_space<vmem>>, %arg5: memref<2x2x32xf32, #tpu.memory_space<vmem>>, %arg6: memref<2x2x32xf32, #tpu.memory_space<vmem>>, %arg7: memref<8x2x1xf32, #tpu.memory_space<vmem>>, %arg8: memref<8x2x64xbf16, #tpu.memory_space<vmem>>, %arg9: memref<8x2x256xf32, #tpu.memory_space<vmem>>) attributes {dimension_semantics = [#tpu.dimension_semantics<arbitrary>], iteration_bounds = array<i64: 1>, scalar_prefetch = 0 : i64, scratch_operands = 1 : i64, tpu.core_type = #tpu.core_type<tc>, window_params = [{pipeline_mode = #tpu.pipeline_mode<synchronous>, transform_indices = @transform_0, window_bounds = array<i64: 8, 2, 32>}, {pipeline_mode = #tpu.pipeline_mode<synchronous>, transform_indices = @transform_1, window_bounds = array<i64: 32, 256>}, {pipeline_mode = #tpu.pipeline_mode<synchronous>, transform_indices = @transform_2, window_bounds = array<i64: 2, 32, 128>}, {pipeline_mode = #tpu.pipeline_mode<synchronous>, transform_indices = @transform_3, window_bounds = array<i64: 1, 256>}, {pipeline_mode = #tpu.pipeline_mode<synchronous>, transform_indices = @transform_4, window_bounds = array<i64: 2, 2, 32>}, {pipeline_mode = #tpu.pipeline_mode<synchronous>, transform_indices = @transform_5, window_bounds = array<i64: 2, 2, 32>}, {pipeline_mode = #tpu.pipeline_mode<synchronous>, transform_indices = @transform_6, window_bounds = array<i64: 8, 2, 1>}, {pipeline_mode = #tpu.pipeline_mode<synchronous>, transform_indices = @transform_7, window_bounds = array<i64: 8, 2, 64>}]} {
    %c0 = arith.constant 0 : index
    %c0_0 = arith.constant 0 : index
    %c0_1 = arith.constant 0 : index
    %0 = vector.load %arg1[%c0, %c0_0, %c0_1] : memref<8x2x32xbf16, #tpu.memory_space<vmem>>, vector<8x2x32xbf16>
    %1 = vector.shape_cast %0 : vector<8x2x32xbf16> to vector<16x32xbf16>
    %c0_2 = arith.constant 0 : index
    %c0_3 = arith.constant 0 : index
    %2 = vector.load %arg2[%c0_2, %c0_3] : memref<32x256xbf16, #tpu.memory_space<vmem>>, vector<32x256xbf16>
    %cst = arith.constant dense<0.000000e+00> : vector<16x256xf32>
    %3 = tpu.matmul %1, %2, %cst {dimension_numbers = #tpu.dot_dimension_numbers<[1], [0], [0], [1], [0, 0, 1, 1], [], []>} : vector<16x32xbf16>, vector<32x256xbf16>, vector<16x256xf32> -> vector<16x256xf32>
    %c0_4 = arith.constant 0 : index
    %c0_5 = arith.constant 0 : index
    %4 = vector.load %arg4[%c0_4, %c0_5] : memref<1x256xf32, #tpu.memory_space<vmem>>, vector<1x256xf32>
    %5 = vector.broadcast %4 : vector<1x256xf32> to vector<16x256xf32>
    %6 = arith.addf %3, %5 : vector<16x256xf32>
    %7 = vector.shape_cast %6 : vector<16x256xf32> to vector<8x2x256xf32>
    %c0_6 = arith.constant 0 : index
    %c0_7 = arith.constant 0 : index
    %c0_8 = arith.constant 0 : index
    %8 = vector.load %arg9[%c0_6, %c0_7, %c0_8] : memref<8x2x256xf32, #tpu.memory_space<vmem>>, vector<8x2x256xf32>
    tpu.vector_store %arg9[%c0_6, %c0_7, %c0_8], %7 {strides = array<i32>} : memref<8x2x256xf32, #tpu.memory_space<vmem>>, vector<8x2x256xf32>,
    %c0_9 = arith.constant 0 : index
    %c0_10 = arith.constant 0 : index
    %c0_11 = arith.constant 0 : index
    %9 = vector.load %arg3[%c0_9, %c0_10, %c0_11] : memref<2x32x128xbf16, #tpu.memory_space<vmem>>, vector<1x32x128xbf16>
    %10 = vector.shape_cast %9 : vector<1x32x128xbf16> to vector<32x128xbf16>
    %c1 = arith.constant 1 : index
    %c0_12 = arith.constant 0 : index
    %c0_13 = arith.constant 0 : index
    %11 = vector.load %arg3[%c1, %c0_12, %c0_13] : memref<2x32x128xbf16, #tpu.memory_space<vmem>>, vector<1x32x128xbf16>
    %12 = vector.shape_cast %11 : vector<1x32x128xbf16> to vector<32x128xbf16>
    %c0_14 = arith.constant 0 : index
    %c0_15 = arith.constant 0 : index
    %c0_16 = arith.constant 0 : index
    %13 = vector.load %arg5[%c0_14, %c0_15, %c0_16] : memref<2x2x32xf32, #tpu.memory_space<vmem>>, vector<1x2x32xf32>
    %14 = vector.shape_cast %13 : vector<1x2x32xf32> to vector<2x32xf32>
    %c0_17 = arith.constant 0 : index
    %c0_18 = arith.constant 0 : index
    %c0_19 = arith.constant 0 : index
    %15 = vector.load %arg6[%c0_17, %c0_18, %c0_19] : memref<2x2x32xf32, #tpu.memory_space<vmem>>, vector<1x2x32xf32>
    %16 = vector.shape_cast %15 : vector<1x2x32xf32> to vector<2x32xf32>
    %c1_20 = arith.constant 1 : index
    %c0_21 = arith.constant 0 : index
    %c0_22 = arith.constant 0 : index
    %17 = vector.load %arg5[%c1_20, %c0_21, %c0_22] : memref<2x2x32xf32, #tpu.memory_space<vmem>>, vector<1x2x32xf32>
    %18 = vector.shape_cast %17 : vector<1x2x32xf32> to vector<2x32xf32>
    %c1_23 = arith.constant 1 : index
    %c0_24 = arith.constant 0 : index
    %c0_25 = arith.constant 0 : index
    %19 = vector.load %arg6[%c1_23, %c0_24, %c0_25] : memref<2x2x32xf32, #tpu.memory_space<vmem>>, vector<1x2x32xf32>
    %20 = vector.shape_cast %19 : vector<1x2x32xf32> to vector<2x32xf32>
    %c0_26 = arith.constant 0 : index
    %c0_27 = arith.constant 0 : index
    %c0_28 = arith.constant 0 : index
    %21 = vector.load %arg9[%c0_26, %c0_27, %c0_28] : memref<8x2x256xf32, #tpu.memory_space<vmem>>, vector<1x2x128xf32>
    %22 = vector.shape_cast %21 : vector<1x2x128xf32> to vector<2x128xf32>
    %23 = arith.truncf %14 : vector<2x32xf32> to vector<2x32xbf16>
    %cst_29 = arith.constant dense<0.000000e+00> : vector<2x128xf32>
    %24 = tpu.matmul %23, %10, %cst_29 {dimension_numbers = #tpu.dot_dimension_numbers<[1], [0], [0], [1], [0, 0, 1, 1], [], []>} : vector<2x32xbf16>, vector<32x128xbf16>, vector<2x128xf32> -> vector<2x128xf32>
    %25 = arith.addf %22, %24 : vector<2x128xf32>
    %26 = vector.extract_strided_slice %25 {offsets = [0, 0], sizes = [2, 96], strides = [1, 1]} : vector<2x128xf32> to vector<2x96xf32>
    %27 = arith.negf %26 : vector<2x96xf32>
    %28 = math.exp %27 : vector<2x96xf32>
    %cst_30 = arith.constant 1.000000e+00 : f32
    %29 = vector.broadcast %cst_30 : f32 to vector<2x96xf32>
    %30 = arith.addf %29, %28 : vector<2x96xf32>
    %31 = arith.divf %29, %30 : vector<2x96xf32>
    %32 = vector.extract_strided_slice %31 {offsets = [0, 0], sizes = [2, 32], strides = [1, 1]} : vector<2x96xf32> to vector<2x32xf32>
    %33 = vector.extract_strided_slice %31 {offsets = [0, 32], sizes = [2, 32], strides = [1, 1]} : vector<2x96xf32> to vector<2x32xf32>
    %34 = vector.extract_strided_slice %31 {offsets = [0, 64], sizes = [2, 32], strides = [1, 1]} : vector<2x96xf32> to vector<2x32xf32>
    %35 = vector.extract_strided_slice %25 {offsets = [0, 96], sizes = [2, 32], strides = [1, 1]} : vector<2x128xf32> to vector<2x32xf32>
    %36 = math.tanh %35 : vector<2x32xf32>
    %37 = arith.mulf %33, %16 : vector<2x32xf32>
    %38 = arith.mulf %32, %36 : vector<2x32xf32>
    %39 = arith.addf %37, %38 : vector<2x32xf32>
    %40 = math.tanh %39 : vector<2x32xf32>
    %41 = arith.mulf %34, %40 : vector<2x32xf32>
    %c0_31 = arith.constant 0 : index
    %c0_32 = arith.constant 0 : index
    %c0_33 = arith.constant 0 : index
    %42 = vector.load %arg7[%c0_31, %c0_32, %c0_33] : memref<8x2x1xf32, #tpu.memory_space<vmem>>, vector<1x2x1xf32>
    %43 = vector.shape_cast %42 : vector<1x2x1xf32> to vector<2x1xf32>
    %44 = vector.broadcast %43 : vector<2x1xf32> to vector<2x32xf32>
    %45 = arith.mulf %41, %44 : vector<2x32xf32>
    %46 = arith.truncf %45 : vector<2x32xf32> to vector<2x32xbf16>
    %c0_34 = arith.constant 0 : index
    %c0_35 = arith.constant 0 : index
    %c0_36 = arith.constant 0 : index
    %47 = vector.load %arg8[%c0_34, %c0_35, %c0_36] : memref<8x2x64xbf16, #tpu.memory_space<vmem>>, vector<1x2x32xbf16>
    %48 = vector.shape_cast %47 : vector<1x2x32xbf16> to vector<2x32xbf16>
    %49 = vector.shape_cast %46 : vector<2x32xbf16> to vector<1x2x32xbf16>
    tpu.vector_store %arg8[%c0_34, %c0_35, %c0_36], %49 {strides = array<i32>} : memref<8x2x64xbf16, #tpu.memory_space<vmem>>, vector<1x2x32xbf16>,
    %50 = arith.subf %41, %14 : vector<2x32xf32>
    %51 = vector.broadcast %43 : vector<2x1xf32> to vector<2x32xf32>
    %52 = arith.mulf %51, %50 : vector<2x32xf32>
    %53 = arith.addf %14, %52 : vector<2x32xf32>
    %54 = arith.subf %39, %16 : vector<2x32xf32>
    %55 = vector.broadcast %43 : vector<2x1xf32> to vector<2x32xf32>
    %56 = arith.mulf %55, %54 : vector<2x32xf32>
    %57 = arith.addf %16, %56 : vector<2x32xf32>
    %c7 = arith.constant 7 : index
    %c0_37 = arith.constant 0 : index
    %c128 = arith.constant 128 : index
    %58 = vector.load %arg9[%c7, %c0_37, %c128] : memref<8x2x256xf32, #tpu.memory_space<vmem>>, vector<1x2x128xf32>
    %59 = vector.shape_cast %58 : vector<1x2x128xf32> to vector<2x128xf32>
    %60 = arith.truncf %18 : vector<2x32xf32> to vector<2x32xbf16>
    %cst_38 = arith.constant dense<0.000000e+00> : vector<2x128xf32>
    %61 = tpu.matmul %60, %12, %cst_38 {dimension_numbers = #tpu.dot_dimension_numbers<[1], [0], [0], [1], [0, 0, 1, 1], [], []>} : vector<2x32xbf16>, vector<32x128xbf16>, vector<2x128xf32> -> vector<2x128xf32>
    %62 = arith.addf %59, %61 : vector<2x128xf32>
    %63 = vector.extract_strided_slice %62 {offsets = [0, 0], sizes = [2, 96], strides = [1, 1]} : vector<2x128xf32> to vector<2x96xf32>
    %64 = arith.negf %63 : vector<2x96xf32>
    %65 = math.exp %64 : vector<2x96xf32>
    %cst_39 = arith.constant 1.000000e+00 : f32
    %66 = vector.broadcast %cst_39 : f32 to vector<2x96xf32>
    %67 = arith.addf %66, %65 : vector<2x96xf32>
    %68 = arith.divf %66, %67 : vector<2x96xf32>
    %69 = vector.extract_strided_slice %68 {offsets = [0, 0], sizes = [2, 32], strides = [1, 1]} : vector<2x96xf32> to vector<2x32xf32>
    %70 = vector.extract_strided_slice %68 {offsets = [0, 32], sizes = [2, 32], strides = [1, 1]} : vector<2x96xf32> to vector<2x32xf32>
    %71 = vector.extract_strided_slice %68 {offsets = [0, 64], sizes = [2, 32], strides = [1, 1]} : vector<2x96xf32> to vector<2x32xf32>
    %72 = vector.extract_strided_slice %62 {offsets = [0, 96], sizes = [2, 32], strides = [1, 1]} : vector<2x128xf32> to vector<2x32xf32>
    %73 = math.tanh %72 : vector<2x32xf32>
    %74 = arith.mulf %70, %20 : vector<2x32xf32>
    %75 = arith.mulf %69, %73 : vector<2x32xf32>
    %76 = arith.addf %74, %75 : vector<2x32xf32>
    %77 = math.tanh %76 : vector<2x32xf32>
    %78 = arith.mulf %71, %77 : vector<2x32xf32>
    %c7_40 = arith.constant 7 : index
    %c0_41 = arith.constant 0 : index
    %c0_42 = arith.constant 0 : index
    %79 = vector.load %arg7[%c7_40, %c0_41, %c0_42] : memref<8x2x1xf32, #tpu.memory_space<vmem>>, vector<1x2x1xf32>
    %80 = vector.shape_cast %79 : vector<1x2x1xf32> to vector<2x1xf32>
    %81 = vector.broadcast %80 : vector<2x1xf32> to vector<2x32xf32>
    %82 = arith.mulf %78, %81 : vector<2x32xf32>
    %83 = arith.truncf %82 : vector<2x32xf32> to vector<2x32xbf16>
    %c7_43 = arith.constant 7 : index
    %c0_44 = arith.constant 0 : index
    %c32 = arith.constant 32 : index
    %84 = vector.load %arg8[%c7_43, %c0_44, %c32] : memref<8x2x64xbf16, #tpu.memory_space<vmem>>, vector<1x2x32xbf16>
    %85 = vector.shape_cast %84 : vector<1x2x32xbf16> to vector<2x32xbf16>
    %86 = vector.shape_cast %83 : vector<2x32xbf16> to vector<1x2x32xbf16>
    tpu.vector_store %arg8[%c7_43, %c0_44, %c32], %86 {strides = array<i32>} : memref<8x2x64xbf16, #tpu.memory_space<vmem>>, vector<1x2x32xbf16>,
    %87 = arith.subf %78, %18 : vector<2x32xf32>
    %88 = vector.broadcast %80 : vector<2x1xf32> to vector<2x32xf32>
    %89 = arith.mulf %88, %87 : vector<2x32xf32>
    %90 = arith.addf %18, %89 : vector<2x32xf32>
    %91 = arith.subf %76, %20 : vector<2x32xf32>
    %92 = vector.broadcast %80 : vector<2x1xf32> to vector<2x32xf32>
    %93 = arith.mulf %92, %91 : vector<2x32xf32>
    %94 = arith.addf %20, %93 : vector<2x32xf32>
    %c1_45 = arith.constant 1 : index
    %c0_46 = arith.constant 0 : index
    %c0_47 = arith.constant 0 : index
    %95 = vector.load %arg9[%c1_45, %c0_46, %c0_47] : memref<8x2x256xf32, #tpu.memory_space<vmem>>, vector<1x2x128xf32>
    %96 = vector.shape_cast %95 : vector<1x2x128xf32> to vector<2x128xf32>
    %97 = arith.truncf %53 : vector<2x32xf32> to vector<2x32xbf16>
    %cst_48 = arith.constant dense<0.000000e+00> : vector<2x128xf32>
    %98 = tpu.matmul %97, %10, %cst_48 {dimension_numbers = #tpu.dot_dimension_numbers<[1], [0], [0], [1], [0, 0, 1, 1], [], []>} : vector<2x32xbf16>, vector<32x128xbf16>, vector<2x128xf32> -> vector<2x128xf32>
    %99 = arith.addf %96, %98 : vector<2x128xf32>
    %100 = vector.extract_strided_slice %99 {offsets = [0, 0], sizes = [2, 96], strides = [1, 1]} : vector<2x128xf32> to vector<2x96xf32>
    %101 = arith.negf %100 : vector<2x96xf32>
    %102 = math.exp %101 : vector<2x96xf32>
    %cst_49 = arith.constant 1.000000e+00 : f32
    %103 = vector.broadcast %cst_49 : f32 to vector<2x96xf32>
    %104 = arith.addf %103, %102 : vector<2x96xf32>
    %105 = arith.divf %103, %104 : vector<2x96xf32>
    %106 = vector.extract_strided_slice %105 {offsets = [0, 0], sizes = [2, 32], strides = [1, 1]} : vector<2x96xf32> to vector<2x32xf32>
    %107 = vector.extract_strided_slice %105 {offsets = [0, 32], sizes = [2, 32], strides = [1, 1]} : vector<2x96xf32> to vector<2x32xf32>
    %108 = vector.extract_strided_slice %105 {offsets = [0, 64], sizes = [2, 32], strides = [1, 1]} : vector<2x96xf32> to vector<2x32xf32>
    %109 = vector.extract_strided_slice %99 {offsets = [0, 96], sizes = [2, 32], strides = [1, 1]} : vector<2x128xf32> to vector<2x32xf32>
    %110 = math.tanh %109 : vector<2x32xf32>
    %111 = arith.mulf %107, %57 : vector<2x32xf32>
    %112 = arith.mulf %106, %110 : vector<2x32xf32>
    %113 = arith.addf %111, %112 : vector<2x32xf32>
    %114 = math.tanh %113 : vector<2x32xf32>
    %115 = arith.mulf %108, %114 : vector<2x32xf32>
    %c1_50 = arith.constant 1 : index
    %c0_51 = arith.constant 0 : index
    %c0_52 = arith.constant 0 : index
    %116 = vector.load %arg7[%c1_50, %c0_51, %c0_52] : memref<8x2x1xf32, #tpu.memory_space<vmem>>, vector<1x2x1xf32>
    %117 = vector.shape_cast %116 : vector<1x2x1xf32> to vector<2x1xf32>
    %118 = vector.broadcast %117 : vector<2x1xf32> to vector<2x32xf32>
    %119 = arith.mulf %115, %118 : vector<2x32xf32>
    %120 = arith.truncf %119 : vector<2x32xf32> to vector<2x32xbf16>
    %c1_53 = arith.constant 1 : index
    %c0_54 = arith.constant 0 : index
    %c0_55 = arith.constant 0 : index
    %121 = vector.load %arg8[%c1_53, %c0_54, %c0_55] : memref<8x2x64xbf16, #tpu.memory_space<vmem>>, vector<1x2x32xbf16>
    %122 = vector.shape_cast %121 : vector<1x2x32xbf16> to vector<2x32xbf16>
    %123 = vector.shape_cast %120 : vector<2x32xbf16> to vector<1x2x32xbf16>
    tpu.vector_store %arg8[%c1_53, %c0_54, %c0_55], %123 {strides = array<i32>} : memref<8x2x64xbf16, #tpu.memory_space<vmem>>, vector<1x2x32xbf16>,
    %124 = arith.subf %115, %53 : vector<2x32xf32>
    %125 = vector.broadcast %117 : vector<2x1xf32> to vector<2x32xf32>
    %126 = arith.mulf %125, %124 : vector<2x32xf32>
    %127 = arith.addf %53, %126 : vector<2x32xf32>
    %128 = arith.subf %113, %57 : vector<2x32xf32>
    %129 = vector.broadcast %117 : vector<2x1xf32> to vector<2x32xf32>
    %130 = arith.mulf %129, %128 : vector<2x32xf32>
    %131 = arith.addf %57, %130 : vector<2x32xf32>
    %c6 = arith.constant 6 : index
    %c0_56 = arith.constant 0 : index
    %c128_57 = arith.constant 128 : index
    %132 = vector.load %arg9[%c6, %c0_56, %c128_57] : memref<8x2x256xf32, #tpu.memory_space<vmem>>, vector<1x2x128xf32>
    %133 = vector.shape_cast %132 : vector<1x2x128xf32> to vector<2x128xf32>
    %134 = arith.truncf %90 : vector<2x32xf32> to vector<2x32xbf16>
    %cst_58 = arith.constant dense<0.000000e+00> : vector<2x128xf32>
    %135 = tpu.matmul %134, %12, %cst_58 {dimension_numbers = #tpu.dot_dimension_numbers<[1], [0], [0], [1], [0, 0, 1, 1], [], []>} : vector<2x32xbf16>, vector<32x128xbf16>, vector<2x128xf32> -> vector<2x128xf32>
    %136 = arith.addf %133, %135 : vector<2x128xf32>
    %137 = vector.extract_strided_slice %136 {offsets = [0, 0], sizes = [2, 96], strides = [1, 1]} : vector<2x128xf32> to vector<2x96xf32>
    %138 = arith.negf %137 : vector<2x96xf32>
    %139 = math.exp %138 : vector<2x96xf32>
    %cst_59 = arith.constant 1.000000e+00 : f32
    %140 = vector.broadcast %cst_59 : f32 to vector<2x96xf32>
    %141 = arith.addf %140, %139 : vector<2x96xf32>
    %142 = arith.divf %140, %141 : vector<2x96xf32>
    %143 = vector.extract_strided_slice %142 {offsets = [0, 0], sizes = [2, 32], strides = [1, 1]} : vector<2x96xf32> to vector<2x32xf32>
    %144 = vector.extract_strided_slice %142 {offsets = [0, 32], sizes = [2, 32], strides = [1, 1]} : vector<2x96xf32> to vector<2x32xf32>
    %145 = vector.extract_strided_slice %142 {offsets = [0, 64], sizes = [2, 32], strides = [1, 1]} : vector<2x96xf32> to vector<2x32xf32>
    %146 = vector.extract_strided_slice %136 {offsets = [0, 96], sizes = [2, 32], strides = [1, 1]} : vector<2x128xf32> to vector<2x32xf32>
    %147 = math.tanh %146 : vector<2x32xf32>
    %148 = arith.mulf %144, %94 : vector<2x32xf32>
    %149 = arith.mulf %143, %147 : vector<2x32xf32>
    %150 = arith.addf %148, %149 : vector<2x32xf32>
    %151 = math.tanh %150 : vector<2x32xf32>
    %152 = arith.mulf %145, %151 : vector<2x32xf32>
    %c6_60 = arith.constant 6 : index
    %c0_61 = arith.constant 0 : index
    %c0_62 = arith.constant 0 : index
    %153 = vector.load %arg7[%c6_60, %c0_61, %c0_62] : memref<8x2x1xf32, #tpu.memory_space<vmem>>, vector<1x2x1xf32>
    %154 = vector.shape_cast %153 : vector<1x2x1xf32> to vector<2x1xf32>
    %155 = vector.broadcast %154 : vector<2x1xf32> to vector<2x32xf32>
    %156 = arith.mulf %152, %155 : vector<2x32xf32>
    %157 = arith.truncf %156 : vector<2x32xf32> to vector<2x32xbf16>
    %c6_63 = arith.constant 6 : index
    %c0_64 = arith.constant 0 : index
    %c32_65 = arith.constant 32 : index
    %158 = vector.load %arg8[%c6_63, %c0_64, %c32_65] : memref<8x2x64xbf16, #tpu.memory_space<vmem>>, vector<1x2x32xbf16>
    %159 = vector.shape_cast %158 : vector<1x2x32xbf16> to vector<2x32xbf16>
    %160 = vector.shape_cast %157 : vector<2x32xbf16> to vector<1x2x32xbf16>
    tpu.vector_store %arg8[%c6_63, %c0_64, %c32_65], %160 {strides = array<i32>} : memref<8x2x64xbf16, #tpu.memory_space<vmem>>, vector<1x2x32xbf16>,
    %161 = arith.subf %152, %90 : vector<2x32xf32>
    %162 = vector.broadcast %154 : vector<2x1xf32> to vector<2x32xf32>
    %163 = arith.mulf %162, %161 : vector<2x32xf32>
    %164 = arith.addf %90, %163 : vector<2x32xf32>
    %165 = arith.subf %150, %94 : vector<2x32xf32>
    %166 = vector.broadcast %154 : vector<2x1xf32> to vector<2x32xf32>
    %167 = arith.mulf %166, %165 : vector<2x32xf32>
    %168 = arith.addf %94, %167 : vector<2x32xf32>
    %c2 = arith.constant 2 : index
    %c0_66 = arith.constant 0 : index
    %c0_67 = arith.constant 0 : index
    %169 = vector.load %arg9[%c2, %c0_66, %c0_67] : memref<8x2x256xf32, #tpu.memory_space<vmem>>, vector<1x2x128xf32>
    %170 = vector.shape_cast %169 : vector<1x2x128xf32> to vector<2x128xf32>
    %171 = arith.truncf %127 : vector<2x32xf32> to vector<2x32xbf16>
    %cst_68 = arith.constant dense<0.000000e+00> : vector<2x128xf32>
    %172 = tpu.matmul %171, %10, %cst_68 {dimension_numbers = #tpu.dot_dimension_numbers<[1], [0], [0], [1], [0, 0, 1, 1], [], []>} : vector<2x32xbf16>, vector<32x128xbf16>, vector<2x128xf32> -> vector<2x128xf32>
    %173 = arith.addf %170, %172 : vector<2x128xf32>
    %174 = vector.extract_strided_slice %173 {offsets = [0, 0], sizes = [2, 96], strides = [1, 1]} : vector<2x128xf32> to vector<2x96xf32>
    %175 = arith.negf %174 : vector<2x96xf32>
    %176 = math.exp %175 : vector<2x96xf32>
    %cst_69 = arith.constant 1.000000e+00 : f32
    %177 = vector.broadcast %cst_69 : f32 to vector<2x96xf32>
    %178 = arith.addf %177, %176 : vector<2x96xf32>
    %179 = arith.divf %177, %178 : vector<2x96xf32>
    %180 = vector.extract_strided_slice %179 {offsets = [0, 0], sizes = [2, 32], strides = [1, 1]} : vector<2x96xf32> to vector<2x32xf32>
    %181 = vector.extract_strided_slice %179 {offsets = [0, 32], sizes = [2, 32], strides = [1, 1]} : vector<2x96xf32> to vector<2x32xf32>
    %182 = vector.extract_strided_slice %179 {offsets = [0, 64], sizes = [2, 32], strides = [1, 1]} : vector<2x96xf32> to vector<2x32xf32>
    %183 = vector.extract_strided_slice %173 {offsets = [0, 96], sizes = [2, 32], strides = [1, 1]} : vector<2x128xf32> to vector<2x32xf32>
    %184 = math.tanh %183 : vector<2x32xf32>
    %185 = arith.mulf %181, %131 : vector<2x32xf32>
    %186 = arith.mulf %180, %184 : vector<2x32xf32>
    %187 = arith.addf %185, %186 : vector<2x32xf32>
    %188 = math.tanh %187 : vector<2x32xf32>
    %189 = arith.mulf %182, %188 : vector<2x32xf32>
    %c2_70 = arith.constant 2 : index
    %c0_71 = arith.constant 0 : index
    %c0_72 = arith.constant 0 : index
    %190 = vector.load %arg7[%c2_70, %c0_71, %c0_72] : memref<8x2x1xf32, #tpu.memory_space<vmem>>, vector<1x2x1xf32>
    %191 = vector.shape_cast %190 : vector<1x2x1xf32> to vector<2x1xf32>
    %192 = vector.broadcast %191 : vector<2x1xf32> to vector<2x32xf32>
    %193 = arith.mulf %189, %192 : vector<2x32xf32>
    %194 = arith.truncf %193 : vector<2x32xf32> to vector<2x32xbf16>
    %c2_73 = arith.constant 2 : index
    %c0_74 = arith.constant 0 : index
    %c0_75 = arith.constant 0 : index
    %195 = vector.load %arg8[%c2_73, %c0_74, %c0_75] : memref<8x2x64xbf16, #tpu.memory_space<vmem>>, vector<1x2x32xbf16>
    %196 = vector.shape_cast %195 : vector<1x2x32xbf16> to vector<2x32xbf16>
    %197 = vector.shape_cast %194 : vector<2x32xbf16> to vector<1x2x32xbf16>
    tpu.vector_store %arg8[%c2_73, %c0_74, %c0_75], %197 {strides = array<i32>} : memref<8x2x64xbf16, #tpu.memory_space<vmem>>, vector<1x2x32xbf16>,
    %198 = arith.subf %189, %127 : vector<2x32xf32>
    %199 = vector.broadcast %191 : vector<2x1xf32> to vector<2x32xf32>
    %200 = arith.mulf %199, %198 : vector<2x32xf32>
    %201 = arith.addf %127, %200 : vector<2x32xf32>
    %202 = arith.subf %187, %131 : vector<2x32xf32>
    %203 = vector.broadcast %191 : vector<2x1xf32> to vector<2x32xf32>
    %204 = arith.mulf %203, %202 : vector<2x32xf32>
    %205 = arith.addf %131, %204 : vector<2x32xf32>
    %c5 = arith.constant 5 : index
    %c0_76 = arith.constant 0 : index
    %c128_77 = arith.constant 128 : index
    %206 = vector.load %arg9[%c5, %c0_76, %c128_77] : memref<8x2x256xf32, #tpu.memory_space<vmem>>, vector<1x2x128xf32>
    %207 = vector.shape_cast %206 : vector<1x2x128xf32> to vector<2x128xf32>
    %208 = arith.truncf %164 : vector<2x32xf32> to vector<2x32xbf16>
    %cst_78 = arith.constant dense<0.000000e+00> : vector<2x128xf32>
    %209 = tpu.matmul %208, %12, %cst_78 {dimension_numbers = #tpu.dot_dimension_numbers<[1], [0], [0], [1], [0, 0, 1, 1], [], []>} : vector<2x32xbf16>, vector<32x128xbf16>, vector<2x128xf32> -> vector<2x128xf32>
    %210 = arith.addf %207, %209 : vector<2x128xf32>
    %211 = vector.extract_strided_slice %210 {offsets = [0, 0], sizes = [2, 96], strides = [1, 1]} : vector<2x128xf32> to vector<2x96xf32>
    %212 = arith.negf %211 : vector<2x96xf32>
    %213 = math.exp %212 : vector<2x96xf32>
    %cst_79 = arith.constant 1.000000e+00 : f32
    %214 = vector.broadcast %cst_79 : f32 to vector<2x96xf32>
    %215 = arith.addf %214, %213 : vector<2x96xf32>
    %216 = arith.divf %214, %215 : vector<2x96xf32>
    %217 = vector.extract_strided_slice %216 {offsets = [0, 0], sizes = [2, 32], strides = [1, 1]} : vector<2x96xf32> to vector<2x32xf32>
    %218 = vector.extract_strided_slice %216 {offsets = [0, 32], sizes = [2, 32], strides = [1, 1]} : vector<2x96xf32> to vector<2x32xf32>
    %219 = vector.extract_strided_slice %216 {offsets = [0, 64], sizes = [2, 32], strides = [1, 1]} : vector<2x96xf32> to vector<2x32xf32>
    %220 = vector.extract_strided_slice %210 {offsets = [0, 96], sizes = [2, 32], strides = [1, 1]} : vector<2x128xf32> to vector<2x32xf32>
    %221 = math.tanh %220 : vector<2x32xf32>
    %222 = arith.mulf %218, %168 : vector<2x32xf32>
    %223 = arith.mulf %217, %221 : vector<2x32xf32>
    %224 = arith.addf %222, %223 : vector<2x32xf32>
    %225 = math.tanh %224 : vector<2x32xf32>
    %226 = arith.mulf %219, %225 : vector<2x32xf32>
    %c5_80 = arith.constant 5 : index
    %c0_81 = arith.constant 0 : index
    %c0_82 = arith.constant 0 : index
    %227 = vector.load %arg7[%c5_80, %c0_81, %c0_82] : memref<8x2x1xf32, #tpu.memory_space<vmem>>, vector<1x2x1xf32>
    %228 = vector.shape_cast %227 : vector<1x2x1xf32> to vector<2x1xf32>
    %229 = vector.broadcast %228 : vector<2x1xf32> to vector<2x32xf32>
    %230 = arith.mulf %226, %229 : vector<2x32xf32>
    %231 = arith.truncf %230 : vector<2x32xf32> to vector<2x32xbf16>
    %c5_83 = arith.constant 5 : index
    %c0_84 = arith.constant 0 : index
    %c32_85 = arith.constant 32 : index
    %232 = vector.load %arg8[%c5_83, %c0_84, %c32_85] : memref<8x2x64xbf16, #tpu.memory_space<vmem>>, vector<1x2x32xbf16>
    %233 = vector.shape_cast %232 : vector<1x2x32xbf16> to vector<2x32xbf16>
    %234 = vector.shape_cast %231 : vector<2x32xbf16> to vector<1x2x32xbf16>
    tpu.vector_store %arg8[%c5_83, %c0_84, %c32_85], %234 {strides = array<i32>} : memref<8x2x64xbf16, #tpu.memory_space<vmem>>, vector<1x2x32xbf16>,
    %235 = arith.subf %226, %164 : vector<2x32xf32>
    %236 = vector.broadcast %228 : vector<2x1xf32> to vector<2x32xf32>
    %237 = arith.mulf %236, %235 : vector<2x32xf32>
    %238 = arith.addf %164, %237 : vector<2x32xf32>
    %239 = arith.subf %224, %168 : vector<2x32xf32>
    %240 = vector.broadcast %228 : vector<2x1xf32> to vector<2x32xf32>
    %241 = arith.mulf %240, %239 : vector<2x32xf32>
    %242 = arith.addf %168, %241 : vector<2x32xf32>
    %c3 = arith.constant 3 : index
    %c0_86 = arith.constant 0 : index
    %c0_87 = arith.constant 0 : index
    %243 = vector.load %arg9[%c3, %c0_86, %c0_87] : memref<8x2x256xf32, #tpu.memory_space<vmem>>, vector<1x2x128xf32>
    %244 = vector.shape_cast %243 : vector<1x2x128xf32> to vector<2x128xf32>
    %245 = arith.truncf %201 : vector<2x32xf32> to vector<2x32xbf16>
    %cst_88 = arith.constant dense<0.000000e+00> : vector<2x128xf32>
    %246 = tpu.matmul %245, %10, %cst_88 {dimension_numbers = #tpu.dot_dimension_numbers<[1], [0], [0], [1], [0, 0, 1, 1], [], []>} : vector<2x32xbf16>, vector<32x128xbf16>, vector<2x128xf32> -> vector<2x128xf32>
    %247 = arith.addf %244, %246 : vector<2x128xf32>
    %248 = vector.extract_strided_slice %247 {offsets = [0, 0], sizes = [2, 96], strides = [1, 1]} : vector<2x128xf32> to vector<2x96xf32>
    %249 = arith.negf %248 : vector<2x96xf32>
    %250 = math.exp %249 : vector<2x96xf32>
    %cst_89 = arith.constant 1.000000e+00 : f32
    %251 = vector.broadcast %cst_89 : f32 to vector<2x96xf32>
    %252 = arith.addf %251, %250 : vector<2x96xf32>
    %253 = arith.divf %251, %252 : vector<2x96xf32>
    %254 = vector.extract_strided_slice %253 {offsets = [0, 0], sizes = [2, 32], strides = [1, 1]} : vector<2x96xf32> to vector<2x32xf32>
    %255 = vector.extract_strided_slice %253 {offsets = [0, 32], sizes = [2, 32], strides = [1, 1]} : vector<2x96xf32> to vector<2x32xf32>
    %256 = vector.extract_strided_slice %253 {offsets = [0, 64], sizes = [2, 32], strides = [1, 1]} : vector<2x96xf32> to vector<2x32xf32>
    %257 = vector.extract_strided_slice %247 {offsets = [0, 96], sizes = [2, 32], strides = [1, 1]} : vector<2x128xf32> to vector<2x32xf32>
    %258 = math.tanh %257 : vector<2x32xf32>
    %259 = arith.mulf %255, %205 : vector<2x32xf32>
    %260 = arith.mulf %254, %258 : vector<2x32xf32>
    %261 = arith.addf %259, %260 : vector<2x32xf32>
    %262 = math.tanh %261 : vector<2x32xf32>
    %263 = arith.mulf %256, %262 : vector<2x32xf32>
    %c3_90 = arith.constant 3 : index
    %c0_91 = arith.constant 0 : index
    %c0_92 = arith.constant 0 : index
    %264 = vector.load %arg7[%c3_90, %c0_91, %c0_92] : memref<8x2x1xf32, #tpu.memory_space<vmem>>, vector<1x2x1xf32>
    %265 = vector.shape_cast %264 : vector<1x2x1xf32> to vector<2x1xf32>
    %266 = vector.broadcast %265 : vector<2x1xf32> to vector<2x32xf32>
    %267 = arith.mulf %263, %266 : vector<2x32xf32>
    %268 = arith.truncf %267 : vector<2x32xf32> to vector<2x32xbf16>
    %c3_93 = arith.constant 3 : index
    %c0_94 = arith.constant 0 : index
    %c0_95 = arith.constant 0 : index
    %269 = vector.load %arg8[%c3_93, %c0_94, %c0_95] : memref<8x2x64xbf16, #tpu.memory_space<vmem>>, vector<1x2x32xbf16>
    %270 = vector.shape_cast %269 : vector<1x2x32xbf16> to vector<2x32xbf16>
    %271 = vector.shape_cast %268 : vector<2x32xbf16> to vector<1x2x32xbf16>
    tpu.vector_store %arg8[%c3_93, %c0_94, %c0_95], %271 {strides = array<i32>} : memref<8x2x64xbf16, #tpu.memory_space<vmem>>, vector<1x2x32xbf16>,
    %272 = arith.subf %263, %201 : vector<2x32xf32>
    %273 = vector.broadcast %265 : vector<2x1xf32> to vector<2x32xf32>
    %274 = arith.mulf %273, %272 : vector<2x32xf32>
    %275 = arith.addf %201, %274 : vector<2x32xf32>
    %276 = arith.subf %261, %205 : vector<2x32xf32>
    %277 = vector.broadcast %265 : vector<2x1xf32> to vector<2x32xf32>
    %278 = arith.mulf %277, %276 : vector<2x32xf32>
    %279 = arith.addf %205, %278 : vector<2x32xf32>
    %c4 = arith.constant 4 : index
    %c0_96 = arith.constant 0 : index
    %c128_97 = arith.constant 128 : index
    %280 = vector.load %arg9[%c4, %c0_96, %c128_97] : memref<8x2x256xf32, #tpu.memory_space<vmem>>, vector<1x2x128xf32>
    %281 = vector.shape_cast %280 : vector<1x2x128xf32> to vector<2x128xf32>
    %282 = arith.truncf %238 : vector<2x32xf32> to vector<2x32xbf16>
    %cst_98 = arith.constant dense<0.000000e+00> : vector<2x128xf32>
    %283 = tpu.matmul %282, %12, %cst_98 {dimension_numbers = #tpu.dot_dimension_numbers<[1], [0], [0], [1], [0, 0, 1, 1], [], []>} : vector<2x32xbf16>, vector<32x128xbf16>, vector<2x128xf32> -> vector<2x128xf32>
    %284 = arith.addf %281, %283 : vector<2x128xf32>
    %285 = vector.extract_strided_slice %284 {offsets = [0, 0], sizes = [2, 96], strides = [1, 1]} : vector<2x128xf32> to vector<2x96xf32>
    %286 = arith.negf %285 : vector<2x96xf32>
    %287 = math.exp %286 : vector<2x96xf32>
    %cst_99 = arith.constant 1.000000e+00 : f32
    %288 = vector.broadcast %cst_99 : f32 to vector<2x96xf32>
    %289 = arith.addf %288, %287 : vector<2x96xf32>
    %290 = arith.divf %288, %289 : vector<2x96xf32>
    %291 = vector.extract_strided_slice %290 {offsets = [0, 0], sizes = [2, 32], strides = [1, 1]} : vector<2x96xf32> to vector<2x32xf32>
    %292 = vector.extract_strided_slice %290 {offsets = [0, 32], sizes = [2, 32], strides = [1, 1]} : vector<2x96xf32> to vector<2x32xf32>
    %293 = vector.extract_strided_slice %290 {offsets = [0, 64], sizes = [2, 32], strides = [1, 1]} : vector<2x96xf32> to vector<2x32xf32>
    %294 = vector.extract_strided_slice %284 {offsets = [0, 96], sizes = [2, 32], strides = [1, 1]} : vector<2x128xf32> to vector<2x32xf32>
    %295 = math.tanh %294 : vector<2x32xf32>
    %296 = arith.mulf %292, %242 : vector<2x32xf32>
    %297 = arith.mulf %291, %295 : vector<2x32xf32>
    %298 = arith.addf %296, %297 : vector<2x32xf32>
    %299 = math.tanh %298 : vector<2x32xf32>
    %300 = arith.mulf %293, %299 : vector<2x32xf32>
    %c4_100 = arith.constant 4 : index
    %c0_101 = arith.constant 0 : index
    %c0_102 = arith.constant 0 : index
    %301 = vector.load %arg7[%c4_100, %c0_101, %c0_102] : memref<8x2x1xf32, #tpu.memory_space<vmem>>, vector<1x2x1xf32>
    %302 = vector.shape_cast %301 : vector<1x2x1xf32> to vector<2x1xf32>
    %303 = vector.broadcast %302 : vector<2x1xf32> to vector<2x32xf32>
    %304 = arith.mulf %300, %303 : vector<2x32xf32>
    %305 = arith.truncf %304 : vector<2x32xf32> to vector<2x32xbf16>
    %c4_103 = arith.constant 4 : index
    %c0_104 = arith.constant 0 : index
    %c32_105 = arith.constant 32 : index
    %306 = vector.load %arg8[%c4_103, %c0_104, %c32_105] : memref<8x2x64xbf16, #tpu.memory_space<vmem>>, vector<1x2x32xbf16>
    %307 = vector.shape_cast %306 : vector<1x2x32xbf16> to vector<2x32xbf16>
    %308 = vector.shape_cast %305 : vector<2x32xbf16> to vector<1x2x32xbf16>
    tpu.vector_store %arg8[%c4_103, %c0_104, %c32_105], %308 {strides = array<i32>} : memref<8x2x64xbf16, #tpu.memory_space<vmem>>, vector<1x2x32xbf16>,
    %309 = arith.subf %300, %238 : vector<2x32xf32>
    %310 = vector.broadcast %302 : vector<2x1xf32> to vector<2x32xf32>
    %311 = arith.mulf %310, %309 : vector<2x32xf32>
    %312 = arith.addf %238, %311 : vector<2x32xf32>
    %313 = arith.subf %298, %242 : vector<2x32xf32>
    %314 = vector.broadcast %302 : vector<2x1xf32> to vector<2x32xf32>
    %315 = arith.mulf %314, %313 : vector<2x32xf32>
    %316 = arith.addf %242, %315 : vector<2x32xf32>
    %c4_106 = arith.constant 4 : index
    %c0_107 = arith.constant 0 : index
    %c0_108 = arith.constant 0 : index
    %317 = vector.load %arg9[%c4_106, %c0_107, %c0_108] : memref<8x2x256xf32, #tpu.memory_space<vmem>>, vector<1x2x128xf32>
    %318 = vector.shape_cast %317 : vector<1x2x128xf32> to vector<2x128xf32>
    %319 = arith.truncf %275 : vector<2x32xf32> to vector<2x32xbf16>
    %cst_109 = arith.constant dense<0.000000e+00> : vector<2x128xf32>
    %320 = tpu.matmul %319, %10, %cst_109 {dimension_numbers = #tpu.dot_dimension_numbers<[1], [0], [0], [1], [0, 0, 1, 1], [], []>} : vector<2x32xbf16>, vector<32x128xbf16>, vector<2x128xf32> -> vector<2x128xf32>
    %321 = arith.addf %318, %320 : vector<2x128xf32>
    %322 = vector.extract_strided_slice %321 {offsets = [0, 0], sizes = [2, 96], strides = [1, 1]} : vector<2x128xf32> to vector<2x96xf32>
    %323 = arith.negf %322 : vector<2x96xf32>
    %324 = math.exp %323 : vector<2x96xf32>
    %cst_110 = arith.constant 1.000000e+00 : f32
    %325 = vector.broadcast %cst_110 : f32 to vector<2x96xf32>
    %326 = arith.addf %325, %324 : vector<2x96xf32>
    %327 = arith.divf %325, %326 : vector<2x96xf32>
    %328 = vector.extract_strided_slice %327 {offsets = [0, 0], sizes = [2, 32], strides = [1, 1]} : vector<2x96xf32> to vector<2x32xf32>
    %329 = vector.extract_strided_slice %327 {offsets = [0, 32], sizes = [2, 32], strides = [1, 1]} : vector<2x96xf32> to vector<2x32xf32>
    %330 = vector.extract_strided_slice %327 {offsets = [0, 64], sizes = [2, 32], strides = [1, 1]} : vector<2x96xf32> to vector<2x32xf32>
    %331 = vector.extract_strided_slice %321 {offsets = [0, 96], sizes = [2, 32], strides = [1, 1]} : vector<2x128xf32> to vector<2x32xf32>
    %332 = math.tanh %331 : vector<2x32xf32>
    %333 = arith.mulf %329, %279 : vector<2x32xf32>
    %334 = arith.mulf %328, %332 : vector<2x32xf32>
    %335 = arith.addf %333, %334 : vector<2x32xf32>
    %336 = math.tanh %335 : vector<2x32xf32>
    %337 = arith.mulf %330, %336 : vector<2x32xf32>
    %c4_111 = arith.constant 4 : index
    %c0_112 = arith.constant 0 : index
    %c0_113 = arith.constant 0 : index
    %338 = vector.load %arg7[%c4_111, %c0_112, %c0_113] : memref<8x2x1xf32, #tpu.memory_space<vmem>>, vector<1x2x1xf32>
    %339 = vector.shape_cast %338 : vector<1x2x1xf32> to vector<2x1xf32>
    %340 = vector.broadcast %339 : vector<2x1xf32> to vector<2x32xf32>
    %341 = arith.mulf %337, %340 : vector<2x32xf32>
    %342 = arith.truncf %341 : vector<2x32xf32> to vector<2x32xbf16>
    %c4_114 = arith.constant 4 : index
    %c0_115 = arith.constant 0 : index
    %c0_116 = arith.constant 0 : index
    %343 = vector.load %arg8[%c4_114, %c0_115, %c0_116] : memref<8x2x64xbf16, #tpu.memory_space<vmem>>, vector<1x2x32xbf16>
    %344 = vector.shape_cast %343 : vector<1x2x32xbf16> to vector<2x32xbf16>
    %345 = vector.shape_cast %342 : vector<2x32xbf16> to vector<1x2x32xbf16>
    tpu.vector_store %arg8[%c4_114, %c0_115, %c0_116], %345 {strides = array<i32>} : memref<8x2x64xbf16, #tpu.memory_space<vmem>>, vector<1x2x32xbf16>,
    %346 = arith.subf %337, %275 : vector<2x32xf32>
    %347 = vector.broadcast %339 : vector<2x1xf32> to vector<2x32xf32>
    %348 = arith.mulf %347, %346 : vector<2x32xf32>
    %349 = arith.addf %275, %348 : vector<2x32xf32>
    %350 = arith.subf %335, %279 : vector<2x32xf32>
    %351 = vector.broadcast %339 : vector<2x1xf32> to vector<2x32xf32>
    %352 = arith.mulf %351, %350 : vector<2x32xf32>
    %353 = arith.addf %279, %352 : vector<2x32xf32>
    %c3_117 = arith.constant 3 : index
    %c0_118 = arith.constant 0 : index
    %c128_119 = arith.constant 128 : index
    %354 = vector.load %arg9[%c3_117, %c0_118, %c128_119] : memref<8x2x256xf32, #tpu.memory_space<vmem>>, vector<1x2x128xf32>
    %355 = vector.shape_cast %354 : vector<1x2x128xf32> to vector<2x128xf32>
    %356 = arith.truncf %312 : vector<2x32xf32> to vector<2x32xbf16>
    %cst_120 = arith.constant dense<0.000000e+00> : vector<2x128xf32>
    %357 = tpu.matmul %356, %12, %cst_120 {dimension_numbers = #tpu.dot_dimension_numbers<[1], [0], [0], [1], [0, 0, 1, 1], [], []>} : vector<2x32xbf16>, vector<32x128xbf16>, vector<2x128xf32> -> vector<2x128xf32>
    %358 = arith.addf %355, %357 : vector<2x128xf32>
    %359 = vector.extract_strided_slice %358 {offsets = [0, 0], sizes = [2, 96], strides = [1, 1]} : vector<2x128xf32> to vector<2x96xf32>
    %360 = arith.negf %359 : vector<2x96xf32>
    %361 = math.exp %360 : vector<2x96xf32>
    %cst_121 = arith.constant 1.000000e+00 : f32
    %362 = vector.broadcast %cst_121 : f32 to vector<2x96xf32>
    %363 = arith.addf %362, %361 : vector<2x96xf32>
    %364 = arith.divf %362, %363 : vector<2x96xf32>
    %365 = vector.extract_strided_slice %364 {offsets = [0, 0], sizes = [2, 32], strides = [1, 1]} : vector<2x96xf32> to vector<2x32xf32>
    %366 = vector.extract_strided_slice %364 {offsets = [0, 32], sizes = [2, 32], strides = [1, 1]} : vector<2x96xf32> to vector<2x32xf32>
    %367 = vector.extract_strided_slice %364 {offsets = [0, 64], sizes = [2, 32], strides = [1, 1]} : vector<2x96xf32> to vector<2x32xf32>
    %368 = vector.extract_strided_slice %358 {offsets = [0, 96], sizes = [2, 32], strides = [1, 1]} : vector<2x128xf32> to vector<2x32xf32>
    %369 = math.tanh %368 : vector<2x32xf32>
    %370 = arith.mulf %366, %316 : vector<2x32xf32>
    %371 = arith.mulf %365, %369 : vector<2x32xf32>
    %372 = arith.addf %370, %371 : vector<2x32xf32>
    %373 = math.tanh %372 : vector<2x32xf32>
    %374 = arith.mulf %367, %373 : vector<2x32xf32>
    %c3_122 = arith.constant 3 : index
    %c0_123 = arith.constant 0 : index
    %c0_124 = arith.constant 0 : index
    %375 = vector.load %arg7[%c3_122, %c0_123, %c0_124] : memref<8x2x1xf32, #tpu.memory_space<vmem>>, vector<1x2x1xf32>
    %376 = vector.shape_cast %375 : vector<1x2x1xf32> to vector<2x1xf32>
    %377 = vector.broadcast %376 : vector<2x1xf32> to vector<2x32xf32>
    %378 = arith.mulf %374, %377 : vector<2x32xf32>
    %379 = arith.truncf %378 : vector<2x32xf32> to vector<2x32xbf16>
    %c3_125 = arith.constant 3 : index
    %c0_126 = arith.constant 0 : index
    %c32_127 = arith.constant 32 : index
    %380 = vector.load %arg8[%c3_125, %c0_126, %c32_127] : memref<8x2x64xbf16, #tpu.memory_space<vmem>>, vector<1x2x32xbf16>
    %381 = vector.shape_cast %380 : vector<1x2x32xbf16> to vector<2x32xbf16>
    %382 = vector.shape_cast %379 : vector<2x32xbf16> to vector<1x2x32xbf16>
    tpu.vector_store %arg8[%c3_125, %c0_126, %c32_127], %382 {strides = array<i32>} : memref<8x2x64xbf16, #tpu.memory_space<vmem>>, vector<1x2x32xbf16>,
    %383 = arith.subf %374, %312 : vector<2x32xf32>
    %384 = vector.broadcast %376 : vector<2x1xf32> to vector<2x32xf32>
    %385 = arith.mulf %384, %383 : vector<2x32xf32>
    %386 = arith.addf %312, %385 : vector<2x32xf32>
    %387 = arith.subf %372, %316 : vector<2x32xf32>
    %388 = vector.broadcast %376 : vector<2x1xf32> to vector<2x32xf32>
    %389 = arith.mulf %388, %387 : vector<2x32xf32>
    %390 = arith.addf %316, %389 : vector<2x32xf32>
    %c5_128 = arith.constant 5 : index
    %c0_129 = arith.constant 0 : index
    %c0_130 = arith.constant 0 : index
    %391 = vector.load %arg9[%c5_128, %c0_129, %c0_130] : memref<8x2x256xf32, #tpu.memory_space<vmem>>, vector<1x2x128xf32>
    %392 = vector.shape_cast %391 : vector<1x2x128xf32> to vector<2x128xf32>
    %393 = arith.truncf %349 : vector<2x32xf32> to vector<2x32xbf16>
    %cst_131 = arith.constant dense<0.000000e+00> : vector<2x128xf32>
    %394 = tpu.matmul %393, %10, %cst_131 {dimension_numbers = #tpu.dot_dimension_numbers<[1], [0], [0], [1], [0, 0, 1, 1], [], []>} : vector<2x32xbf16>, vector<32x128xbf16>, vector<2x128xf32> -> vector<2x128xf32>
    %395 = arith.addf %392, %394 : vector<2x128xf32>
    %396 = vector.extract_strided_slice %395 {offsets = [0, 0], sizes = [2, 96], strides = [1, 1]} : vector<2x128xf32> to vector<2x96xf32>
    %397 = arith.negf %396 : vector<2x96xf32>
    %398 = math.exp %397 : vector<2x96xf32>
    %cst_132 = arith.constant 1.000000e+00 : f32
    %399 = vector.broadcast %cst_132 : f32 to vector<2x96xf32>
    %400 = arith.addf %399, %398 : vector<2x96xf32>
    %401 = arith.divf %399, %400 : vector<2x96xf32>
    %402 = vector.extract_strided_slice %401 {offsets = [0, 0], sizes = [2, 32], strides = [1, 1]} : vector<2x96xf32> to vector<2x32xf32>
    %403 = vector.extract_strided_slice %401 {offsets = [0, 32], sizes = [2, 32], strides = [1, 1]} : vector<2x96xf32> to vector<2x32xf32>
    %404 = vector.extract_strided_slice %401 {offsets = [0, 64], sizes = [2, 32], strides = [1, 1]} : vector<2x96xf32> to vector<2x32xf32>
    %405 = vector.extract_strided_slice %395 {offsets = [0, 96], sizes = [2, 32], strides = [1, 1]} : vector<2x128xf32> to vector<2x32xf32>
    %406 = math.tanh %405 : vector<2x32xf32>
    %407 = arith.mulf %403, %353 : vector<2x32xf32>
    %408 = arith.mulf %402, %406 : vector<2x32xf32>
    %409 = arith.addf %407, %408 : vector<2x32xf32>
    %410 = math.tanh %409 : vector<2x32xf32>
    %411 = arith.mulf %404, %410 : vector<2x32xf32>
    %c5_133 = arith.constant 5 : index
    %c0_134 = arith.constant 0 : index
    %c0_135 = arith.constant 0 : index
    %412 = vector.load %arg7[%c5_133, %c0_134, %c0_135] : memref<8x2x1xf32, #tpu.memory_space<vmem>>, vector<1x2x1xf32>
    %413 = vector.shape_cast %412 : vector<1x2x1xf32> to vector<2x1xf32>
    %414 = vector.broadcast %413 : vector<2x1xf32> to vector<2x32xf32>
    %415 = arith.mulf %411, %414 : vector<2x32xf32>
    %416 = arith.truncf %415 : vector<2x32xf32> to vector<2x32xbf16>
    %c5_136 = arith.constant 5 : index
    %c0_137 = arith.constant 0 : index
    %c0_138 = arith.constant 0 : index
    %417 = vector.load %arg8[%c5_136, %c0_137, %c0_138] : memref<8x2x64xbf16, #tpu.memory_space<vmem>>, vector<1x2x32xbf16>
    %418 = vector.shape_cast %417 : vector<1x2x32xbf16> to vector<2x32xbf16>
    %419 = vector.shape_cast %416 : vector<2x32xbf16> to vector<1x2x32xbf16>
    tpu.vector_store %arg8[%c5_136, %c0_137, %c0_138], %419 {strides = array<i32>} : memref<8x2x64xbf16, #tpu.memory_space<vmem>>, vector<1x2x32xbf16>,
    %420 = arith.subf %411, %349 : vector<2x32xf32>
    %421 = vector.broadcast %413 : vector<2x1xf32> to vector<2x32xf32>
    %422 = arith.mulf %421, %420 : vector<2x32xf32>
    %423 = arith.addf %349, %422 : vector<2x32xf32>
    %424 = arith.subf %409, %353 : vector<2x32xf32>
    %425 = vector.broadcast %413 : vector<2x1xf32> to vector<2x32xf32>
    %426 = arith.mulf %425, %424 : vector<2x32xf32>
    %427 = arith.addf %353, %426 : vector<2x32xf32>
    %c2_139 = arith.constant 2 : index
    %c0_140 = arith.constant 0 : index
    %c128_141 = arith.constant 128 : index
    %428 = vector.load %arg9[%c2_139, %c0_140, %c128_141] : memref<8x2x256xf32, #tpu.memory_space<vmem>>, vector<1x2x128xf32>
    %429 = vector.shape_cast %428 : vector<1x2x128xf32> to vector<2x128xf32>
    %430 = arith.truncf %386 : vector<2x32xf32> to vector<2x32xbf16>
    %cst_142 = arith.constant dense<0.000000e+00> : vector<2x128xf32>
    %431 = tpu.matmul %430, %12, %cst_142 {dimension_numbers = #tpu.dot_dimension_numbers<[1], [0], [0], [1], [0, 0, 1, 1], [], []>} : vector<2x32xbf16>, vector<32x128xbf16>, vector<2x128xf32> -> vector<2x128xf32>
    %432 = arith.addf %429, %431 : vector<2x128xf32>
    %433 = vector.extract_strided_slice %432 {offsets = [0, 0], sizes = [2, 96], strides = [1, 1]} : vector<2x128xf32> to vector<2x96xf32>
    %434 = arith.negf %433 : vector<2x96xf32>
    %435 = math.exp %434 : vector<2x96xf32>
    %cst_143 = arith.constant 1.000000e+00 : f32
    %436 = vector.broadcast %cst_143 : f32 to vector<2x96xf32>
    %437 = arith.addf %436, %435 : vector<2x96xf32>
    %438 = arith.divf %436, %437 : vector<2x96xf32>
    %439 = vector.extract_strided_slice %438 {offsets = [0, 0], sizes = [2, 32], strides = [1, 1]} : vector<2x96xf32> to vector<2x32xf32>
    %440 = vector.extract_strided_slice %438 {offsets = [0, 32], sizes = [2, 32], strides = [1, 1]} : vector<2x96xf32> to vector<2x32xf32>
    %441 = vector.extract_strided_slice %438 {offsets = [0, 64], sizes = [2, 32], strides = [1, 1]} : vector<2x96xf32> to vector<2x32xf32>
    %442 = vector.extract_strided_slice %432 {offsets = [0, 96], sizes = [2, 32], strides = [1, 1]} : vector<2x128xf32> to vector<2x32xf32>
    %443 = math.tanh %442 : vector<2x32xf32>
    %444 = arith.mulf %440, %390 : vector<2x32xf32>
    %445 = arith.mulf %439, %443 : vector<2x32xf32>
    %446 = arith.addf %444, %445 : vector<2x32xf32>
    %447 = math.tanh %446 : vector<2x32xf32>
    %448 = arith.mulf %441, %447 : vector<2x32xf32>
    %c2_144 = arith.constant 2 : index
    %c0_145 = arith.constant 0 : index
    %c0_146 = arith.constant 0 : index
    %449 = vector.load %arg7[%c2_144, %c0_145, %c0_146] : memref<8x2x1xf32, #tpu.memory_space<vmem>>, vector<1x2x1xf32>
    %450 = vector.shape_cast %449 : vector<1x2x1xf32> to vector<2x1xf32>
    %451 = vector.broadcast %450 : vector<2x1xf32> to vector<2x32xf32>
    %452 = arith.mulf %448, %451 : vector<2x32xf32>
    %453 = arith.truncf %452 : vector<2x32xf32> to vector<2x32xbf16>
    %c2_147 = arith.constant 2 : index
    %c0_148 = arith.constant 0 : index
    %c32_149 = arith.constant 32 : index
    %454 = vector.load %arg8[%c2_147, %c0_148, %c32_149] : memref<8x2x64xbf16, #tpu.memory_space<vmem>>, vector<1x2x32xbf16>
    %455 = vector.shape_cast %454 : vector<1x2x32xbf16> to vector<2x32xbf16>
    %456 = vector.shape_cast %453 : vector<2x32xbf16> to vector<1x2x32xbf16>
    tpu.vector_store %arg8[%c2_147, %c0_148, %c32_149], %456 {strides = array<i32>} : memref<8x2x64xbf16, #tpu.memory_space<vmem>>, vector<1x2x32xbf16>,
    %457 = arith.subf %448, %386 : vector<2x32xf32>
    %458 = vector.broadcast %450 : vector<2x1xf32> to vector<2x32xf32>
    %459 = arith.mulf %458, %457 : vector<2x32xf32>
    %460 = arith.addf %386, %459 : vector<2x32xf32>
    %461 = arith.subf %446, %390 : vector<2x32xf32>
    %462 = vector.broadcast %450 : vector<2x1xf32> to vector<2x32xf32>
    %463 = arith.mulf %462, %461 : vector<2x32xf32>
    %464 = arith.addf %390, %463 : vector<2x32xf32>
    %c6_150 = arith.constant 6 : index
    %c0_151 = arith.constant 0 : index
    %c0_152 = arith.constant 0 : index
    %465 = vector.load %arg9[%c6_150, %c0_151, %c0_152] : memref<8x2x256xf32, #tpu.memory_space<vmem>>, vector<1x2x128xf32>
    %466 = vector.shape_cast %465 : vector<1x2x128xf32> to vector<2x128xf32>
    %467 = arith.truncf %423 : vector<2x32xf32> to vector<2x32xbf16>
    %cst_153 = arith.constant dense<0.000000e+00> : vector<2x128xf32>
    %468 = tpu.matmul %467, %10, %cst_153 {dimension_numbers = #tpu.dot_dimension_numbers<[1], [0], [0], [1], [0, 0, 1, 1], [], []>} : vector<2x32xbf16>, vector<32x128xbf16>, vector<2x128xf32> -> vector<2x128xf32>
    %469 = arith.addf %466, %468 : vector<2x128xf32>
    %470 = vector.extract_strided_slice %469 {offsets = [0, 0], sizes = [2, 96], strides = [1, 1]} : vector<2x128xf32> to vector<2x96xf32>
    %471 = arith.negf %470 : vector<2x96xf32>
    %472 = math.exp %471 : vector<2x96xf32>
    %cst_154 = arith.constant 1.000000e+00 : f32
    %473 = vector.broadcast %cst_154 : f32 to vector<2x96xf32>
    %474 = arith.addf %473, %472 : vector<2x96xf32>
    %475 = arith.divf %473, %474 : vector<2x96xf32>
    %476 = vector.extract_strided_slice %475 {offsets = [0, 0], sizes = [2, 32], strides = [1, 1]} : vector<2x96xf32> to vector<2x32xf32>
    %477 = vector.extract_strided_slice %475 {offsets = [0, 32], sizes = [2, 32], strides = [1, 1]} : vector<2x96xf32> to vector<2x32xf32>
    %478 = vector.extract_strided_slice %475 {offsets = [0, 64], sizes = [2, 32], strides = [1, 1]} : vector<2x96xf32> to vector<2x32xf32>
    %479 = vector.extract_strided_slice %469 {offsets = [0, 96], sizes = [2, 32], strides = [1, 1]} : vector<2x128xf32> to vector<2x32xf32>
    %480 = math.tanh %479 : vector<2x32xf32>
    %481 = arith.mulf %477, %427 : vector<2x32xf32>
    %482 = arith.mulf %476, %480 : vector<2x32xf32>
    %483 = arith.addf %481, %482 : vector<2x32xf32>
    %484 = math.tanh %483 : vector<2x32xf32>
    %485 = arith.mulf %478, %484 : vector<2x32xf32>
    %c6_155 = arith.constant 6 : index
    %c0_156 = arith.constant 0 : index
    %c0_157 = arith.constant 0 : index
    %486 = vector.load %arg7[%c6_155, %c0_156, %c0_157] : memref<8x2x1xf32, #tpu.memory_space<vmem>>, vector<1x2x1xf32>
    %487 = vector.shape_cast %486 : vector<1x2x1xf32> to vector<2x1xf32>
    %488 = vector.broadcast %487 : vector<2x1xf32> to vector<2x32xf32>
    %489 = arith.mulf %485, %488 : vector<2x32xf32>
    %490 = arith.truncf %489 : vector<2x32xf32> to vector<2x32xbf16>
    %c6_158 = arith.constant 6 : index
    %c0_159 = arith.constant 0 : index
    %c0_160 = arith.constant 0 : index
    %491 = vector.load %arg8[%c6_158, %c0_159, %c0_160] : memref<8x2x64xbf16, #tpu.memory_space<vmem>>, vector<1x2x32xbf16>
    %492 = vector.shape_cast %491 : vector<1x2x32xbf16> to vector<2x32xbf16>
    %493 = vector.shape_cast %490 : vector<2x32xbf16> to vector<1x2x32xbf16>
    tpu.vector_store %arg8[%c6_158, %c0_159, %c0_160], %493 {strides = array<i32>} : memref<8x2x64xbf16, #tpu.memory_space<vmem>>, vector<1x2x32xbf16>,
    %494 = arith.subf %485, %423 : vector<2x32xf32>
    %495 = vector.broadcast %487 : vector<2x1xf32> to vector<2x32xf32>
    %496 = arith.mulf %495, %494 : vector<2x32xf32>
    %497 = arith.addf %423, %496 : vector<2x32xf32>
    %498 = arith.subf %483, %427 : vector<2x32xf32>
    %499 = vector.broadcast %487 : vector<2x1xf32> to vector<2x32xf32>
    %500 = arith.mulf %499, %498 : vector<2x32xf32>
    %501 = arith.addf %427, %500 : vector<2x32xf32>
    %c1_161 = arith.constant 1 : index
    %c0_162 = arith.constant 0 : index
    %c128_163 = arith.constant 128 : index
    %502 = vector.load %arg9[%c1_161, %c0_162, %c128_163] : memref<8x2x256xf32, #tpu.memory_space<vmem>>, vector<1x2x128xf32>
    %503 = vector.shape_cast %502 : vector<1x2x128xf32> to vector<2x128xf32>
    %504 = arith.truncf %460 : vector<2x32xf32> to vector<2x32xbf16>
    %cst_164 = arith.constant dense<0.000000e+00> : vector<2x128xf32>
    %505 = tpu.matmul %504, %12, %cst_164 {dimension_numbers = #tpu.dot_dimension_numbers<[1], [0], [0], [1], [0, 0, 1, 1], [], []>} : vector<2x32xbf16>, vector<32x128xbf16>, vector<2x128xf32> -> vector<2x128xf32>
    %506 = arith.addf %503, %505 : vector<2x128xf32>
    %507 = vector.extract_strided_slice %506 {offsets = [0, 0], sizes = [2, 96], strides = [1, 1]} : vector<2x128xf32> to vector<2x96xf32>
    %508 = arith.negf %507 : vector<2x96xf32>
    %509 = math.exp %508 : vector<2x96xf32>
    %cst_165 = arith.constant 1.000000e+00 : f32
    %510 = vector.broadcast %cst_165 : f32 to vector<2x96xf32>
    %511 = arith.addf %510, %509 : vector<2x96xf32>
    %512 = arith.divf %510, %511 : vector<2x96xf32>
    %513 = vector.extract_strided_slice %512 {offsets = [0, 0], sizes = [2, 32], strides = [1, 1]} : vector<2x96xf32> to vector<2x32xf32>
    %514 = vector.extract_strided_slice %512 {offsets = [0, 32], sizes = [2, 32], strides = [1, 1]} : vector<2x96xf32> to vector<2x32xf32>
    %515 = vector.extract_strided_slice %512 {offsets = [0, 64], sizes = [2, 32], strides = [1, 1]} : vector<2x96xf32> to vector<2x32xf32>
    %516 = vector.extract_strided_slice %506 {offsets = [0, 96], sizes = [2, 32], strides = [1, 1]} : vector<2x128xf32> to vector<2x32xf32>
    %517 = math.tanh %516 : vector<2x32xf32>
    %518 = arith.mulf %514, %464 : vector<2x32xf32>
    %519 = arith.mulf %513, %517 : vector<2x32xf32>
    %520 = arith.addf %518, %519 : vector<2x32xf32>
    %521 = math.tanh %520 : vector<2x32xf32>
    %522 = arith.mulf %515, %521 : vector<2x32xf32>
    %c1_166 = arith.constant 1 : index
    %c0_167 = arith.constant 0 : index
    %c0_168 = arith.constant 0 : index
    %523 = vector.load %arg7[%c1_166, %c0_167, %c0_168] : memref<8x2x1xf32, #tpu.memory_space<vmem>>, vector<1x2x1xf32>
    %524 = vector.shape_cast %523 : vector<1x2x1xf32> to vector<2x1xf32>
    %525 = vector.broadcast %524 : vector<2x1xf32> to vector<2x32xf32>
    %526 = arith.mulf %522, %525 : vector<2x32xf32>
    %527 = arith.truncf %526 : vector<2x32xf32> to vector<2x32xbf16>
    %c1_169 = arith.constant 1 : index
    %c0_170 = arith.constant 0 : index
    %c32_171 = arith.constant 32 : index
    %528 = vector.load %arg8[%c1_169, %c0_170, %c32_171] : memref<8x2x64xbf16, #tpu.memory_space<vmem>>, vector<1x2x32xbf16>
    %529 = vector.shape_cast %528 : vector<1x2x32xbf16> to vector<2x32xbf16>
    %530 = vector.shape_cast %527 : vector<2x32xbf16> to vector<1x2x32xbf16>
    tpu.vector_store %arg8[%c1_169, %c0_170, %c32_171], %530 {strides = array<i32>} : memref<8x2x64xbf16, #tpu.memory_space<vmem>>, vector<1x2x32xbf16>,
    %531 = arith.subf %522, %460 : vector<2x32xf32>
    %532 = vector.broadcast %524 : vector<2x1xf32> to vector<2x32xf32>
    %533 = arith.mulf %532, %531 : vector<2x32xf32>
    %534 = arith.addf %460, %533 : vector<2x32xf32>
    %535 = arith.subf %520, %464 : vector<2x32xf32>
    %536 = vector.broadcast %524 : vector<2x1xf32> to vector<2x32xf32>
    %537 = arith.mulf %536, %535 : vector<2x32xf32>
    %538 = arith.addf %464, %537 : vector<2x32xf32>
    %c7_172 = arith.constant 7 : index
    %c0_173 = arith.constant 0 : index
    %c0_174 = arith.constant 0 : index
    %539 = vector.load %arg9[%c7_172, %c0_173, %c0_174] : memref<8x2x256xf32, #tpu.memory_space<vmem>>, vector<1x2x128xf32>
    %540 = vector.shape_cast %539 : vector<1x2x128xf32> to vector<2x128xf32>
    %541 = arith.truncf %497 : vector<2x32xf32> to vector<2x32xbf16>
    %cst_175 = arith.constant dense<0.000000e+00> : vector<2x128xf32>
    %542 = tpu.matmul %541, %10, %cst_175 {dimension_numbers = #tpu.dot_dimension_numbers<[1], [0], [0], [1], [0, 0, 1, 1], [], []>} : vector<2x32xbf16>, vector<32x128xbf16>, vector<2x128xf32> -> vector<2x128xf32>
    %543 = arith.addf %540, %542 : vector<2x128xf32>
    %544 = vector.extract_strided_slice %543 {offsets = [0, 0], sizes = [2, 96], strides = [1, 1]} : vector<2x128xf32> to vector<2x96xf32>
    %545 = arith.negf %544 : vector<2x96xf32>
    %546 = math.exp %545 : vector<2x96xf32>
    %cst_176 = arith.constant 1.000000e+00 : f32
    %547 = vector.broadcast %cst_176 : f32 to vector<2x96xf32>
    %548 = arith.addf %547, %546 : vector<2x96xf32>
    %549 = arith.divf %547, %548 : vector<2x96xf32>
    %550 = vector.extract_strided_slice %549 {offsets = [0, 0], sizes = [2, 32], strides = [1, 1]} : vector<2x96xf32> to vector<2x32xf32>
    %551 = vector.extract_strided_slice %549 {offsets = [0, 32], sizes = [2, 32], strides = [1, 1]} : vector<2x96xf32> to vector<2x32xf32>
    %552 = vector.extract_strided_slice %549 {offsets = [0, 64], sizes = [2, 32], strides = [1, 1]} : vector<2x96xf32> to vector<2x32xf32>
    %553 = vector.extract_strided_slice %543 {offsets = [0, 96], sizes = [2, 32], strides = [1, 1]} : vector<2x128xf32> to vector<2x32xf32>
    %554 = math.tanh %553 : vector<2x32xf32>
    %555 = arith.mulf %551, %501 : vector<2x32xf32>
    %556 = arith.mulf %550, %554 : vector<2x32xf32>
    %557 = arith.addf %555, %556 : vector<2x32xf32>
    %558 = math.tanh %557 : vector<2x32xf32>
    %559 = arith.mulf %552, %558 : vector<2x32xf32>
    %c7_177 = arith.constant 7 : index
    %c0_178 = arith.constant 0 : index
    %c0_179 = arith.constant 0 : index
    %560 = vector.load %arg7[%c7_177, %c0_178, %c0_179] : memref<8x2x1xf32, #tpu.memory_space<vmem>>, vector<1x2x1xf32>
    %561 = vector.shape_cast %560 : vector<1x2x1xf32> to vector<2x1xf32>
    %562 = vector.broadcast %561 : vector<2x1xf32> to vector<2x32xf32>
    %563 = arith.mulf %559, %562 : vector<2x32xf32>
    %564 = arith.truncf %563 : vector<2x32xf32> to vector<2x32xbf16>
    %c7_180 = arith.constant 7 : index
    %c0_181 = arith.constant 0 : index
    %c0_182 = arith.constant 0 : index
    %565 = vector.load %arg8[%c7_180, %c0_181, %c0_182] : memref<8x2x64xbf16, #tpu.memory_space<vmem>>, vector<1x2x32xbf16>
    %566 = vector.shape_cast %565 : vector<1x2x32xbf16> to vector<2x32xbf16>
    %567 = vector.shape_cast %564 : vector<2x32xbf16> to vector<1x2x32xbf16>
    tpu.vector_store %arg8[%c7_180, %c0_181, %c0_182], %567 {strides = array<i32>} : memref<8x2x64xbf16, #tpu.memory_space<vmem>>, vector<1x2x32xbf16>,
    %c0_183 = arith.constant 0 : index
    %c0_184 = arith.constant 0 : index
    %c128_185 = arith.constant 128 : index
    %568 = vector.load %arg9[%c0_183, %c0_184, %c128_185] : memref<8x2x256xf32, #tpu.memory_space<vmem>>, vector<1x2x128xf32>
    %569 = vector.shape_cast %568 : vector<1x2x128xf32> to vector<2x128xf32>
    %570 = arith.truncf %534 : vector<2x32xf32> to vector<2x32xbf16>
    %cst_186 = arith.constant dense<0.000000e+00> : vector<2x128xf32>
    %571 = tpu.matmul %570, %12, %cst_186 {dimension_numbers = #tpu.dot_dimension_numbers<[1], [0], [0], [1], [0, 0, 1, 1], [], []>} : vector<2x32xbf16>, vector<32x128xbf16>, vector<2x128xf32> -> vector<2x128xf32>
    %572 = arith.addf %569, %571 : vector<2x128xf32>
    %573 = vector.extract_strided_slice %572 {offsets = [0, 0], sizes = [2, 96], strides = [1, 1]} : vector<2x128xf32> to vector<2x96xf32>
    %574 = arith.negf %573 : vector<2x96xf32>
    %575 = math.exp %574 : vector<2x96xf32>
    %cst_187 = arith.constant 1.000000e+00 : f32
    %576 = vector.broadcast %cst_187 : f32 to vector<2x96xf32>
    %577 = arith.addf %576, %575 : vector<2x96xf32>
    %578 = arith.divf %576, %577 : vector<2x96xf32>
    %579 = vector.extract_strided_slice %578 {offsets = [0, 0], sizes = [2, 32], strides = [1, 1]} : vector<2x96xf32> to vector<2x32xf32>
    %580 = vector.extract_strided_slice %578 {offsets = [0, 32], sizes = [2, 32], strides = [1, 1]} : vector<2x96xf32> to vector<2x32xf32>
    %581 = vector.extract_strided_slice %578 {offsets = [0, 64], sizes = [2, 32], strides = [1, 1]} : vector<2x96xf32> to vector<2x32xf32>
    %582 = vector.extract_strided_slice %572 {offsets = [0, 96], sizes = [2, 32], strides = [1, 1]} : vector<2x128xf32> to vector<2x32xf32>
    %583 = math.tanh %582 : vector<2x32xf32>
    %584 = arith.mulf %580, %538 : vector<2x32xf32>
    %585 = arith.mulf %579, %583 : vector<2x32xf32>
    %586 = arith.addf %584, %585 : vector<2x32xf32>
    %587 = math.tanh %586 : vector<2x32xf32>
    %588 = arith.mulf %581, %587 : vector<2x32xf32>
    %c0_188 = arith.constant 0 : index
    %c0_189 = arith.constant 0 : index
    %c0_190 = arith.constant 0 : index
    %589 = vector.load %arg7[%c0_188, %c0_189, %c0_190] : memref<8x2x1xf32, #tpu.memory_space<vmem>>, vector<1x2x1xf32>
    %590 = vector.shape_cast %589 : vector<1x2x1xf32> to vector<2x1xf32>
    %591 = vector.broadcast %590 : vector<2x1xf32> to vector<2x32xf32>
    %592 = arith.mulf %588, %591 : vector<2x32xf32>
    %593 = arith.truncf %592 : vector<2x32xf32> to vector<2x32xbf16>
    %c0_191 = arith.constant 0 : index
    %c0_192 = arith.constant 0 : index
    %c32_193 = arith.constant 32 : index
    %594 = vector.load %arg8[%c0_191, %c0_192, %c32_193] : memref<8x2x64xbf16, #tpu.memory_space<vmem>>, vector<1x2x32xbf16>
    %595 = vector.shape_cast %594 : vector<1x2x32xbf16> to vector<2x32xbf16>
    %596 = vector.shape_cast %593 : vector<2x32xbf16> to vector<1x2x32xbf16>
    tpu.vector_store %arg8[%c0_191, %c0_192, %c32_193], %596 {strides = array<i32>} : memref<8x2x64xbf16, #tpu.memory_space<vmem>>, vector<1x2x32xbf16>,
    return
  }
  func.func @transform_0(%arg0: i32) -> (i32, i32, i32) {
    %c0_i32 = arith.constant 0 : i32
    %c0_i32_0 = arith.constant 0 : i32
    %c0_i32_1 = arith.constant 0 : i32
    %c0_i32_2 = arith.constant 0 : i32
    return %c0_i32, %c0_i32_0, %c0_i32_1 : i32, i32, i32
  }
  func.func @transform_1(%arg0: i32) -> (i32, i32) {
    %c0_i32 = arith.constant 0 : i32
    %c0_i32_0 = arith.constant 0 : i32
    %c0_i32_1 = arith.constant 0 : i32
    return %c0_i32, %c0_i32_0 : i32, i32
  }
  func.func @transform_2(%arg0: i32) -> (i32, i32, i32) {
    %c0_i32 = arith.constant 0 : i32
    %c0_i32_0 = arith.constant 0 : i32
    %c0_i32_1 = arith.constant 0 : i32
    %c0_i32_2 = arith.constant 0 : i32
    return %c0_i32, %c0_i32_0, %c0_i32_1 : i32, i32, i32
  }
  func.func @transform_3(%arg0: i32) -> (i32, i32) {
    %c0_i32 = arith.constant 0 : i32
    %c0_i32_0 = arith.constant 0 : i32
    %c0_i32_1 = arith.constant 0 : i32
    return %c0_i32, %c0_i32_0 : i32, i32
  }
  func.func @transform_4(%arg0: i32) -> (i32, i32, i32) {
    %c0_i32 = arith.constant 0 : i32
    %c0_i32_0 = arith.constant 0 : i32
    %c0_i32_1 = arith.constant 0 : i32
    %c0_i32_2 = arith.constant 0 : i32
    return %c0_i32, %c0_i32_0, %c0_i32_1 : i32, i32, i32
  }
  func.func @transform_5(%arg0: i32) -> (i32, i32, i32) {
    %c0_i32 = arith.constant 0 : i32
    %c0_i32_0 = arith.constant 0 : i32
    %c0_i32_1 = arith.constant 0 : i32
    %c0_i32_2 = arith.constant 0 : i32
    return %c0_i32, %c0_i32_0, %c0_i32_1 : i32, i32, i32
  }
  func.func @transform_6(%arg0: i32) -> (i32, i32, i32) {
    %c0_i32 = arith.constant 0 : i32
    %c0_i32_0 = arith.constant 0 : i32
    %c0_i32_1 = arith.constant 0 : i32
    %c0_i32_2 = arith.constant 0 : i32
    return %c0_i32, %c0_i32_0, %c0_i32_1 : i32, i32, i32
  }
  func.func @transform_7(%arg0: i32) -> (i32, i32, i32) {
    %c0_i32 = arith.constant 0 : i32
    %c0_i32_0 = arith.constant 0 : i32
    %c0_i32_1 = arith.constant 0 : i32
    %c0_i32_2 = arith.constant 0 : i32
    return %c0_i32, %c0_i32_0, %c0_i32_1 : i32, i32, i32
  }
}

module attributes {stable_mosaic.version = 11 : i64} {
  func.func @_linear_kernel(%arg0: i32, %arg1: i32, %arg2: memref<16x64xbf16, #tpu.memory_space<vmem>>, %arg3: memref<64x128xbf16, #tpu.memory_space<vmem>>, %arg4: memref<1x128xf32, #tpu.memory_space<vmem>>, %arg5: memref<16x128xf32, #tpu.memory_space<vmem>>) attributes {dimension_semantics = [#tpu.dimension_semantics<parallel>, #tpu.dimension_semantics<parallel>], iteration_bounds = array<i64: 1, 1>, scalar_prefetch = 0 : i64, scratch_operands = 0 : i64, tpu.core_type = #tpu.core_type<tc>, window_params = [{transform_indices = @transform_0, window_bounds = array<i64: 16, 64>}, {transform_indices = @transform_1, window_bounds = array<i64: 64, 128>}, {transform_indices = @transform_2, window_bounds = array<i64: 1, 128>}, {transform_indices = @transform_3, window_bounds = array<i64: 16, 128>}]} {
    %c0 = arith.constant 0 : index
    %c0_0 = arith.constant 0 : index
    %0 = vector.load %arg2[%c0, %c0_0] : memref<16x64xbf16, #tpu.memory_space<vmem>>, vector<16x64xbf16>
    %c0_1 = arith.constant 0 : index
    %c0_2 = arith.constant 0 : index
    %1 = vector.load %arg3[%c0_1, %c0_2] : memref<64x128xbf16, #tpu.memory_space<vmem>>, vector<64x128xbf16>
    %cst = arith.constant dense<0.000000e+00> : vector<16x128xf32>
    %2 = tpu.matmul %0, %1, %cst {dimension_numbers = #tpu.dot_dimension_numbers<[1], [0], [0], [1], [0, 0, 1, 1], [], []>} : vector<16x64xbf16>, vector<64x128xbf16>, vector<16x128xf32> -> vector<16x128xf32>
    %c0_3 = arith.constant 0 : index
    %c0_4 = arith.constant 0 : index
    %3 = vector.load %arg4[%c0_3, %c0_4] : memref<1x128xf32, #tpu.memory_space<vmem>>, vector<1x128xf32>
    %4 = vector.broadcast %3 : vector<1x128xf32> to vector<16x128xf32>
    %5 = arith.addf %2, %4 : vector<16x128xf32>
    %c0_5 = arith.constant 0 : index
    %c0_6 = arith.constant 0 : index
    %6 = vector.load %arg5[%c0_5, %c0_6] : memref<16x128xf32, #tpu.memory_space<vmem>>, vector<16x128xf32>
    tpu.vector_store %arg5[%c0_5, %c0_6], %5 {strides = array<i32>} : memref<16x128xf32, #tpu.memory_space<vmem>>, vector<16x128xf32>,
    return
  }
  func.func @transform_0(%arg0: i32, %arg1: i32) -> (i32, i32) {
    %c0_i32 = arith.constant 0 : i32
    %c0_i32_0 = arith.constant 0 : i32
    return %arg0, %c0_i32 : i32, i32
  }
  func.func @transform_1(%arg0: i32, %arg1: i32) -> (i32, i32) {
    %c0_i32 = arith.constant 0 : i32
    %c0_i32_0 = arith.constant 0 : i32
    return %c0_i32, %arg1 : i32, i32
  }
  func.func @transform_2(%arg0: i32, %arg1: i32) -> (i32, i32) {
    %c0_i32 = arith.constant 0 : i32
    %c0_i32_0 = arith.constant 0 : i32
    return %c0_i32, %arg1 : i32, i32
  }
  func.func @transform_3(%arg0: i32, %arg1: i32) -> (i32, i32) {
    %c0_i32 = arith.constant 0 : i32
    return %arg0, %arg1 : i32, i32
  }
}

module attributes {stable_mosaic.version = 11 : i64} {
  func.func @_bilstm_kernel(%arg0: i32, %arg1: memref<8x2x64xbf16, #tpu.memory_space<vmem>>, %arg2: memref<64x256xbf16, #tpu.memory_space<vmem>>, %arg3: memref<2x32x128xbf16, #tpu.memory_space<vmem>>, %arg4: memref<1x256xf32, #tpu.memory_space<vmem>>, %arg5: memref<2x2x32xf32, #tpu.memory_space<vmem>>, %arg6: memref<2x2x32xf32, #tpu.memory_space<vmem>>, %arg7: memref<8x2x1xf32, #tpu.memory_space<vmem>>, %arg8: memref<8x2x64xbf16, #tpu.memory_space<vmem>>, %arg9: memref<8x2x256xf32, #tpu.memory_space<vmem>>) attributes {dimension_semantics = [#tpu.dimension_semantics<arbitrary>], iteration_bounds = array<i64: 1>, scalar_prefetch = 0 : i64, scratch_operands = 1 : i64, tpu.core_type = #tpu.core_type<tc>, window_params = [{pipeline_mode = #tpu.pipeline_mode<synchronous>, transform_indices = @transform_0, window_bounds = array<i64: 8, 2, 64>}, {pipeline_mode = #tpu.pipeline_mode<synchronous>, transform_indices = @transform_1, window_bounds = array<i64: 64, 256>}, {pipeline_mode = #tpu.pipeline_mode<synchronous>, transform_indices = @transform_2, window_bounds = array<i64: 2, 32, 128>}, {pipeline_mode = #tpu.pipeline_mode<synchronous>, transform_indices = @transform_3, window_bounds = array<i64: 1, 256>}, {pipeline_mode = #tpu.pipeline_mode<synchronous>, transform_indices = @transform_4, window_bounds = array<i64: 2, 2, 32>}, {pipeline_mode = #tpu.pipeline_mode<synchronous>, transform_indices = @transform_5, window_bounds = array<i64: 2, 2, 32>}, {pipeline_mode = #tpu.pipeline_mode<synchronous>, transform_indices = @transform_6, window_bounds = array<i64: 8, 2, 1>}, {pipeline_mode = #tpu.pipeline_mode<synchronous>, transform_indices = @transform_7, window_bounds = array<i64: 8, 2, 64>}]} {
    %c0 = arith.constant 0 : index
    %c0_0 = arith.constant 0 : index
    %c0_1 = arith.constant 0 : index
    %0 = vector.load %arg1[%c0, %c0_0, %c0_1] : memref<8x2x64xbf16, #tpu.memory_space<vmem>>, vector<8x2x64xbf16>
    %1 = vector.shape_cast %0 : vector<8x2x64xbf16> to vector<16x64xbf16>
    %c0_2 = arith.constant 0 : index
    %c0_3 = arith.constant 0 : index
    %2 = vector.load %arg2[%c0_2, %c0_3] : memref<64x256xbf16, #tpu.memory_space<vmem>>, vector<64x256xbf16>
    %cst = arith.constant dense<0.000000e+00> : vector<16x256xf32>
    %3 = tpu.matmul %1, %2, %cst {dimension_numbers = #tpu.dot_dimension_numbers<[1], [0], [0], [1], [0, 0, 1, 1], [], []>} : vector<16x64xbf16>, vector<64x256xbf16>, vector<16x256xf32> -> vector<16x256xf32>
    %c0_4 = arith.constant 0 : index
    %c0_5 = arith.constant 0 : index
    %4 = vector.load %arg4[%c0_4, %c0_5] : memref<1x256xf32, #tpu.memory_space<vmem>>, vector<1x256xf32>
    %5 = vector.broadcast %4 : vector<1x256xf32> to vector<16x256xf32>
    %6 = arith.addf %3, %5 : vector<16x256xf32>
    %7 = vector.shape_cast %6 : vector<16x256xf32> to vector<8x2x256xf32>
    %c0_6 = arith.constant 0 : index
    %c0_7 = arith.constant 0 : index
    %c0_8 = arith.constant 0 : index
    %8 = vector.load %arg9[%c0_6, %c0_7, %c0_8] : memref<8x2x256xf32, #tpu.memory_space<vmem>>, vector<8x2x256xf32>
    tpu.vector_store %arg9[%c0_6, %c0_7, %c0_8], %7 {strides = array<i32>} : memref<8x2x256xf32, #tpu.memory_space<vmem>>, vector<8x2x256xf32>,
    %c0_9 = arith.constant 0 : index
    %c0_10 = arith.constant 0 : index
    %c0_11 = arith.constant 0 : index
    %9 = vector.load %arg3[%c0_9, %c0_10, %c0_11] : memref<2x32x128xbf16, #tpu.memory_space<vmem>>, vector<1x32x128xbf16>
    %10 = vector.shape_cast %9 : vector<1x32x128xbf16> to vector<32x128xbf16>
    %c1 = arith.constant 1 : index
    %c0_12 = arith.constant 0 : index
    %c0_13 = arith.constant 0 : index
    %11 = vector.load %arg3[%c1, %c0_12, %c0_13] : memref<2x32x128xbf16, #tpu.memory_space<vmem>>, vector<1x32x128xbf16>
    %12 = vector.shape_cast %11 : vector<1x32x128xbf16> to vector<32x128xbf16>
    %c0_14 = arith.constant 0 : index
    %c0_15 = arith.constant 0 : index
    %c0_16 = arith.constant 0 : index
    %13 = vector.load %arg5[%c0_14, %c0_15, %c0_16] : memref<2x2x32xf32, #tpu.memory_space<vmem>>, vector<1x2x32xf32>
    %14 = vector.shape_cast %13 : vector<1x2x32xf32> to vector<2x32xf32>
    %c0_17 = arith.constant 0 : index
    %c0_18 = arith.constant 0 : index
    %c0_19 = arith.constant 0 : index
    %15 = vector.load %arg6[%c0_17, %c0_18, %c0_19] : memref<2x2x32xf32, #tpu.memory_space<vmem>>, vector<1x2x32xf32>
    %16 = vector.shape_cast %15 : vector<1x2x32xf32> to vector<2x32xf32>
    %c1_20 = arith.constant 1 : index
    %c0_21 = arith.constant 0 : index
    %c0_22 = arith.constant 0 : index
    %17 = vector.load %arg5[%c1_20, %c0_21, %c0_22] : memref<2x2x32xf32, #tpu.memory_space<vmem>>, vector<1x2x32xf32>
    %18 = vector.shape_cast %17 : vector<1x2x32xf32> to vector<2x32xf32>
    %c1_23 = arith.constant 1 : index
    %c0_24 = arith.constant 0 : index
    %c0_25 = arith.constant 0 : index
    %19 = vector.load %arg6[%c1_23, %c0_24, %c0_25] : memref<2x2x32xf32, #tpu.memory_space<vmem>>, vector<1x2x32xf32>
    %20 = vector.shape_cast %19 : vector<1x2x32xf32> to vector<2x32xf32>
    %c0_26 = arith.constant 0 : index
    %c0_27 = arith.constant 0 : index
    %c0_28 = arith.constant 0 : index
    %21 = vector.load %arg9[%c0_26, %c0_27, %c0_28] : memref<8x2x256xf32, #tpu.memory_space<vmem>>, vector<1x2x128xf32>
    %22 = vector.shape_cast %21 : vector<1x2x128xf32> to vector<2x128xf32>
    %23 = arith.truncf %14 : vector<2x32xf32> to vector<2x32xbf16>
    %cst_29 = arith.constant dense<0.000000e+00> : vector<2x128xf32>
    %24 = tpu.matmul %23, %10, %cst_29 {dimension_numbers = #tpu.dot_dimension_numbers<[1], [0], [0], [1], [0, 0, 1, 1], [], []>} : vector<2x32xbf16>, vector<32x128xbf16>, vector<2x128xf32> -> vector<2x128xf32>
    %25 = arith.addf %22, %24 : vector<2x128xf32>
    %26 = vector.extract_strided_slice %25 {offsets = [0, 0], sizes = [2, 96], strides = [1, 1]} : vector<2x128xf32> to vector<2x96xf32>
    %27 = arith.negf %26 : vector<2x96xf32>
    %28 = math.exp %27 : vector<2x96xf32>
    %cst_30 = arith.constant 1.000000e+00 : f32
    %29 = vector.broadcast %cst_30 : f32 to vector<2x96xf32>
    %30 = arith.addf %29, %28 : vector<2x96xf32>
    %31 = arith.divf %29, %30 : vector<2x96xf32>
    %32 = vector.extract_strided_slice %31 {offsets = [0, 0], sizes = [2, 32], strides = [1, 1]} : vector<2x96xf32> to vector<2x32xf32>
    %33 = vector.extract_strided_slice %31 {offsets = [0, 32], sizes = [2, 32], strides = [1, 1]} : vector<2x96xf32> to vector<2x32xf32>
    %34 = vector.extract_strided_slice %31 {offsets = [0, 64], sizes = [2, 32], strides = [1, 1]} : vector<2x96xf32> to vector<2x32xf32>
    %35 = vector.extract_strided_slice %25 {offsets = [0, 96], sizes = [2, 32], strides = [1, 1]} : vector<2x128xf32> to vector<2x32xf32>
    %36 = math.tanh %35 : vector<2x32xf32>
    %37 = arith.mulf %33, %16 : vector<2x32xf32>
    %38 = arith.mulf %32, %36 : vector<2x32xf32>
    %39 = arith.addf %37, %38 : vector<2x32xf32>
    %40 = math.tanh %39 : vector<2x32xf32>
    %41 = arith.mulf %34, %40 : vector<2x32xf32>
    %c0_31 = arith.constant 0 : index
    %c0_32 = arith.constant 0 : index
    %c0_33 = arith.constant 0 : index
    %42 = vector.load %arg7[%c0_31, %c0_32, %c0_33] : memref<8x2x1xf32, #tpu.memory_space<vmem>>, vector<1x2x1xf32>
    %43 = vector.shape_cast %42 : vector<1x2x1xf32> to vector<2x1xf32>
    %44 = vector.broadcast %43 : vector<2x1xf32> to vector<2x32xf32>
    %45 = arith.mulf %41, %44 : vector<2x32xf32>
    %46 = arith.truncf %45 : vector<2x32xf32> to vector<2x32xbf16>
    %c0_34 = arith.constant 0 : index
    %c0_35 = arith.constant 0 : index
    %c0_36 = arith.constant 0 : index
    %47 = vector.load %arg8[%c0_34, %c0_35, %c0_36] : memref<8x2x64xbf16, #tpu.memory_space<vmem>>, vector<1x2x32xbf16>
    %48 = vector.shape_cast %47 : vector<1x2x32xbf16> to vector<2x32xbf16>
    %49 = vector.shape_cast %46 : vector<2x32xbf16> to vector<1x2x32xbf16>
    tpu.vector_store %arg8[%c0_34, %c0_35, %c0_36], %49 {strides = array<i32>} : memref<8x2x64xbf16, #tpu.memory_space<vmem>>, vector<1x2x32xbf16>,
    %50 = arith.subf %41, %14 : vector<2x32xf32>
    %51 = vector.broadcast %43 : vector<2x1xf32> to vector<2x32xf32>
    %52 = arith.mulf %51, %50 : vector<2x32xf32>
    %53 = arith.addf %14, %52 : vector<2x32xf32>
    %54 = arith.subf %39, %16 : vector<2x32xf32>
    %55 = vector.broadcast %43 : vector<2x1xf32> to vector<2x32xf32>
    %56 = arith.mulf %55, %54 : vector<2x32xf32>
    %57 = arith.addf %16, %56 : vector<2x32xf32>
    %c7 = arith.constant 7 : index
    %c0_37 = arith.constant 0 : index
    %c128 = arith.constant 128 : index
    %58 = vector.load %arg9[%c7, %c0_37, %c128] : memref<8x2x256xf32, #tpu.memory_space<vmem>>, vector<1x2x128xf32>
    %59 = vector.shape_cast %58 : vector<1x2x128xf32> to vector<2x128xf32>
    %60 = arith.truncf %18 : vector<2x32xf32> to vector<2x32xbf16>
    %cst_38 = arith.constant dense<0.000000e+00> : vector<2x128xf32>
    %61 = tpu.matmul %60, %12, %cst_38 {dimension_numbers = #tpu.dot_dimension_numbers<[1], [0], [0], [1], [0, 0, 1, 1], [], []>} : vector<2x32xbf16>, vector<32x128xbf16>, vector<2x128xf32> -> vector<2x128xf32>
    %62 = arith.addf %59, %61 : vector<2x128xf32>
    %63 = vector.extract_strided_slice %62 {offsets = [0, 0], sizes = [2, 96], strides = [1, 1]} : vector<2x128xf32> to vector<2x96xf32>
    %64 = arith.negf %63 : vector<2x96xf32>
    %65 = math.exp %64 : vector<2x96xf32>
    %cst_39 = arith.constant 1.000000e+00 : f32
    %66 = vector.broadcast %cst_39 : f32 to vector<2x96xf32>
    %67 = arith.addf %66, %65 : vector<2x96xf32>
    %68 = arith.divf %66, %67 : vector<2x96xf32>
    %69 = vector.extract_strided_slice %68 {offsets = [0, 0], sizes = [2, 32], strides = [1, 1]} : vector<2x96xf32> to vector<2x32xf32>
    %70 = vector.extract_strided_slice %68 {offsets = [0, 32], sizes = [2, 32], strides = [1, 1]} : vector<2x96xf32> to vector<2x32xf32>
    %71 = vector.extract_strided_slice %68 {offsets = [0, 64], sizes = [2, 32], strides = [1, 1]} : vector<2x96xf32> to vector<2x32xf32>
    %72 = vector.extract_strided_slice %62 {offsets = [0, 96], sizes = [2, 32], strides = [1, 1]} : vector<2x128xf32> to vector<2x32xf32>
    %73 = math.tanh %72 : vector<2x32xf32>
    %74 = arith.mulf %70, %20 : vector<2x32xf32>
    %75 = arith.mulf %69, %73 : vector<2x32xf32>
    %76 = arith.addf %74, %75 : vector<2x32xf32>
    %77 = math.tanh %76 : vector<2x32xf32>
    %78 = arith.mulf %71, %77 : vector<2x32xf32>
    %c7_40 = arith.constant 7 : index
    %c0_41 = arith.constant 0 : index
    %c0_42 = arith.constant 0 : index
    %79 = vector.load %arg7[%c7_40, %c0_41, %c0_42] : memref<8x2x1xf32, #tpu.memory_space<vmem>>, vector<1x2x1xf32>
    %80 = vector.shape_cast %79 : vector<1x2x1xf32> to vector<2x1xf32>
    %81 = vector.broadcast %80 : vector<2x1xf32> to vector<2x32xf32>
    %82 = arith.mulf %78, %81 : vector<2x32xf32>
    %83 = arith.truncf %82 : vector<2x32xf32> to vector<2x32xbf16>
    %c7_43 = arith.constant 7 : index
    %c0_44 = arith.constant 0 : index
    %c32 = arith.constant 32 : index
    %84 = vector.load %arg8[%c7_43, %c0_44, %c32] : memref<8x2x64xbf16, #tpu.memory_space<vmem>>, vector<1x2x32xbf16>
    %85 = vector.shape_cast %84 : vector<1x2x32xbf16> to vector<2x32xbf16>
    %86 = vector.shape_cast %83 : vector<2x32xbf16> to vector<1x2x32xbf16>
    tpu.vector_store %arg8[%c7_43, %c0_44, %c32], %86 {strides = array<i32>} : memref<8x2x64xbf16, #tpu.memory_space<vmem>>, vector<1x2x32xbf16>,
    %87 = arith.subf %78, %18 : vector<2x32xf32>
    %88 = vector.broadcast %80 : vector<2x1xf32> to vector<2x32xf32>
    %89 = arith.mulf %88, %87 : vector<2x32xf32>
    %90 = arith.addf %18, %89 : vector<2x32xf32>
    %91 = arith.subf %76, %20 : vector<2x32xf32>
    %92 = vector.broadcast %80 : vector<2x1xf32> to vector<2x32xf32>
    %93 = arith.mulf %92, %91 : vector<2x32xf32>
    %94 = arith.addf %20, %93 : vector<2x32xf32>
    %c1_45 = arith.constant 1 : index
    %c0_46 = arith.constant 0 : index
    %c0_47 = arith.constant 0 : index
    %95 = vector.load %arg9[%c1_45, %c0_46, %c0_47] : memref<8x2x256xf32, #tpu.memory_space<vmem>>, vector<1x2x128xf32>
    %96 = vector.shape_cast %95 : vector<1x2x128xf32> to vector<2x128xf32>
    %97 = arith.truncf %53 : vector<2x32xf32> to vector<2x32xbf16>
    %cst_48 = arith.constant dense<0.000000e+00> : vector<2x128xf32>
    %98 = tpu.matmul %97, %10, %cst_48 {dimension_numbers = #tpu.dot_dimension_numbers<[1], [0], [0], [1], [0, 0, 1, 1], [], []>} : vector<2x32xbf16>, vector<32x128xbf16>, vector<2x128xf32> -> vector<2x128xf32>
    %99 = arith.addf %96, %98 : vector<2x128xf32>
    %100 = vector.extract_strided_slice %99 {offsets = [0, 0], sizes = [2, 96], strides = [1, 1]} : vector<2x128xf32> to vector<2x96xf32>
    %101 = arith.negf %100 : vector<2x96xf32>
    %102 = math.exp %101 : vector<2x96xf32>
    %cst_49 = arith.constant 1.000000e+00 : f32
    %103 = vector.broadcast %cst_49 : f32 to vector<2x96xf32>
    %104 = arith.addf %103, %102 : vector<2x96xf32>
    %105 = arith.divf %103, %104 : vector<2x96xf32>
    %106 = vector.extract_strided_slice %105 {offsets = [0, 0], sizes = [2, 32], strides = [1, 1]} : vector<2x96xf32> to vector<2x32xf32>
    %107 = vector.extract_strided_slice %105 {offsets = [0, 32], sizes = [2, 32], strides = [1, 1]} : vector<2x96xf32> to vector<2x32xf32>
    %108 = vector.extract_strided_slice %105 {offsets = [0, 64], sizes = [2, 32], strides = [1, 1]} : vector<2x96xf32> to vector<2x32xf32>
    %109 = vector.extract_strided_slice %99 {offsets = [0, 96], sizes = [2, 32], strides = [1, 1]} : vector<2x128xf32> to vector<2x32xf32>
    %110 = math.tanh %109 : vector<2x32xf32>
    %111 = arith.mulf %107, %57 : vector<2x32xf32>
    %112 = arith.mulf %106, %110 : vector<2x32xf32>
    %113 = arith.addf %111, %112 : vector<2x32xf32>
    %114 = math.tanh %113 : vector<2x32xf32>
    %115 = arith.mulf %108, %114 : vector<2x32xf32>
    %c1_50 = arith.constant 1 : index
    %c0_51 = arith.constant 0 : index
    %c0_52 = arith.constant 0 : index
    %116 = vector.load %arg7[%c1_50, %c0_51, %c0_52] : memref<8x2x1xf32, #tpu.memory_space<vmem>>, vector<1x2x1xf32>
    %117 = vector.shape_cast %116 : vector<1x2x1xf32> to vector<2x1xf32>
    %118 = vector.broadcast %117 : vector<2x1xf32> to vector<2x32xf32>
    %119 = arith.mulf %115, %118 : vector<2x32xf32>
    %120 = arith.truncf %119 : vector<2x32xf32> to vector<2x32xbf16>
    %c1_53 = arith.constant 1 : index
    %c0_54 = arith.constant 0 : index
    %c0_55 = arith.constant 0 : index
    %121 = vector.load %arg8[%c1_53, %c0_54, %c0_55] : memref<8x2x64xbf16, #tpu.memory_space<vmem>>, vector<1x2x32xbf16>
    %122 = vector.shape_cast %121 : vector<1x2x32xbf16> to vector<2x32xbf16>
    %123 = vector.shape_cast %120 : vector<2x32xbf16> to vector<1x2x32xbf16>
    tpu.vector_store %arg8[%c1_53, %c0_54, %c0_55], %123 {strides = array<i32>} : memref<8x2x64xbf16, #tpu.memory_space<vmem>>, vector<1x2x32xbf16>,
    %124 = arith.subf %115, %53 : vector<2x32xf32>
    %125 = vector.broadcast %117 : vector<2x1xf32> to vector<2x32xf32>
    %126 = arith.mulf %125, %124 : vector<2x32xf32>
    %127 = arith.addf %53, %126 : vector<2x32xf32>
    %128 = arith.subf %113, %57 : vector<2x32xf32>
    %129 = vector.broadcast %117 : vector<2x1xf32> to vector<2x32xf32>
    %130 = arith.mulf %129, %128 : vector<2x32xf32>
    %131 = arith.addf %57, %130 : vector<2x32xf32>
    %c6 = arith.constant 6 : index
    %c0_56 = arith.constant 0 : index
    %c128_57 = arith.constant 128 : index
    %132 = vector.load %arg9[%c6, %c0_56, %c128_57] : memref<8x2x256xf32, #tpu.memory_space<vmem>>, vector<1x2x128xf32>
    %133 = vector.shape_cast %132 : vector<1x2x128xf32> to vector<2x128xf32>
    %134 = arith.truncf %90 : vector<2x32xf32> to vector<2x32xbf16>
    %cst_58 = arith.constant dense<0.000000e+00> : vector<2x128xf32>
    %135 = tpu.matmul %134, %12, %cst_58 {dimension_numbers = #tpu.dot_dimension_numbers<[1], [0], [0], [1], [0, 0, 1, 1], [], []>} : vector<2x32xbf16>, vector<32x128xbf16>, vector<2x128xf32> -> vector<2x128xf32>
    %136 = arith.addf %133, %135 : vector<2x128xf32>
    %137 = vector.extract_strided_slice %136 {offsets = [0, 0], sizes = [2, 96], strides = [1, 1]} : vector<2x128xf32> to vector<2x96xf32>
    %138 = arith.negf %137 : vector<2x96xf32>
    %139 = math.exp %138 : vector<2x96xf32>
    %cst_59 = arith.constant 1.000000e+00 : f32
    %140 = vector.broadcast %cst_59 : f32 to vector<2x96xf32>
    %141 = arith.addf %140, %139 : vector<2x96xf32>
    %142 = arith.divf %140, %141 : vector<2x96xf32>
    %143 = vector.extract_strided_slice %142 {offsets = [0, 0], sizes = [2, 32], strides = [1, 1]} : vector<2x96xf32> to vector<2x32xf32>
    %144 = vector.extract_strided_slice %142 {offsets = [0, 32], sizes = [2, 32], strides = [1, 1]} : vector<2x96xf32> to vector<2x32xf32>
    %145 = vector.extract_strided_slice %142 {offsets = [0, 64], sizes = [2, 32], strides = [1, 1]} : vector<2x96xf32> to vector<2x32xf32>
    %146 = vector.extract_strided_slice %136 {offsets = [0, 96], sizes = [2, 32], strides = [1, 1]} : vector<2x128xf32> to vector<2x32xf32>
    %147 = math.tanh %146 : vector<2x32xf32>
    %148 = arith.mulf %144, %94 : vector<2x32xf32>
    %149 = arith.mulf %143, %147 : vector<2x32xf32>
    %150 = arith.addf %148, %149 : vector<2x32xf32>
    %151 = math.tanh %150 : vector<2x32xf32>
    %152 = arith.mulf %145, %151 : vector<2x32xf32>
    %c6_60 = arith.constant 6 : index
    %c0_61 = arith.constant 0 : index
    %c0_62 = arith.constant 0 : index
    %153 = vector.load %arg7[%c6_60, %c0_61, %c0_62] : memref<8x2x1xf32, #tpu.memory_space<vmem>>, vector<1x2x1xf32>
    %154 = vector.shape_cast %153 : vector<1x2x1xf32> to vector<2x1xf32>
    %155 = vector.broadcast %154 : vector<2x1xf32> to vector<2x32xf32>
    %156 = arith.mulf %152, %155 : vector<2x32xf32>
    %157 = arith.truncf %156 : vector<2x32xf32> to vector<2x32xbf16>
    %c6_63 = arith.constant 6 : index
    %c0_64 = arith.constant 0 : index
    %c32_65 = arith.constant 32 : index
    %158 = vector.load %arg8[%c6_63, %c0_64, %c32_65] : memref<8x2x64xbf16, #tpu.memory_space<vmem>>, vector<1x2x32xbf16>
    %159 = vector.shape_cast %158 : vector<1x2x32xbf16> to vector<2x32xbf16>
    %160 = vector.shape_cast %157 : vector<2x32xbf16> to vector<1x2x32xbf16>
    tpu.vector_store %arg8[%c6_63, %c0_64, %c32_65], %160 {strides = array<i32>} : memref<8x2x64xbf16, #tpu.memory_space<vmem>>, vector<1x2x32xbf16>,
    %161 = arith.subf %152, %90 : vector<2x32xf32>
    %162 = vector.broadcast %154 : vector<2x1xf32> to vector<2x32xf32>
    %163 = arith.mulf %162, %161 : vector<2x32xf32>
    %164 = arith.addf %90, %163 : vector<2x32xf32>
    %165 = arith.subf %150, %94 : vector<2x32xf32>
    %166 = vector.broadcast %154 : vector<2x1xf32> to vector<2x32xf32>
    %167 = arith.mulf %166, %165 : vector<2x32xf32>
    %168 = arith.addf %94, %167 : vector<2x32xf32>
    %c2 = arith.constant 2 : index
    %c0_66 = arith.constant 0 : index
    %c0_67 = arith.constant 0 : index
    %169 = vector.load %arg9[%c2, %c0_66, %c0_67] : memref<8x2x256xf32, #tpu.memory_space<vmem>>, vector<1x2x128xf32>
    %170 = vector.shape_cast %169 : vector<1x2x128xf32> to vector<2x128xf32>
    %171 = arith.truncf %127 : vector<2x32xf32> to vector<2x32xbf16>
    %cst_68 = arith.constant dense<0.000000e+00> : vector<2x128xf32>
    %172 = tpu.matmul %171, %10, %cst_68 {dimension_numbers = #tpu.dot_dimension_numbers<[1], [0], [0], [1], [0, 0, 1, 1], [], []>} : vector<2x32xbf16>, vector<32x128xbf16>, vector<2x128xf32> -> vector<2x128xf32>
    %173 = arith.addf %170, %172 : vector<2x128xf32>
    %174 = vector.extract_strided_slice %173 {offsets = [0, 0], sizes = [2, 96], strides = [1, 1]} : vector<2x128xf32> to vector<2x96xf32>
    %175 = arith.negf %174 : vector<2x96xf32>
    %176 = math.exp %175 : vector<2x96xf32>
    %cst_69 = arith.constant 1.000000e+00 : f32
    %177 = vector.broadcast %cst_69 : f32 to vector<2x96xf32>
    %178 = arith.addf %177, %176 : vector<2x96xf32>
    %179 = arith.divf %177, %178 : vector<2x96xf32>
    %180 = vector.extract_strided_slice %179 {offsets = [0, 0], sizes = [2, 32], strides = [1, 1]} : vector<2x96xf32> to vector<2x32xf32>
    %181 = vector.extract_strided_slice %179 {offsets = [0, 32], sizes = [2, 32], strides = [1, 1]} : vector<2x96xf32> to vector<2x32xf32>
    %182 = vector.extract_strided_slice %179 {offsets = [0, 64], sizes = [2, 32], strides = [1, 1]} : vector<2x96xf32> to vector<2x32xf32>
    %183 = vector.extract_strided_slice %173 {offsets = [0, 96], sizes = [2, 32], strides = [1, 1]} : vector<2x128xf32> to vector<2x32xf32>
    %184 = math.tanh %183 : vector<2x32xf32>
    %185 = arith.mulf %181, %131 : vector<2x32xf32>
    %186 = arith.mulf %180, %184 : vector<2x32xf32>
    %187 = arith.addf %185, %186 : vector<2x32xf32>
    %188 = math.tanh %187 : vector<2x32xf32>
    %189 = arith.mulf %182, %188 : vector<2x32xf32>
    %c2_70 = arith.constant 2 : index
    %c0_71 = arith.constant 0 : index
    %c0_72 = arith.constant 0 : index
    %190 = vector.load %arg7[%c2_70, %c0_71, %c0_72] : memref<8x2x1xf32, #tpu.memory_space<vmem>>, vector<1x2x1xf32>
    %191 = vector.shape_cast %190 : vector<1x2x1xf32> to vector<2x1xf32>
    %192 = vector.broadcast %191 : vector<2x1xf32> to vector<2x32xf32>
    %193 = arith.mulf %189, %192 : vector<2x32xf32>
    %194 = arith.truncf %193 : vector<2x32xf32> to vector<2x32xbf16>
    %c2_73 = arith.constant 2 : index
    %c0_74 = arith.constant 0 : index
    %c0_75 = arith.constant 0 : index
    %195 = vector.load %arg8[%c2_73, %c0_74, %c0_75] : memref<8x2x64xbf16, #tpu.memory_space<vmem>>, vector<1x2x32xbf16>
    %196 = vector.shape_cast %195 : vector<1x2x32xbf16> to vector<2x32xbf16>
    %197 = vector.shape_cast %194 : vector<2x32xbf16> to vector<1x2x32xbf16>
    tpu.vector_store %arg8[%c2_73, %c0_74, %c0_75], %197 {strides = array<i32>} : memref<8x2x64xbf16, #tpu.memory_space<vmem>>, vector<1x2x32xbf16>,
    %198 = arith.subf %189, %127 : vector<2x32xf32>
    %199 = vector.broadcast %191 : vector<2x1xf32> to vector<2x32xf32>
    %200 = arith.mulf %199, %198 : vector<2x32xf32>
    %201 = arith.addf %127, %200 : vector<2x32xf32>
    %202 = arith.subf %187, %131 : vector<2x32xf32>
    %203 = vector.broadcast %191 : vector<2x1xf32> to vector<2x32xf32>
    %204 = arith.mulf %203, %202 : vector<2x32xf32>
    %205 = arith.addf %131, %204 : vector<2x32xf32>
    %c5 = arith.constant 5 : index
    %c0_76 = arith.constant 0 : index
    %c128_77 = arith.constant 128 : index
    %206 = vector.load %arg9[%c5, %c0_76, %c128_77] : memref<8x2x256xf32, #tpu.memory_space<vmem>>, vector<1x2x128xf32>
    %207 = vector.shape_cast %206 : vector<1x2x128xf32> to vector<2x128xf32>
    %208 = arith.truncf %164 : vector<2x32xf32> to vector<2x32xbf16>
    %cst_78 = arith.constant dense<0.000000e+00> : vector<2x128xf32>
    %209 = tpu.matmul %208, %12, %cst_78 {dimension_numbers = #tpu.dot_dimension_numbers<[1], [0], [0], [1], [0, 0, 1, 1], [], []>} : vector<2x32xbf16>, vector<32x128xbf16>, vector<2x128xf32> -> vector<2x128xf32>
    %210 = arith.addf %207, %209 : vector<2x128xf32>
    %211 = vector.extract_strided_slice %210 {offsets = [0, 0], sizes = [2, 96], strides = [1, 1]} : vector<2x128xf32> to vector<2x96xf32>
    %212 = arith.negf %211 : vector<2x96xf32>
    %213 = math.exp %212 : vector<2x96xf32>
    %cst_79 = arith.constant 1.000000e+00 : f32
    %214 = vector.broadcast %cst_79 : f32 to vector<2x96xf32>
    %215 = arith.addf %214, %213 : vector<2x96xf32>
    %216 = arith.divf %214, %215 : vector<2x96xf32>
    %217 = vector.extract_strided_slice %216 {offsets = [0, 0], sizes = [2, 32], strides = [1, 1]} : vector<2x96xf32> to vector<2x32xf32>
    %218 = vector.extract_strided_slice %216 {offsets = [0, 32], sizes = [2, 32], strides = [1, 1]} : vector<2x96xf32> to vector<2x32xf32>
    %219 = vector.extract_strided_slice %216 {offsets = [0, 64], sizes = [2, 32], strides = [1, 1]} : vector<2x96xf32> to vector<2x32xf32>
    %220 = vector.extract_strided_slice %210 {offsets = [0, 96], sizes = [2, 32], strides = [1, 1]} : vector<2x128xf32> to vector<2x32xf32>
    %221 = math.tanh %220 : vector<2x32xf32>
    %222 = arith.mulf %218, %168 : vector<2x32xf32>
    %223 = arith.mulf %217, %221 : vector<2x32xf32>
    %224 = arith.addf %222, %223 : vector<2x32xf32>
    %225 = math.tanh %224 : vector<2x32xf32>
    %226 = arith.mulf %219, %225 : vector<2x32xf32>
    %c5_80 = arith.constant 5 : index
    %c0_81 = arith.constant 0 : index
    %c0_82 = arith.constant 0 : index
    %227 = vector.load %arg7[%c5_80, %c0_81, %c0_82] : memref<8x2x1xf32, #tpu.memory_space<vmem>>, vector<1x2x1xf32>
    %228 = vector.shape_cast %227 : vector<1x2x1xf32> to vector<2x1xf32>
    %229 = vector.broadcast %228 : vector<2x1xf32> to vector<2x32xf32>
    %230 = arith.mulf %226, %229 : vector<2x32xf32>
    %231 = arith.truncf %230 : vector<2x32xf32> to vector<2x32xbf16>
    %c5_83 = arith.constant 5 : index
    %c0_84 = arith.constant 0 : index
    %c32_85 = arith.constant 32 : index
    %232 = vector.load %arg8[%c5_83, %c0_84, %c32_85] : memref<8x2x64xbf16, #tpu.memory_space<vmem>>, vector<1x2x32xbf16>
    %233 = vector.shape_cast %232 : vector<1x2x32xbf16> to vector<2x32xbf16>
    %234 = vector.shape_cast %231 : vector<2x32xbf16> to vector<1x2x32xbf16>
    tpu.vector_store %arg8[%c5_83, %c0_84, %c32_85], %234 {strides = array<i32>} : memref<8x2x64xbf16, #tpu.memory_space<vmem>>, vector<1x2x32xbf16>,
    %235 = arith.subf %226, %164 : vector<2x32xf32>
    %236 = vector.broadcast %228 : vector<2x1xf32> to vector<2x32xf32>
    %237 = arith.mulf %236, %235 : vector<2x32xf32>
    %238 = arith.addf %164, %237 : vector<2x32xf32>
    %239 = arith.subf %224, %168 : vector<2x32xf32>
    %240 = vector.broadcast %228 : vector<2x1xf32> to vector<2x32xf32>
    %241 = arith.mulf %240, %239 : vector<2x32xf32>
    %242 = arith.addf %168, %241 : vector<2x32xf32>
    %c3 = arith.constant 3 : index
    %c0_86 = arith.constant 0 : index
    %c0_87 = arith.constant 0 : index
    %243 = vector.load %arg9[%c3, %c0_86, %c0_87] : memref<8x2x256xf32, #tpu.memory_space<vmem>>, vector<1x2x128xf32>
    %244 = vector.shape_cast %243 : vector<1x2x128xf32> to vector<2x128xf32>
    %245 = arith.truncf %201 : vector<2x32xf32> to vector<2x32xbf16>
    %cst_88 = arith.constant dense<0.000000e+00> : vector<2x128xf32>
    %246 = tpu.matmul %245, %10, %cst_88 {dimension_numbers = #tpu.dot_dimension_numbers<[1], [0], [0], [1], [0, 0, 1, 1], [], []>} : vector<2x32xbf16>, vector<32x128xbf16>, vector<2x128xf32> -> vector<2x128xf32>
    %247 = arith.addf %244, %246 : vector<2x128xf32>
    %248 = vector.extract_strided_slice %247 {offsets = [0, 0], sizes = [2, 96], strides = [1, 1]} : vector<2x128xf32> to vector<2x96xf32>
    %249 = arith.negf %248 : vector<2x96xf32>
    %250 = math.exp %249 : vector<2x96xf32>
    %cst_89 = arith.constant 1.000000e+00 : f32
    %251 = vector.broadcast %cst_89 : f32 to vector<2x96xf32>
    %252 = arith.addf %251, %250 : vector<2x96xf32>
    %253 = arith.divf %251, %252 : vector<2x96xf32>
    %254 = vector.extract_strided_slice %253 {offsets = [0, 0], sizes = [2, 32], strides = [1, 1]} : vector<2x96xf32> to vector<2x32xf32>
    %255 = vector.extract_strided_slice %253 {offsets = [0, 32], sizes = [2, 32], strides = [1, 1]} : vector<2x96xf32> to vector<2x32xf32>
    %256 = vector.extract_strided_slice %253 {offsets = [0, 64], sizes = [2, 32], strides = [1, 1]} : vector<2x96xf32> to vector<2x32xf32>
    %257 = vector.extract_strided_slice %247 {offsets = [0, 96], sizes = [2, 32], strides = [1, 1]} : vector<2x128xf32> to vector<2x32xf32>
    %258 = math.tanh %257 : vector<2x32xf32>
    %259 = arith.mulf %255, %205 : vector<2x32xf32>
    %260 = arith.mulf %254, %258 : vector<2x32xf32>
    %261 = arith.addf %259, %260 : vector<2x32xf32>
    %262 = math.tanh %261 : vector<2x32xf32>
    %263 = arith.mulf %256, %262 : vector<2x32xf32>
    %c3_90 = arith.constant 3 : index
    %c0_91 = arith.constant 0 : index
    %c0_92 = arith.constant 0 : index
    %264 = vector.load %arg7[%c3_90, %c0_91, %c0_92] : memref<8x2x1xf32, #tpu.memory_space<vmem>>, vector<1x2x1xf32>
    %265 = vector.shape_cast %264 : vector<1x2x1xf32> to vector<2x1xf32>
    %266 = vector.broadcast %265 : vector<2x1xf32> to vector<2x32xf32>
    %267 = arith.mulf %263, %266 : vector<2x32xf32>
    %268 = arith.truncf %267 : vector<2x32xf32> to vector<2x32xbf16>
    %c3_93 = arith.constant 3 : index
    %c0_94 = arith.constant 0 : index
    %c0_95 = arith.constant 0 : index
    %269 = vector.load %arg8[%c3_93, %c0_94, %c0_95] : memref<8x2x64xbf16, #tpu.memory_space<vmem>>, vector<1x2x32xbf16>
    %270 = vector.shape_cast %269 : vector<1x2x32xbf16> to vector<2x32xbf16>
    %271 = vector.shape_cast %268 : vector<2x32xbf16> to vector<1x2x32xbf16>
    tpu.vector_store %arg8[%c3_93, %c0_94, %c0_95], %271 {strides = array<i32>} : memref<8x2x64xbf16, #tpu.memory_space<vmem>>, vector<1x2x32xbf16>,
    %272 = arith.subf %263, %201 : vector<2x32xf32>
    %273 = vector.broadcast %265 : vector<2x1xf32> to vector<2x32xf32>
    %274 = arith.mulf %273, %272 : vector<2x32xf32>
    %275 = arith.addf %201, %274 : vector<2x32xf32>
    %276 = arith.subf %261, %205 : vector<2x32xf32>
    %277 = vector.broadcast %265 : vector<2x1xf32> to vector<2x32xf32>
    %278 = arith.mulf %277, %276 : vector<2x32xf32>
    %279 = arith.addf %205, %278 : vector<2x32xf32>
    %c4 = arith.constant 4 : index
    %c0_96 = arith.constant 0 : index
    %c128_97 = arith.constant 128 : index
    %280 = vector.load %arg9[%c4, %c0_96, %c128_97] : memref<8x2x256xf32, #tpu.memory_space<vmem>>, vector<1x2x128xf32>
    %281 = vector.shape_cast %280 : vector<1x2x128xf32> to vector<2x128xf32>
    %282 = arith.truncf %238 : vector<2x32xf32> to vector<2x32xbf16>
    %cst_98 = arith.constant dense<0.000000e+00> : vector<2x128xf32>
    %283 = tpu.matmul %282, %12, %cst_98 {dimension_numbers = #tpu.dot_dimension_numbers<[1], [0], [0], [1], [0, 0, 1, 1], [], []>} : vector<2x32xbf16>, vector<32x128xbf16>, vector<2x128xf32> -> vector<2x128xf32>
    %284 = arith.addf %281, %283 : vector<2x128xf32>
    %285 = vector.extract_strided_slice %284 {offsets = [0, 0], sizes = [2, 96], strides = [1, 1]} : vector<2x128xf32> to vector<2x96xf32>
    %286 = arith.negf %285 : vector<2x96xf32>
    %287 = math.exp %286 : vector<2x96xf32>
    %cst_99 = arith.constant 1.000000e+00 : f32
    %288 = vector.broadcast %cst_99 : f32 to vector<2x96xf32>
    %289 = arith.addf %288, %287 : vector<2x96xf32>
    %290 = arith.divf %288, %289 : vector<2x96xf32>
    %291 = vector.extract_strided_slice %290 {offsets = [0, 0], sizes = [2, 32], strides = [1, 1]} : vector<2x96xf32> to vector<2x32xf32>
    %292 = vector.extract_strided_slice %290 {offsets = [0, 32], sizes = [2, 32], strides = [1, 1]} : vector<2x96xf32> to vector<2x32xf32>
    %293 = vector.extract_strided_slice %290 {offsets = [0, 64], sizes = [2, 32], strides = [1, 1]} : vector<2x96xf32> to vector<2x32xf32>
    %294 = vector.extract_strided_slice %284 {offsets = [0, 96], sizes = [2, 32], strides = [1, 1]} : vector<2x128xf32> to vector<2x32xf32>
    %295 = math.tanh %294 : vector<2x32xf32>
    %296 = arith.mulf %292, %242 : vector<2x32xf32>
    %297 = arith.mulf %291, %295 : vector<2x32xf32>
    %298 = arith.addf %296, %297 : vector<2x32xf32>
    %299 = math.tanh %298 : vector<2x32xf32>
    %300 = arith.mulf %293, %299 : vector<2x32xf32>
    %c4_100 = arith.constant 4 : index
    %c0_101 = arith.constant 0 : index
    %c0_102 = arith.constant 0 : index
    %301 = vector.load %arg7[%c4_100, %c0_101, %c0_102] : memref<8x2x1xf32, #tpu.memory_space<vmem>>, vector<1x2x1xf32>
    %302 = vector.shape_cast %301 : vector<1x2x1xf32> to vector<2x1xf32>
    %303 = vector.broadcast %302 : vector<2x1xf32> to vector<2x32xf32>
    %304 = arith.mulf %300, %303 : vector<2x32xf32>
    %305 = arith.truncf %304 : vector<2x32xf32> to vector<2x32xbf16>
    %c4_103 = arith.constant 4 : index
    %c0_104 = arith.constant 0 : index
    %c32_105 = arith.constant 32 : index
    %306 = vector.load %arg8[%c4_103, %c0_104, %c32_105] : memref<8x2x64xbf16, #tpu.memory_space<vmem>>, vector<1x2x32xbf16>
    %307 = vector.shape_cast %306 : vector<1x2x32xbf16> to vector<2x32xbf16>
    %308 = vector.shape_cast %305 : vector<2x32xbf16> to vector<1x2x32xbf16>
    tpu.vector_store %arg8[%c4_103, %c0_104, %c32_105], %308 {strides = array<i32>} : memref<8x2x64xbf16, #tpu.memory_space<vmem>>, vector<1x2x32xbf16>,
    %309 = arith.subf %300, %238 : vector<2x32xf32>
    %310 = vector.broadcast %302 : vector<2x1xf32> to vector<2x32xf32>
    %311 = arith.mulf %310, %309 : vector<2x32xf32>
    %312 = arith.addf %238, %311 : vector<2x32xf32>
    %313 = arith.subf %298, %242 : vector<2x32xf32>
    %314 = vector.broadcast %302 : vector<2x1xf32> to vector<2x32xf32>
    %315 = arith.mulf %314, %313 : vector<2x32xf32>
    %316 = arith.addf %242, %315 : vector<2x32xf32>
    %c4_106 = arith.constant 4 : index
    %c0_107 = arith.constant 0 : index
    %c0_108 = arith.constant 0 : index
    %317 = vector.load %arg9[%c4_106, %c0_107, %c0_108] : memref<8x2x256xf32, #tpu.memory_space<vmem>>, vector<1x2x128xf32>
    %318 = vector.shape_cast %317 : vector<1x2x128xf32> to vector<2x128xf32>
    %319 = arith.truncf %275 : vector<2x32xf32> to vector<2x32xbf16>
    %cst_109 = arith.constant dense<0.000000e+00> : vector<2x128xf32>
    %320 = tpu.matmul %319, %10, %cst_109 {dimension_numbers = #tpu.dot_dimension_numbers<[1], [0], [0], [1], [0, 0, 1, 1], [], []>} : vector<2x32xbf16>, vector<32x128xbf16>, vector<2x128xf32> -> vector<2x128xf32>
    %321 = arith.addf %318, %320 : vector<2x128xf32>
    %322 = vector.extract_strided_slice %321 {offsets = [0, 0], sizes = [2, 96], strides = [1, 1]} : vector<2x128xf32> to vector<2x96xf32>
    %323 = arith.negf %322 : vector<2x96xf32>
    %324 = math.exp %323 : vector<2x96xf32>
    %cst_110 = arith.constant 1.000000e+00 : f32
    %325 = vector.broadcast %cst_110 : f32 to vector<2x96xf32>
    %326 = arith.addf %325, %324 : vector<2x96xf32>
    %327 = arith.divf %325, %326 : vector<2x96xf32>
    %328 = vector.extract_strided_slice %327 {offsets = [0, 0], sizes = [2, 32], strides = [1, 1]} : vector<2x96xf32> to vector<2x32xf32>
    %329 = vector.extract_strided_slice %327 {offsets = [0, 32], sizes = [2, 32], strides = [1, 1]} : vector<2x96xf32> to vector<2x32xf32>
    %330 = vector.extract_strided_slice %327 {offsets = [0, 64], sizes = [2, 32], strides = [1, 1]} : vector<2x96xf32> to vector<2x32xf32>
    %331 = vector.extract_strided_slice %321 {offsets = [0, 96], sizes = [2, 32], strides = [1, 1]} : vector<2x128xf32> to vector<2x32xf32>
    %332 = math.tanh %331 : vector<2x32xf32>
    %333 = arith.mulf %329, %279 : vector<2x32xf32>
    %334 = arith.mulf %328, %332 : vector<2x32xf32>
    %335 = arith.addf %333, %334 : vector<2x32xf32>
    %336 = math.tanh %335 : vector<2x32xf32>
    %337 = arith.mulf %330, %336 : vector<2x32xf32>
    %c4_111 = arith.constant 4 : index
    %c0_112 = arith.constant 0 : index
    %c0_113 = arith.constant 0 : index
    %338 = vector.load %arg7[%c4_111, %c0_112, %c0_113] : memref<8x2x1xf32, #tpu.memory_space<vmem>>, vector<1x2x1xf32>
    %339 = vector.shape_cast %338 : vector<1x2x1xf32> to vector<2x1xf32>
    %340 = vector.broadcast %339 : vector<2x1xf32> to vector<2x32xf32>
    %341 = arith.mulf %337, %340 : vector<2x32xf32>
    %342 = arith.truncf %341 : vector<2x32xf32> to vector<2x32xbf16>
    %c4_114 = arith.constant 4 : index
    %c0_115 = arith.constant 0 : index
    %c0_116 = arith.constant 0 : index
    %343 = vector.load %arg8[%c4_114, %c0_115, %c0_116] : memref<8x2x64xbf16, #tpu.memory_space<vmem>>, vector<1x2x32xbf16>
    %344 = vector.shape_cast %343 : vector<1x2x32xbf16> to vector<2x32xbf16>
    %345 = vector.shape_cast %342 : vector<2x32xbf16> to vector<1x2x32xbf16>
    tpu.vector_store %arg8[%c4_114, %c0_115, %c0_116], %345 {strides = array<i32>} : memref<8x2x64xbf16, #tpu.memory_space<vmem>>, vector<1x2x32xbf16>,
    %346 = arith.subf %337, %275 : vector<2x32xf32>
    %347 = vector.broadcast %339 : vector<2x1xf32> to vector<2x32xf32>
    %348 = arith.mulf %347, %346 : vector<2x32xf32>
    %349 = arith.addf %275, %348 : vector<2x32xf32>
    %350 = arith.subf %335, %279 : vector<2x32xf32>
    %351 = vector.broadcast %339 : vector<2x1xf32> to vector<2x32xf32>
    %352 = arith.mulf %351, %350 : vector<2x32xf32>
    %353 = arith.addf %279, %352 : vector<2x32xf32>
    %c3_117 = arith.constant 3 : index
    %c0_118 = arith.constant 0 : index
    %c128_119 = arith.constant 128 : index
    %354 = vector.load %arg9[%c3_117, %c0_118, %c128_119] : memref<8x2x256xf32, #tpu.memory_space<vmem>>, vector<1x2x128xf32>
    %355 = vector.shape_cast %354 : vector<1x2x128xf32> to vector<2x128xf32>
    %356 = arith.truncf %312 : vector<2x32xf32> to vector<2x32xbf16>
    %cst_120 = arith.constant dense<0.000000e+00> : vector<2x128xf32>
    %357 = tpu.matmul %356, %12, %cst_120 {dimension_numbers = #tpu.dot_dimension_numbers<[1], [0], [0], [1], [0, 0, 1, 1], [], []>} : vector<2x32xbf16>, vector<32x128xbf16>, vector<2x128xf32> -> vector<2x128xf32>
    %358 = arith.addf %355, %357 : vector<2x128xf32>
    %359 = vector.extract_strided_slice %358 {offsets = [0, 0], sizes = [2, 96], strides = [1, 1]} : vector<2x128xf32> to vector<2x96xf32>
    %360 = arith.negf %359 : vector<2x96xf32>
    %361 = math.exp %360 : vector<2x96xf32>
    %cst_121 = arith.constant 1.000000e+00 : f32
    %362 = vector.broadcast %cst_121 : f32 to vector<2x96xf32>
    %363 = arith.addf %362, %361 : vector<2x96xf32>
    %364 = arith.divf %362, %363 : vector<2x96xf32>
    %365 = vector.extract_strided_slice %364 {offsets = [0, 0], sizes = [2, 32], strides = [1, 1]} : vector<2x96xf32> to vector<2x32xf32>
    %366 = vector.extract_strided_slice %364 {offsets = [0, 32], sizes = [2, 32], strides = [1, 1]} : vector<2x96xf32> to vector<2x32xf32>
    %367 = vector.extract_strided_slice %364 {offsets = [0, 64], sizes = [2, 32], strides = [1, 1]} : vector<2x96xf32> to vector<2x32xf32>
    %368 = vector.extract_strided_slice %358 {offsets = [0, 96], sizes = [2, 32], strides = [1, 1]} : vector<2x128xf32> to vector<2x32xf32>
    %369 = math.tanh %368 : vector<2x32xf32>
    %370 = arith.mulf %366, %316 : vector<2x32xf32>
    %371 = arith.mulf %365, %369 : vector<2x32xf32>
    %372 = arith.addf %370, %371 : vector<2x32xf32>
    %373 = math.tanh %372 : vector<2x32xf32>
    %374 = arith.mulf %367, %373 : vector<2x32xf32>
    %c3_122 = arith.constant 3 : index
    %c0_123 = arith.constant 0 : index
    %c0_124 = arith.constant 0 : index
    %375 = vector.load %arg7[%c3_122, %c0_123, %c0_124] : memref<8x2x1xf32, #tpu.memory_space<vmem>>, vector<1x2x1xf32>
    %376 = vector.shape_cast %375 : vector<1x2x1xf32> to vector<2x1xf32>
    %377 = vector.broadcast %376 : vector<2x1xf32> to vector<2x32xf32>
    %378 = arith.mulf %374, %377 : vector<2x32xf32>
    %379 = arith.truncf %378 : vector<2x32xf32> to vector<2x32xbf16>
    %c3_125 = arith.constant 3 : index
    %c0_126 = arith.constant 0 : index
    %c32_127 = arith.constant 32 : index
    %380 = vector.load %arg8[%c3_125, %c0_126, %c32_127] : memref<8x2x64xbf16, #tpu.memory_space<vmem>>, vector<1x2x32xbf16>
    %381 = vector.shape_cast %380 : vector<1x2x32xbf16> to vector<2x32xbf16>
    %382 = vector.shape_cast %379 : vector<2x32xbf16> to vector<1x2x32xbf16>
    tpu.vector_store %arg8[%c3_125, %c0_126, %c32_127], %382 {strides = array<i32>} : memref<8x2x64xbf16, #tpu.memory_space<vmem>>, vector<1x2x32xbf16>,
    %383 = arith.subf %374, %312 : vector<2x32xf32>
    %384 = vector.broadcast %376 : vector<2x1xf32> to vector<2x32xf32>
    %385 = arith.mulf %384, %383 : vector<2x32xf32>
    %386 = arith.addf %312, %385 : vector<2x32xf32>
    %387 = arith.subf %372, %316 : vector<2x32xf32>
    %388 = vector.broadcast %376 : vector<2x1xf32> to vector<2x32xf32>
    %389 = arith.mulf %388, %387 : vector<2x32xf32>
    %390 = arith.addf %316, %389 : vector<2x32xf32>
    %c5_128 = arith.constant 5 : index
    %c0_129 = arith.constant 0 : index
    %c0_130 = arith.constant 0 : index
    %391 = vector.load %arg9[%c5_128, %c0_129, %c0_130] : memref<8x2x256xf32, #tpu.memory_space<vmem>>, vector<1x2x128xf32>
    %392 = vector.shape_cast %391 : vector<1x2x128xf32> to vector<2x128xf32>
    %393 = arith.truncf %349 : vector<2x32xf32> to vector<2x32xbf16>
    %cst_131 = arith.constant dense<0.000000e+00> : vector<2x128xf32>
    %394 = tpu.matmul %393, %10, %cst_131 {dimension_numbers = #tpu.dot_dimension_numbers<[1], [0], [0], [1], [0, 0, 1, 1], [], []>} : vector<2x32xbf16>, vector<32x128xbf16>, vector<2x128xf32> -> vector<2x128xf32>
    %395 = arith.addf %392, %394 : vector<2x128xf32>
    %396 = vector.extract_strided_slice %395 {offsets = [0, 0], sizes = [2, 96], strides = [1, 1]} : vector<2x128xf32> to vector<2x96xf32>
    %397 = arith.negf %396 : vector<2x96xf32>
    %398 = math.exp %397 : vector<2x96xf32>
    %cst_132 = arith.constant 1.000000e+00 : f32
    %399 = vector.broadcast %cst_132 : f32 to vector<2x96xf32>
    %400 = arith.addf %399, %398 : vector<2x96xf32>
    %401 = arith.divf %399, %400 : vector<2x96xf32>
    %402 = vector.extract_strided_slice %401 {offsets = [0, 0], sizes = [2, 32], strides = [1, 1]} : vector<2x96xf32> to vector<2x32xf32>
    %403 = vector.extract_strided_slice %401 {offsets = [0, 32], sizes = [2, 32], strides = [1, 1]} : vector<2x96xf32> to vector<2x32xf32>
    %404 = vector.extract_strided_slice %401 {offsets = [0, 64], sizes = [2, 32], strides = [1, 1]} : vector<2x96xf32> to vector<2x32xf32>
    %405 = vector.extract_strided_slice %395 {offsets = [0, 96], sizes = [2, 32], strides = [1, 1]} : vector<2x128xf32> to vector<2x32xf32>
    %406 = math.tanh %405 : vector<2x32xf32>
    %407 = arith.mulf %403, %353 : vector<2x32xf32>
    %408 = arith.mulf %402, %406 : vector<2x32xf32>
    %409 = arith.addf %407, %408 : vector<2x32xf32>
    %410 = math.tanh %409 : vector<2x32xf32>
    %411 = arith.mulf %404, %410 : vector<2x32xf32>
    %c5_133 = arith.constant 5 : index
    %c0_134 = arith.constant 0 : index
    %c0_135 = arith.constant 0 : index
    %412 = vector.load %arg7[%c5_133, %c0_134, %c0_135] : memref<8x2x1xf32, #tpu.memory_space<vmem>>, vector<1x2x1xf32>
    %413 = vector.shape_cast %412 : vector<1x2x1xf32> to vector<2x1xf32>
    %414 = vector.broadcast %413 : vector<2x1xf32> to vector<2x32xf32>
    %415 = arith.mulf %411, %414 : vector<2x32xf32>
    %416 = arith.truncf %415 : vector<2x32xf32> to vector<2x32xbf16>
    %c5_136 = arith.constant 5 : index
    %c0_137 = arith.constant 0 : index
    %c0_138 = arith.constant 0 : index
    %417 = vector.load %arg8[%c5_136, %c0_137, %c0_138] : memref<8x2x64xbf16, #tpu.memory_space<vmem>>, vector<1x2x32xbf16>
    %418 = vector.shape_cast %417 : vector<1x2x32xbf16> to vector<2x32xbf16>
    %419 = vector.shape_cast %416 : vector<2x32xbf16> to vector<1x2x32xbf16>
    tpu.vector_store %arg8[%c5_136, %c0_137, %c0_138], %419 {strides = array<i32>} : memref<8x2x64xbf16, #tpu.memory_space<vmem>>, vector<1x2x32xbf16>,
    %420 = arith.subf %411, %349 : vector<2x32xf32>
    %421 = vector.broadcast %413 : vector<2x1xf32> to vector<2x32xf32>
    %422 = arith.mulf %421, %420 : vector<2x32xf32>
    %423 = arith.addf %349, %422 : vector<2x32xf32>
    %424 = arith.subf %409, %353 : vector<2x32xf32>
    %425 = vector.broadcast %413 : vector<2x1xf32> to vector<2x32xf32>
    %426 = arith.mulf %425, %424 : vector<2x32xf32>
    %427 = arith.addf %353, %426 : vector<2x32xf32>
    %c2_139 = arith.constant 2 : index
    %c0_140 = arith.constant 0 : index
    %c128_141 = arith.constant 128 : index
    %428 = vector.load %arg9[%c2_139, %c0_140, %c128_141] : memref<8x2x256xf32, #tpu.memory_space<vmem>>, vector<1x2x128xf32>
    %429 = vector.shape_cast %428 : vector<1x2x128xf32> to vector<2x128xf32>
    %430 = arith.truncf %386 : vector<2x32xf32> to vector<2x32xbf16>
    %cst_142 = arith.constant dense<0.000000e+00> : vector<2x128xf32>
    %431 = tpu.matmul %430, %12, %cst_142 {dimension_numbers = #tpu.dot_dimension_numbers<[1], [0], [0], [1], [0, 0, 1, 1], [], []>} : vector<2x32xbf16>, vector<32x128xbf16>, vector<2x128xf32> -> vector<2x128xf32>
    %432 = arith.addf %429, %431 : vector<2x128xf32>
    %433 = vector.extract_strided_slice %432 {offsets = [0, 0], sizes = [2, 96], strides = [1, 1]} : vector<2x128xf32> to vector<2x96xf32>
    %434 = arith.negf %433 : vector<2x96xf32>
    %435 = math.exp %434 : vector<2x96xf32>
    %cst_143 = arith.constant 1.000000e+00 : f32
    %436 = vector.broadcast %cst_143 : f32 to vector<2x96xf32>
    %437 = arith.addf %436, %435 : vector<2x96xf32>
    %438 = arith.divf %436, %437 : vector<2x96xf32>
    %439 = vector.extract_strided_slice %438 {offsets = [0, 0], sizes = [2, 32], strides = [1, 1]} : vector<2x96xf32> to vector<2x32xf32>
    %440 = vector.extract_strided_slice %438 {offsets = [0, 32], sizes = [2, 32], strides = [1, 1]} : vector<2x96xf32> to vector<2x32xf32>
    %441 = vector.extract_strided_slice %438 {offsets = [0, 64], sizes = [2, 32], strides = [1, 1]} : vector<2x96xf32> to vector<2x32xf32>
    %442 = vector.extract_strided_slice %432 {offsets = [0, 96], sizes = [2, 32], strides = [1, 1]} : vector<2x128xf32> to vector<2x32xf32>
    %443 = math.tanh %442 : vector<2x32xf32>
    %444 = arith.mulf %440, %390 : vector<2x32xf32>
    %445 = arith.mulf %439, %443 : vector<2x32xf32>
    %446 = arith.addf %444, %445 : vector<2x32xf32>
    %447 = math.tanh %446 : vector<2x32xf32>
    %448 = arith.mulf %441, %447 : vector<2x32xf32>
    %c2_144 = arith.constant 2 : index
    %c0_145 = arith.constant 0 : index
    %c0_146 = arith.constant 0 : index
    %449 = vector.load %arg7[%c2_144, %c0_145, %c0_146] : memref<8x2x1xf32, #tpu.memory_space<vmem>>, vector<1x2x1xf32>
    %450 = vector.shape_cast %449 : vector<1x2x1xf32> to vector<2x1xf32>
    %451 = vector.broadcast %450 : vector<2x1xf32> to vector<2x32xf32>
    %452 = arith.mulf %448, %451 : vector<2x32xf32>
    %453 = arith.truncf %452 : vector<2x32xf32> to vector<2x32xbf16>
    %c2_147 = arith.constant 2 : index
    %c0_148 = arith.constant 0 : index
    %c32_149 = arith.constant 32 : index
    %454 = vector.load %arg8[%c2_147, %c0_148, %c32_149] : memref<8x2x64xbf16, #tpu.memory_space<vmem>>, vector<1x2x32xbf16>
    %455 = vector.shape_cast %454 : vector<1x2x32xbf16> to vector<2x32xbf16>
    %456 = vector.shape_cast %453 : vector<2x32xbf16> to vector<1x2x32xbf16>
    tpu.vector_store %arg8[%c2_147, %c0_148, %c32_149], %456 {strides = array<i32>} : memref<8x2x64xbf16, #tpu.memory_space<vmem>>, vector<1x2x32xbf16>,
    %457 = arith.subf %448, %386 : vector<2x32xf32>
    %458 = vector.broadcast %450 : vector<2x1xf32> to vector<2x32xf32>
    %459 = arith.mulf %458, %457 : vector<2x32xf32>
    %460 = arith.addf %386, %459 : vector<2x32xf32>
    %461 = arith.subf %446, %390 : vector<2x32xf32>
    %462 = vector.broadcast %450 : vector<2x1xf32> to vector<2x32xf32>
    %463 = arith.mulf %462, %461 : vector<2x32xf32>
    %464 = arith.addf %390, %463 : vector<2x32xf32>
    %c6_150 = arith.constant 6 : index
    %c0_151 = arith.constant 0 : index
    %c0_152 = arith.constant 0 : index
    %465 = vector.load %arg9[%c6_150, %c0_151, %c0_152] : memref<8x2x256xf32, #tpu.memory_space<vmem>>, vector<1x2x128xf32>
    %466 = vector.shape_cast %465 : vector<1x2x128xf32> to vector<2x128xf32>
    %467 = arith.truncf %423 : vector<2x32xf32> to vector<2x32xbf16>
    %cst_153 = arith.constant dense<0.000000e+00> : vector<2x128xf32>
    %468 = tpu.matmul %467, %10, %cst_153 {dimension_numbers = #tpu.dot_dimension_numbers<[1], [0], [0], [1], [0, 0, 1, 1], [], []>} : vector<2x32xbf16>, vector<32x128xbf16>, vector<2x128xf32> -> vector<2x128xf32>
    %469 = arith.addf %466, %468 : vector<2x128xf32>
    %470 = vector.extract_strided_slice %469 {offsets = [0, 0], sizes = [2, 96], strides = [1, 1]} : vector<2x128xf32> to vector<2x96xf32>
    %471 = arith.negf %470 : vector<2x96xf32>
    %472 = math.exp %471 : vector<2x96xf32>
    %cst_154 = arith.constant 1.000000e+00 : f32
    %473 = vector.broadcast %cst_154 : f32 to vector<2x96xf32>
    %474 = arith.addf %473, %472 : vector<2x96xf32>
    %475 = arith.divf %473, %474 : vector<2x96xf32>
    %476 = vector.extract_strided_slice %475 {offsets = [0, 0], sizes = [2, 32], strides = [1, 1]} : vector<2x96xf32> to vector<2x32xf32>
    %477 = vector.extract_strided_slice %475 {offsets = [0, 32], sizes = [2, 32], strides = [1, 1]} : vector<2x96xf32> to vector<2x32xf32>
    %478 = vector.extract_strided_slice %475 {offsets = [0, 64], sizes = [2, 32], strides = [1, 1]} : vector<2x96xf32> to vector<2x32xf32>
    %479 = vector.extract_strided_slice %469 {offsets = [0, 96], sizes = [2, 32], strides = [1, 1]} : vector<2x128xf32> to vector<2x32xf32>
    %480 = math.tanh %479 : vector<2x32xf32>
    %481 = arith.mulf %477, %427 : vector<2x32xf32>
    %482 = arith.mulf %476, %480 : vector<2x32xf32>
    %483 = arith.addf %481, %482 : vector<2x32xf32>
    %484 = math.tanh %483 : vector<2x32xf32>
    %485 = arith.mulf %478, %484 : vector<2x32xf32>
    %c6_155 = arith.constant 6 : index
    %c0_156 = arith.constant 0 : index
    %c0_157 = arith.constant 0 : index
    %486 = vector.load %arg7[%c6_155, %c0_156, %c0_157] : memref<8x2x1xf32, #tpu.memory_space<vmem>>, vector<1x2x1xf32>
    %487 = vector.shape_cast %486 : vector<1x2x1xf32> to vector<2x1xf32>
    %488 = vector.broadcast %487 : vector<2x1xf32> to vector<2x32xf32>
    %489 = arith.mulf %485, %488 : vector<2x32xf32>
    %490 = arith.truncf %489 : vector<2x32xf32> to vector<2x32xbf16>
    %c6_158 = arith.constant 6 : index
    %c0_159 = arith.constant 0 : index
    %c0_160 = arith.constant 0 : index
    %491 = vector.load %arg8[%c6_158, %c0_159, %c0_160] : memref<8x2x64xbf16, #tpu.memory_space<vmem>>, vector<1x2x32xbf16>
    %492 = vector.shape_cast %491 : vector<1x2x32xbf16> to vector<2x32xbf16>
    %493 = vector.shape_cast %490 : vector<2x32xbf16> to vector<1x2x32xbf16>
    tpu.vector_store %arg8[%c6_158, %c0_159, %c0_160], %493 {strides = array<i32>} : memref<8x2x64xbf16, #tpu.memory_space<vmem>>, vector<1x2x32xbf16>,
    %494 = arith.subf %485, %423 : vector<2x32xf32>
    %495 = vector.broadcast %487 : vector<2x1xf32> to vector<2x32xf32>
    %496 = arith.mulf %495, %494 : vector<2x32xf32>
    %497 = arith.addf %423, %496 : vector<2x32xf32>
    %498 = arith.subf %483, %427 : vector<2x32xf32>
    %499 = vector.broadcast %487 : vector<2x1xf32> to vector<2x32xf32>
    %500 = arith.mulf %499, %498 : vector<2x32xf32>
    %501 = arith.addf %427, %500 : vector<2x32xf32>
    %c1_161 = arith.constant 1 : index
    %c0_162 = arith.constant 0 : index
    %c128_163 = arith.constant 128 : index
    %502 = vector.load %arg9[%c1_161, %c0_162, %c128_163] : memref<8x2x256xf32, #tpu.memory_space<vmem>>, vector<1x2x128xf32>
    %503 = vector.shape_cast %502 : vector<1x2x128xf32> to vector<2x128xf32>
    %504 = arith.truncf %460 : vector<2x32xf32> to vector<2x32xbf16>
    %cst_164 = arith.constant dense<0.000000e+00> : vector<2x128xf32>
    %505 = tpu.matmul %504, %12, %cst_164 {dimension_numbers = #tpu.dot_dimension_numbers<[1], [0], [0], [1], [0, 0, 1, 1], [], []>} : vector<2x32xbf16>, vector<32x128xbf16>, vector<2x128xf32> -> vector<2x128xf32>
    %506 = arith.addf %503, %505 : vector<2x128xf32>
    %507 = vector.extract_strided_slice %506 {offsets = [0, 0], sizes = [2, 96], strides = [1, 1]} : vector<2x128xf32> to vector<2x96xf32>
    %508 = arith.negf %507 : vector<2x96xf32>
    %509 = math.exp %508 : vector<2x96xf32>
    %cst_165 = arith.constant 1.000000e+00 : f32
    %510 = vector.broadcast %cst_165 : f32 to vector<2x96xf32>
    %511 = arith.addf %510, %509 : vector<2x96xf32>
    %512 = arith.divf %510, %511 : vector<2x96xf32>
    %513 = vector.extract_strided_slice %512 {offsets = [0, 0], sizes = [2, 32], strides = [1, 1]} : vector<2x96xf32> to vector<2x32xf32>
    %514 = vector.extract_strided_slice %512 {offsets = [0, 32], sizes = [2, 32], strides = [1, 1]} : vector<2x96xf32> to vector<2x32xf32>
    %515 = vector.extract_strided_slice %512 {offsets = [0, 64], sizes = [2, 32], strides = [1, 1]} : vector<2x96xf32> to vector<2x32xf32>
    %516 = vector.extract_strided_slice %506 {offsets = [0, 96], sizes = [2, 32], strides = [1, 1]} : vector<2x128xf32> to vector<2x32xf32>
    %517 = math.tanh %516 : vector<2x32xf32>
    %518 = arith.mulf %514, %464 : vector<2x32xf32>
    %519 = arith.mulf %513, %517 : vector<2x32xf32>
    %520 = arith.addf %518, %519 : vector<2x32xf32>
    %521 = math.tanh %520 : vector<2x32xf32>
    %522 = arith.mulf %515, %521 : vector<2x32xf32>
    %c1_166 = arith.constant 1 : index
    %c0_167 = arith.constant 0 : index
    %c0_168 = arith.constant 0 : index
    %523 = vector.load %arg7[%c1_166, %c0_167, %c0_168] : memref<8x2x1xf32, #tpu.memory_space<vmem>>, vector<1x2x1xf32>
    %524 = vector.shape_cast %523 : vector<1x2x1xf32> to vector<2x1xf32>
    %525 = vector.broadcast %524 : vector<2x1xf32> to vector<2x32xf32>
    %526 = arith.mulf %522, %525 : vector<2x32xf32>
    %527 = arith.truncf %526 : vector<2x32xf32> to vector<2x32xbf16>
    %c1_169 = arith.constant 1 : index
    %c0_170 = arith.constant 0 : index
    %c32_171 = arith.constant 32 : index
    %528 = vector.load %arg8[%c1_169, %c0_170, %c32_171] : memref<8x2x64xbf16, #tpu.memory_space<vmem>>, vector<1x2x32xbf16>
    %529 = vector.shape_cast %528 : vector<1x2x32xbf16> to vector<2x32xbf16>
    %530 = vector.shape_cast %527 : vector<2x32xbf16> to vector<1x2x32xbf16>
    tpu.vector_store %arg8[%c1_169, %c0_170, %c32_171], %530 {strides = array<i32>} : memref<8x2x64xbf16, #tpu.memory_space<vmem>>, vector<1x2x32xbf16>,
    %531 = arith.subf %522, %460 : vector<2x32xf32>
    %532 = vector.broadcast %524 : vector<2x1xf32> to vector<2x32xf32>
    %533 = arith.mulf %532, %531 : vector<2x32xf32>
    %534 = arith.addf %460, %533 : vector<2x32xf32>
    %535 = arith.subf %520, %464 : vector<2x32xf32>
    %536 = vector.broadcast %524 : vector<2x1xf32> to vector<2x32xf32>
    %537 = arith.mulf %536, %535 : vector<2x32xf32>
    %538 = arith.addf %464, %537 : vector<2x32xf32>
    %c7_172 = arith.constant 7 : index
    %c0_173 = arith.constant 0 : index
    %c0_174 = arith.constant 0 : index
    %539 = vector.load %arg9[%c7_172, %c0_173, %c0_174] : memref<8x2x256xf32, #tpu.memory_space<vmem>>, vector<1x2x128xf32>
    %540 = vector.shape_cast %539 : vector<1x2x128xf32> to vector<2x128xf32>
    %541 = arith.truncf %497 : vector<2x32xf32> to vector<2x32xbf16>
    %cst_175 = arith.constant dense<0.000000e+00> : vector<2x128xf32>
    %542 = tpu.matmul %541, %10, %cst_175 {dimension_numbers = #tpu.dot_dimension_numbers<[1], [0], [0], [1], [0, 0, 1, 1], [], []>} : vector<2x32xbf16>, vector<32x128xbf16>, vector<2x128xf32> -> vector<2x128xf32>
    %543 = arith.addf %540, %542 : vector<2x128xf32>
    %544 = vector.extract_strided_slice %543 {offsets = [0, 0], sizes = [2, 96], strides = [1, 1]} : vector<2x128xf32> to vector<2x96xf32>
    %545 = arith.negf %544 : vector<2x96xf32>
    %546 = math.exp %545 : vector<2x96xf32>
    %cst_176 = arith.constant 1.000000e+00 : f32
    %547 = vector.broadcast %cst_176 : f32 to vector<2x96xf32>
    %548 = arith.addf %547, %546 : vector<2x96xf32>
    %549 = arith.divf %547, %548 : vector<2x96xf32>
    %550 = vector.extract_strided_slice %549 {offsets = [0, 0], sizes = [2, 32], strides = [1, 1]} : vector<2x96xf32> to vector<2x32xf32>
    %551 = vector.extract_strided_slice %549 {offsets = [0, 32], sizes = [2, 32], strides = [1, 1]} : vector<2x96xf32> to vector<2x32xf32>
    %552 = vector.extract_strided_slice %549 {offsets = [0, 64], sizes = [2, 32], strides = [1, 1]} : vector<2x96xf32> to vector<2x32xf32>
    %553 = vector.extract_strided_slice %543 {offsets = [0, 96], sizes = [2, 32], strides = [1, 1]} : vector<2x128xf32> to vector<2x32xf32>
    %554 = math.tanh %553 : vector<2x32xf32>
    %555 = arith.mulf %551, %501 : vector<2x32xf32>
    %556 = arith.mulf %550, %554 : vector<2x32xf32>
    %557 = arith.addf %555, %556 : vector<2x32xf32>
    %558 = math.tanh %557 : vector<2x32xf32>
    %559 = arith.mulf %552, %558 : vector<2x32xf32>
    %c7_177 = arith.constant 7 : index
    %c0_178 = arith.constant 0 : index
    %c0_179 = arith.constant 0 : index
    %560 = vector.load %arg7[%c7_177, %c0_178, %c0_179] : memref<8x2x1xf32, #tpu.memory_space<vmem>>, vector<1x2x1xf32>
    %561 = vector.shape_cast %560 : vector<1x2x1xf32> to vector<2x1xf32>
    %562 = vector.broadcast %561 : vector<2x1xf32> to vector<2x32xf32>
    %563 = arith.mulf %559, %562 : vector<2x32xf32>
    %564 = arith.truncf %563 : vector<2x32xf32> to vector<2x32xbf16>
    %c7_180 = arith.constant 7 : index
    %c0_181 = arith.constant 0 : index
    %c0_182 = arith.constant 0 : index
    %565 = vector.load %arg8[%c7_180, %c0_181, %c0_182] : memref<8x2x64xbf16, #tpu.memory_space<vmem>>, vector<1x2x32xbf16>
    %566 = vector.shape_cast %565 : vector<1x2x32xbf16> to vector<2x32xbf16>
    %567 = vector.shape_cast %564 : vector<2x32xbf16> to vector<1x2x32xbf16>
    tpu.vector_store %arg8[%c7_180, %c0_181, %c0_182], %567 {strides = array<i32>} : memref<8x2x64xbf16, #tpu.memory_space<vmem>>, vector<1x2x32xbf16>,
    %c0_183 = arith.constant 0 : index
    %c0_184 = arith.constant 0 : index
    %c128_185 = arith.constant 128 : index
    %568 = vector.load %arg9[%c0_183, %c0_184, %c128_185] : memref<8x2x256xf32, #tpu.memory_space<vmem>>, vector<1x2x128xf32>
    %569 = vector.shape_cast %568 : vector<1x2x128xf32> to vector<2x128xf32>
    %570 = arith.truncf %534 : vector<2x32xf32> to vector<2x32xbf16>
    %cst_186 = arith.constant dense<0.000000e+00> : vector<2x128xf32>
    %571 = tpu.matmul %570, %12, %cst_186 {dimension_numbers = #tpu.dot_dimension_numbers<[1], [0], [0], [1], [0, 0, 1, 1], [], []>} : vector<2x32xbf16>, vector<32x128xbf16>, vector<2x128xf32> -> vector<2x128xf32>
    %572 = arith.addf %569, %571 : vector<2x128xf32>
    %573 = vector.extract_strided_slice %572 {offsets = [0, 0], sizes = [2, 96], strides = [1, 1]} : vector<2x128xf32> to vector<2x96xf32>
    %574 = arith.negf %573 : vector<2x96xf32>
    %575 = math.exp %574 : vector<2x96xf32>
    %cst_187 = arith.constant 1.000000e+00 : f32
    %576 = vector.broadcast %cst_187 : f32 to vector<2x96xf32>
    %577 = arith.addf %576, %575 : vector<2x96xf32>
    %578 = arith.divf %576, %577 : vector<2x96xf32>
    %579 = vector.extract_strided_slice %578 {offsets = [0, 0], sizes = [2, 32], strides = [1, 1]} : vector<2x96xf32> to vector<2x32xf32>
    %580 = vector.extract_strided_slice %578 {offsets = [0, 32], sizes = [2, 32], strides = [1, 1]} : vector<2x96xf32> to vector<2x32xf32>
    %581 = vector.extract_strided_slice %578 {offsets = [0, 64], sizes = [2, 32], strides = [1, 1]} : vector<2x96xf32> to vector<2x32xf32>
    %582 = vector.extract_strided_slice %572 {offsets = [0, 96], sizes = [2, 32], strides = [1, 1]} : vector<2x128xf32> to vector<2x32xf32>
    %583 = math.tanh %582 : vector<2x32xf32>
    %584 = arith.mulf %580, %538 : vector<2x32xf32>
    %585 = arith.mulf %579, %583 : vector<2x32xf32>
    %586 = arith.addf %584, %585 : vector<2x32xf32>
    %587 = math.tanh %586 : vector<2x32xf32>
    %588 = arith.mulf %581, %587 : vector<2x32xf32>
    %c0_188 = arith.constant 0 : index
    %c0_189 = arith.constant 0 : index
    %c0_190 = arith.constant 0 : index
    %589 = vector.load %arg7[%c0_188, %c0_189, %c0_190] : memref<8x2x1xf32, #tpu.memory_space<vmem>>, vector<1x2x1xf32>
    %590 = vector.shape_cast %589 : vector<1x2x1xf32> to vector<2x1xf32>
    %591 = vector.broadcast %590 : vector<2x1xf32> to vector<2x32xf32>
    %592 = arith.mulf %588, %591 : vector<2x32xf32>
    %593 = arith.truncf %592 : vector<2x32xf32> to vector<2x32xbf16>
    %c0_191 = arith.constant 0 : index
    %c0_192 = arith.constant 0 : index
    %c32_193 = arith.constant 32 : index
    %594 = vector.load %arg8[%c0_191, %c0_192, %c32_193] : memref<8x2x64xbf16, #tpu.memory_space<vmem>>, vector<1x2x32xbf16>
    %595 = vector.shape_cast %594 : vector<1x2x32xbf16> to vector<2x32xbf16>
    %596 = vector.shape_cast %593 : vector<2x32xbf16> to vector<1x2x32xbf16>
    tpu.vector_store %arg8[%c0_191, %c0_192, %c32_193], %596 {strides = array<i32>} : memref<8x2x64xbf16, #tpu.memory_space<vmem>>, vector<1x2x32xbf16>,
    return
  }
  func.func @transform_0(%arg0: i32) -> (i32, i32, i32) {
    %c0_i32 = arith.constant 0 : i32
    %c0_i32_0 = arith.constant 0 : i32
    %c0_i32_1 = arith.constant 0 : i32
    %c0_i32_2 = arith.constant 0 : i32
    return %c0_i32, %c0_i32_0, %c0_i32_1 : i32, i32, i32
  }
  func.func @transform_1(%arg0: i32) -> (i32, i32) {
    %c0_i32 = arith.constant 0 : i32
    %c0_i32_0 = arith.constant 0 : i32
    %c0_i32_1 = arith.constant 0 : i32
    return %c0_i32, %c0_i32_0 : i32, i32
  }
  func.func @transform_2(%arg0: i32) -> (i32, i32, i32) {
    %c0_i32 = arith.constant 0 : i32
    %c0_i32_0 = arith.constant 0 : i32
    %c0_i32_1 = arith.constant 0 : i32
    %c0_i32_2 = arith.constant 0 : i32
    return %c0_i32, %c0_i32_0, %c0_i32_1 : i32, i32, i32
  }
  func.func @transform_3(%arg0: i32) -> (i32, i32) {
    %c0_i32 = arith.constant 0 : i32
    %c0_i32_0 = arith.constant 0 : i32
    %c0_i32_1 = arith.constant 0 : i32
    return %c0_i32, %c0_i32_0 : i32, i32
  }
  func.func @transform_4(%arg0: i32) -> (i32, i32, i32) {
    %c0_i32 = arith.constant 0 : i32
    %c0_i32_0 = arith.constant 0 : i32
    %c0_i32_1 = arith.constant 0 : i32
    %c0_i32_2 = arith.constant 0 : i32
    return %c0_i32, %c0_i32_0, %c0_i32_1 : i32, i32, i32
  }
  func.func @transform_5(%arg0: i32) -> (i32, i32, i32) {
    %c0_i32 = arith.constant 0 : i32
    %c0_i32_0 = arith.constant 0 : i32
    %c0_i32_1 = arith.constant 0 : i32
    %c0_i32_2 = arith.constant 0 : i32
    return %c0_i32, %c0_i32_0, %c0_i32_1 : i32, i32, i32
  }
  func.func @transform_6(%arg0: i32) -> (i32, i32, i32) {
    %c0_i32 = arith.constant 0 : i32
    %c0_i32_0 = arith.constant 0 : i32
    %c0_i32_1 = arith.constant 0 : i32
    %c0_i32_2 = arith.constant 0 : i32
    return %c0_i32, %c0_i32_0, %c0_i32_1 : i32, i32, i32
  }
  func.func @transform_7(%arg0: i32) -> (i32, i32, i32) {
    %c0_i32 = arith.constant 0 : i32
    %c0_i32_0 = arith.constant 0 : i32
    %c0_i32_1 = arith.constant 0 : i32
    %c0_i32_2 = arith.constant 0 : i32
    return %c0_i32, %c0_i32_0, %c0_i32_1 : i32, i32, i32
  }
}

</mosaic_0001>

<bundles_post_ra>
// kernel: lstm_lm_forward_pallas.5
= control target key start
LH: loop header
LB: loop body
LE: loop exit
PB: predicated region body
PF: predicated region fallthrough
CT: control target
= control target key end

     0   :  { %v143_v0 = vmov 0.0   ;;  %vm144_vm0 = vmmov 0   ;;  %vm61_vm1 = vcmask 523264   ;;  %s189_s1 = inlined_call_operand.vmem [shape: bf16[64,128], index: 1, kind: input, shape index: {}]   ;;  %s190_s0 = inlined_call_operand.vmem [shape: bf16[16,64], index: 0, kind: input, shape index: {}]   ;;  %s191_s2 = inlined_call_operand.vmem [shape: f32[1,128], index: 2, kind: input, shape index: {}]   ;;  %s192_s3 = inlined_call_operand.vmem [shape: f32[16,128], index: 3, kind: output, shape index: {}]  }
   0x1   :  { %124 = vmatprep.subr.bf16.mxu0 %v143_v0  ;;  %v138_v1 = vld [vmem:[%s189_s1] sm:$0xff]   ;;  %132 = vmatprep.mubr.msk.bf16.mxu0 %vm144_vm0, %v143_v0  ;;  %v139_v2 = vld [vmem:[%s189_s1 + $0x8] sm:$0xff]   ;;  %v140_v3 = vld [vmem:[%s189_s1 + $0x10] sm:$0xff]  }
   0x2   :  { %125 = vmatpush3.bf16.msra.mxu0 %v138_v1  ;;  %v141_v4 = vld [vmem:[%s189_s1 + $0x18] sm:$0xff]   ;;  %v142_v5 = vld [vmem:[%s190_s0] sm:$0xff]  }
   0x3   :  { %126 = vmatprep.subr.bf16.mxu0 %v143_v0  ;;  %v112_v6 = vld [vmem:[%s191_s2] ss:$0 sm:$0xff] }
   0x6   :  { %127 = vmatpush3.bf16.msra.mxu0 %v139_v2 }
   0x7   :  { %128 = vmatprep.subr.bf16.mxu0 %v143_v0 }
   0xa   :  { %129 = vmatpush3.bf16.msra.mxu0 %v140_v3 }
   0xb   :  { %130 = vmatprep.subr.bf16.mxu0 %v143_v0 }
   0xe   :  { %131 = vmatpush3.bf16.msra.mxu0 %v141_v4 }
  0x11   :  { %133 = vmatmul.mubr.msk.bf16.vlgmr.msra.gmra.mrb[0].mxu0 %vm61_vm1, %v142_v5 }
  0xe4   :  { %v99_v7 = vpop.f32.mrb[0].mxu0 }
  0xe5   :  { %v100_v8 = vadd.f32 %v112_v6, %v99_v7  ;;  %v134_v9 = vpop.f32.mrb[1].mxu0 }
  0xe6   :  { %v102_v10 = vpop.f32.mrb[2].mxu0 }
  0xe7   :  { %106 = vst [vmem:[%s192_s3] sm:$0xff] %v100_v8  ;;  %v103_v11 = vadd.f32 %v112_v6, %v102_v10  ;;  %v135_v12 = vpop.f32.mrb[3].mxu0 }
  0xe9   :  { %107 = vst [vmem:[%s192_s3 + $0x8] sm:$0xff] %v103_v11 }

// kernel: lstm_lm_forward_pallas.3
= control target key start
LH: loop header
LB: loop body
LE: loop exit
PB: predicated region body
PF: predicated region fallthrough
CT: control target
= control target key end

     0   :  { %v41_v0 = vlaneseq  ;;  %v2978_v2 = vmov 0   ;;  %v2979_v3 = vmov 1966171168   ;;  %v2980_v7 = vmov 1983009808   ;;  %s2983_s12 = smov 32   ;;  %s3850_s1 = inlined_call_operand.vmem [shape: bf16[32,256], index: 1, kind: input, shape index: {}]   ;;  %s3851_s0 = inlined_call_operand.vmem [shape: bf16[8,2,32], index: 0, kind: input, shape index: {}]   ;;  %s3852_s2 = inlined_call_operand.vmem [shape: bf16[2,32,128], index: 2, kind: input, shape index: {}]   ;;  %s3853_s4 = inlined_call_operand.vmem [shape: f32[2,2,32], index: 4, kind: input, shape index: {}]   ;;  %s3854_s5 = inlined_call_operand.vmem [shape: f32[2,2,32], index: 5, kind: input, shape index: {}]   ;;  %s3855_s3 = inlined_call_operand.vmem [shape: f32[1,256], index: 3, kind: input, shape index: {}]   ;;  %s3856_s6 = inlined_call_operand.vmem [shape: f32[8,2,1], index: 6, kind: input, shape index: {}]   ;;  %s3857_s7 = inlined_call_operand.vmem [shape: bf16[8,2,64], index: 7, kind: output, shape index: {}]  }
   0x1   :  { %v2836_v1 = vld [vmem:[%s3850_s1 + $0x4] ss:$8 sps:$4 sm:$0xff]   ;;  %164 = vmatprep.mubr.bf16.mxu0 %v2978_v2  ;;  %v64_v4 = vunpack.c.l.s4 %v2979_v3  ;;  %2834 = vset.pattern.permute.xlu0 %v2978_v2  ;;  %v2838_v5 = vld [vmem:[%s3850_s1] ss:$8 sps:$4 sm:$0xff]   ;;  %v182_v8 = vunpack.c.l.s4 %v2980_v7  ;;  %v2839_v9 = vld [vmem:[%s3850_s1 + $0x14] ss:$8 sps:$4 sm:$0xff]  }
   0x2   :  { %v3032_v6 = vshrl.u32 %v41_v0, 7  ;;  %2835 = vset.pattern.permute.xlu1 %v2978_v2  ;;  %132 = vmatprep.subr.bf16.mxu0 %v2836_v1  ;;  %v2841_v10 = vld [vmem:[%s3850_s1 + $0x10] ss:$8 sps:$4 sm:$0xff]   ;;  %v27_v11 = vld [vmem:[%s3851_s0] sm:$0x1]  ;;  %v2981_v13 = vmov 0.0  }
   0x3   :  { %v65_v12 = vunpack.c.0.s8 %v64_v4  ;;  %2698 = vmatprep.subr.bf16.mxu1 %v2981_v13  ;;  %133 = vmatpush1.bf16.msra.mxu0 %v2838_v5  ;;  %v28_v14 = vld [vmem:[%s3851_s0 + $0x1] sm:$0x1]  ;;  %v29_v15 = vld [vmem:[%s3851_s0 + $0x2] sm:$0x1]  ;;  %v30_v16 = vld [vmem:[%s3851_s0 + $0x3] sm:$0x1]  ;;  %v183_v17 = vunpack.c.0.s8 %v182_v8 }
   0x4   :  { %134 = vmatprep.subr.bf16.mxu0 %v2839_v9  ;;  %v31_v18 = vld [vmem:[%s3851_s0 + $0x4] sm:$0x1]  ;;  %v32_v19 = vld [vmem:[%s3851_s0 + $0x5] sm:$0x1]  ;;  %v33_v20 = vld [vmem:[%s3851_s0 + $0x6] sm:$0x1]  ;;  %v59_v21 = vcombine.low %v27_v11, %v28_v14  ;;  %v60_v22 = vcombine.low %v29_v15, %v30_v16 }
   0x5   :  { %v3063_v23 = vsub.s32 %v65_v12, %v3032_v6  ;;  %v34_v24 = vld [vmem:[%s3851_s0 + $0x7] sm:$0x1]  ;;  %v61_v25 = vcombine.low %v31_v18, %v32_v19  ;;  %v3077_v31 = vsub.s32 %v183_v17, %v3032_v6  ;;  %vm2982_vm0 = vmmov 0   ;;  %v3087_v34 = vld [vmem:[%s3852_s2 + $0x8] sm:$0xff]   ;;  %v3092_v35 = vld [vmem:[%s3853_s4] sm:$0x3] }
   0x6   :  { %v62_v26 = vcombine.low %v33_v20, %v34_v24  ;;  %v3073_v29 = vld [vmem:[%s3852_s2] sm:$0xff]   ;;  %2702 = vmatprep.mubr.msk.bf16.mxu1 %vm2982_vm0, %v2981_v13  ;;  %v247_v39 = vpack.c.bf16 %v3092_v35, %v3092_v35  ;;  %vm128_vm1 = vcmask 261120   ;;  %v3115_v43 = vld [vmem:[%s3852_s2 + $0x10] sm:$0xff]   ;;  %v3133_v47 = vld [vmem:[%s3852_s2 + $0x18] sm:$0xff]   ;;  %v43_v49 = vsub.s32 0, %v3032_v6  ;;  %s2985_s20 = smov 96  }
   0x7   :  { %v69_v27 = vrot.slane %v59_v21, %v3063_v23  ;;  %v76_v28 = vrot.slane %v60_v22, %v3063_v23  ;;  %135 = vmatpush1.bf16.msra.mxu0 %v2841_v10  ;;  %v83_v30 = vrot.slane %v61_v25, %v3063_v23  ;;  %2699 = vmatpush3.bf16.msra.mxu1 %v3073_v29  ;;  %v3099_v38 = vld [vmem:[%s3854_s5] sm:$0x3]  ;;  %v3106_v40 = vld [vmem:[%s3854_s5 + $0x2] sm:$0x3]  ;;  %v47_v51 = vsub.s32 1, %v3032_v6 }
   0x8   :  { %v90_v32 = vrot.slane %v62_v26, %v3063_v23  ;;  %2706 = vmatprep.subr.bf16.mxu0 %v2981_v13  ;;  %2700 = vmatprep.subr.bf16.mxu1 %v2981_v13  ;;  %v318_v41 = vrot.slane %v3099_v38, %v3077_v31  ;;  %v479_v45 = vrot.slane %v3106_v40, %v3077_v31  ;;  %v3128_v46 = vld [vmem:[%s3853_s4 + $0x2] sm:$0x3]  ;;  %v39_v50 = vld [vmem:[%s3855_s3] sm:$0x3]  ;;  %s2984_s3 = smov 64   ;;  %vm365_vm2 = vcmask 253952  }
   0x9   :  { %v91_v33 = vcombine.low %v69_v27, %v76_v28  ;;  %v408_v48 = vpack.c.bf16 %v3128_v46, %v3128_v46  ;;  %v44_v52 = vrot.slane %v39_v50, %v43_v49  ;;  %v48_v53 = vrot.slane %v39_v50, %v47_v51 }
   0xa   :  { %v92_v36 = vcombine.low %v83_v30, %v90_v32  ;;  %319 = vrot.lane.b32.xlu1 %v318_v41, %s2983_s12  ;;  %vm528_vm3 = vcmask 516352  }
   0xb   :  { %v99_v37 = vrot.slane %v91_v33, %v3063_v23  ;;  %2701 = vmatpush3.bf16.msra.mxu1 %v3087_v34 }
   0xc   :  { %v106_v42 = vrot.slane %v92_v36, %v3063_v23  ;;  %2714 = vmatprep.subr.bf16.mxu1 %v2981_v13 }
   0xe   :  { %v107_v44 = vcombine.low %v99_v37, %v106_v42  ;;  %2703 = vmatmul.mubr.msk.bf16.vlgmr.msra.gmra.mrb[0].mxu1 %vm128_vm1, %v247_v39  ;;  %480 = vrot.lane.b32.xlu1 %v479_v45, %s2983_s12 }
   0xf   :  { %2715 = vmatpush3.bf16.msra.mxu1 %v3073_v29  ;;  %2718 = vmatprep.mubr.msk.bf16.mxu1 %vm2982_vm0, %v2981_v13 }
  0x10   :  { %2575 = vmatmul.mubr.msk.bf16.vlgmr.msra.gmra.mrb[0].mxu0 %vm128_vm1, %v107_v44  ;;  %2716 = vmatprep.subr.bf16.mxu1 %v2981_v13 }
  0x11   :  { %2707 = vmatpush3.bf16.msra.mxu0 %v3115_v43  ;;  %2710 = vmatprep.mubr.msk.bf16.mxu0 %vm2982_vm0, %v2981_v13 }
  0x12   :  { %2708 = vmatprep.subr.bf16.mxu0 %v2981_v13 }
  0x13   :  { %2717 = vmatpush3.bf16.msra.mxu1 %v3087_v34 }
  0x14   :  { %2730 = vmatprep.subr.bf16.mxu1 %v2981_v13 }
  0x15   :  { %2709 = vmatpush3.bf16.msra.mxu0 %v3133_v47 }
  0x16   :  { %2722 = vmatprep.subr.bf16.mxu0 %v2981_v13 }
  0x18   :  { %2711 = vmatmul.mubr.msk.bf16.vlgmr.msra.gmra.mrb[4].mxu0 %vm128_vm1, %v408_v48 }
  0x19   :  { %2723 = vmatpush3.bf16.msra.mxu0 %v3115_v43  ;;  %2726 = vmatprep.mubr.msk.bf16.mxu0 %vm2982_vm0, %v2981_v13 }
  0x1a   :  { %2724 = vmatprep.subr.bf16.mxu0 %v2981_v13 }
  0x1d   :  { %2725 = vmatpush3.bf16.msra.mxu0 %v3133_v47 }
  0x1e   :  { %2738 = vmatprep.subr.bf16.mxu0 %v2981_v13 }
  0x7c   :  { %v320_v45 = vpop.permute.xlu1 %319 }
  0x80   :  { %v481_v51 = vpop.permute.xlu1 %480 }
  0xe1   :  { %v297_v54 = vpop.f32.mrb[0].mxu1 }
  0xe2   :  { %v2704_v56 = vpop.f32.mrb[1].mxu1 }
  0xe3   :  { %v166_v55 = vpop.f32.mrb[0].mxu0  ;;  %v300_v59 = vpop.f32.mrb[2].mxu1  ;;  %v374_v56 = vrot.slane %v3092_v35, %v3077_v31 }
  0xe4   :  { %v167_v57 = vadd.f32 %v166_v55, %v44_v52  ;;  %v168_v58 = vpop.f32.mrb[1].mxu0  ;;  %v2705_v62 = vpop.f32.mrb[3].mxu1  ;;  %v537_v59 = vrot.slane %v3128_v46, %v3077_v31 }
  0xe5   :  { %v169_v60 = vadd.f32 %v168_v58, %v48_v53  ;;  %v170_v61 = vpop.f32.mrb[2].mxu0  ;;  %v339_v58 = vld [vmem:[%s3856_s6] sm:$0x3] }
  0xe6   :  { %v171_v63 = vadd.f32 %v170_v61, %v44_v52  ;;  %v172_v0 = vpop.f32.mrb[3].mxu0 }
  0xe7   :  { %v179_v1 = vcombine.low %v167_v57, %v169_v60  ;;  %v180_v2 = vcombine.high %v167_v57, %v169_v60  ;;  %v173_v3 = vadd.f32 %v172_v0, %v48_v53  ;;  %v2594_v60 = vld [vmem:[%s3856_s6 + $0xe] sm:$0x3] }
  0xe9   :  { %v187_v4 = vrot.slane %v179_v1, %v3077_v31  ;;  %v194_v5 = vrot.slane %v180_v2, %v3077_v31  ;;  %2576 = vst.sshfl [vmem:[#allocation2] sm:$0x33 pattern:$0x76325410] %v179_v1  ;;  %v197_v6 = vcombine.low %v171_v63, %v173_v3  ;;  %v198_v7 = vcombine.high %v171_v63, %v173_v3 }
  0xea   :  { %2577 = vst.sshfl [vmem:[#allocation2 + $0x8] sm:$0x33 pattern:$0x76325410] %v180_v2 }
  0xeb   :  { %v195_v8 = vcombine.high %v187_v4, %v187_v4  ;;  %v196_v9 = vcombine.high %v194_v5, %v194_v5  ;;  %v205_v10 = vrot.slane %v197_v6, %v3077_v31  ;;  %v212_v11 = vrot.slane %v198_v7, %v3077_v31  ;;  %2578 = vst.sshfl [vmem:[#allocation2 + $0x10] sm:$0x33 pattern:$0x76325410] %v197_v6  ;;  %v458_v12 = vpop.f32.mrb[4].mxu0 }
  0xec   :  { %2579 = vst.sshfl [vmem:[#allocation2 + $0x18] sm:$0x33 pattern:$0x76325410] %v198_v7  ;;  %v2712_v14 = vpop.f32.mrb[5].mxu0 }
  0xed   :  { %224 = vst [vmem:[#allocation2 + $0x4] sm:$0xf] %v195_v8  ;;  %226 = vst [vmem:[#allocation2 + $0xc] sm:$0xf] %v196_v9  ;;  %v213_v15 = vcombine.high %v205_v10, %v205_v10  ;;  %v214_v16 = vcombine.high %v212_v11, %v212_v11  ;;  %v461_v17 = vpop.f32.mrb[6].mxu0 }
  0xee   :  { %v2713_v18 = vpop.f32.mrb[7].mxu0 }
  0xef   :  { %228 = vst [vmem:[#allocation2 + $0x14] sm:$0xf] %v213_v15  ;;  %230 = vst [vmem:[#allocation2 + $0x1c] sm:$0xf] %v214_v16 }
  0xf0   :  { %v246_v19 = vld [vmem:[#allocation2] sm:$0x3] }
  0xf1   :  { %v303_v20 = vadd.f32 %v297_v54, %v246_v19 }
  0xf3   :  { %2846 = vtanh.f32 %v303_v20  ;;  %v2589_v26 = vmul.f32 -1.442695, %v303_v20 }
  0xf6   :  { %v407_v21 = vld [vmem:[#allocation2 + $0x1e] sm:$0x3] }
  0xf7   :  { %v464_v22 = vadd.f32 %v458_v12, %v407_v21 }
  0xf9   :  { %2848 = vtanh.f32 %v464_v22  ;;  %v2593_v27 = vmul.f32 -1.442695, %v464_v22 }
  0xfa   :  { %2850 = vpow2.f32 %v2589_v26 }
  0xfb   :  { %2852 = vpow2.f32 %v2593_v27 }
  0xfd   :  { %v2847_v24 = vpop.eup %2846 }
  0xfe   :  { %324 = vrot.lane.b32.xlu0 %v2847_v24, %s2983_s12 }
 0x103   :  { %v2849_v25 = vpop.eup %2848 }
 0x104   :  { %485 = vrot.lane.b32.xlu0 %v2849_v25, %s2983_s12  ;;  %v2851_v28 = vpop.eup %2850 }
 0x105   :  { %v307_v30 = vadd.f32 1.0, %v2851_v28  ;;  %v2853_v32 = vpop.eup %2852  ;;  %v720_v28 = vld [vmem:[#allocation2 + $0x1a] sm:$0x3] }
 0x106   :  { %v468_v33 = vadd.f32 1.0, %v2853_v32 }
 0x107   :  { %2854 = vrcp.f32 %v307_v30 }
 0x108   :  { %2856 = vrcp.f32 %v468_v33 }
 0x111   :  { %v2855_v36 = vpop.eup %2854 }
 0x112   :  { %v2857_v41 = vpop.eup %2856  ;;  %v322_v48 = vmul.f32 %v2855_v36, %v320_v45 }
 0x113   :  { %v483_v52 = vmul.f32 %v2857_v41, %v481_v51 }
 0x170   :  { %v325_v37 = vpop.permute.xlu0 %324 }
 0x171   :  { %v327_v39 = vmul.f32 %v2855_v36, %v325_v37 }
 0x173   :  { %329 = vrot.lane.b32.xlu0 %v327_v39, %s2983_s12 }
 0x176   :  { %v486_v42 = vpop.permute.xlu0 %485 }
 0x177   :  { %v488_v44 = vmul.f32 %v2857_v41, %v486_v42 }
 0x179   :  { %490 = vrot.lane.b32.xlu1 %v488_v44, %s2983_s12 }
 0x1e5   :  { %v330_v49 = vpop.permute.xlu0 %329 }
 0x1e6   :  { %v332_v50 = vadd.f32 %v330_v49, %v322_v48 }
 0x1e8   :  { %2858 = vtanh.f32 %v332_v50  ;;  %v392_v2 = vsub.f32 %v332_v50, %v320_v45 }
 0x1ea   :  { %v400_v7 = vrot.slane %v392_v2, %v3077_v31 }
 0x1eb   :  { %v491_v53 = vpop.permute.xlu1 %490 }
 0x1ec   :  { %v493_v54 = vadd.f32 %v491_v53, %v483_v52 }
 0x1ee   :  { %2860 = vtanh.f32 %v493_v54  ;;  %v555_v8 = vsub.f32 %v493_v54, %v481_v51 }
 0x1f0   :  { %v563_v10 = vrot.slane %v555_v8, %v3077_v31 }
 0x1f2   :  { %v2859_v55 = vpop.eup %2858 }
 0x1f3   :  { %335 = vrot.lane.b32.xlu0 %v2859_v55, %s2983_s12 }
 0x1f7   :  { %375 = vrot.lane.b32.xlu0 %v374_v56, %s2984_s3 }
 0x1f8   :  { %v2861_v57 = vpop.eup %2860 }
 0x1f9   :  { %496 = vrot.lane.b32.xlu1 %v2861_v57, %s2983_s12 }
 0x1fb   :  { %342 = vperm.xlu0 %2834, %v339_v58  }
 0x1fd   :  { %538 = vrot.lane.b32.xlu1 %v537_v59, %s2984_s3 }
 0x201   :  { %504 = vperm.xlu1 %2835, %v2594_v60  }
 0x265   :  { %v336_v61 = vpop.permute.xlu0 %335 }
 0x266   :  { %v3182_v62 = vmul.f32 %v2855_v36, %v336_v61 }
 0x269   :  { %v376_v63 = vpop.permute.xlu0 %375 }
 0x26a   :  { %v378_v0 = vsub.f32 %v3182_v62, %v376_v63 }
 0x26b   :  { %v497_v1 = vpop.permute.xlu1 %496 }
 0x26c   :  { %v386_v3 = vrot.slane %v378_v0, %v3077_v31  ;;  %v3186_v4 = vmul.f32 %v2857_v41, %v497_v1 }
 0x26e   :  { %387 = vrot.lane.b32.xlu1 %v386_v3, %s2984_s3 }
 0x26f   :  { %v539_v5 = vpop.permute.xlu1 %538 }
 0x270   :  { %v541_v6 = vsub.f32 %v3186_v4, %v539_v5 }
 0x272   :  { %v549_v9 = vrot.slane %v541_v6, %v3077_v31  ;;  %401 = vrot.lane.b32.xlu1 %v400_v7, %s2985_s20 }
 0x274   :  { %550 = vrot.lane.b32.xlu0 %v549_v9, %s2984_s3 }
 0x278   :  { %564 = vrot.lane.b32.xlu0 %v563_v10, %s2985_s20 }
 0x27a   :  { %v3198_v12 = vpop.permute.xlu0 %342 }
 0x280   :  { %v3196_v11 = vpop.permute.xlu1 %504 }
 0x2e0   :  { %v388_v14 = vpop.permute.xlu1 %387 }
 0x2e1   :  { %v390_v15 = vmul.f32 %v388_v14, %v3198_v12  ;;  %v2598_v14 = vld [vmem:[%s3856_s6 + $0x2] sm:$0x3] }
 0x2e3   :  { %v3202_v16 = vadd.f32 %v390_v15, %v3092_v35 }
 0x2e4   :  { %v402_v27 = vpop.permute.xlu1 %401 }
 0x2e5   :  { %v571_v17 = vpack.c.bf16 %v3202_v16, %v3202_v16  ;;  %v404_v36 = vmul.f32 %v402_v27, %v3198_v12  ;;  %v687_v9 = vrot.slane %v3202_v16, %v3077_v31 }
 0x2e6   :  { %v551_v18 = vpop.permute.xlu0 %550 }
 0x2e7   :  { %v553_v19 = vmul.f32 %v551_v18, %v3196_v11  ;;  %2719 = vmatmul.mubr.msk.bf16.vlgmr.msra.gmra.mrb[4].mxu1 %vm128_vm1, %v571_v17  ;;  %v3228_v42 = vadd.f32 %v404_v36, %v3099_v38  ;;  %v2602_v17 = vld [vmem:[%s3856_s6 + $0xc] sm:$0x3] }
 0x2e8   :  { %2731 = vmatpush3.bf16.msra.mxu1 %v3073_v29  ;;  %2734 = vmatprep.mubr.msk.bf16.mxu1 %vm2982_vm0, %v2981_v13 }
 0x2e9   :  { %v3212_v20 = vadd.f32 %v3128_v46, %v553_v19  ;;  %2732 = vmatprep.subr.bf16.mxu1 %v2981_v13  ;;  %v570_v46 = vld [vmem:[#allocation2 + $0x4] sm:$0x3]  ;;  %v630_v48 = vrot.slane %v3228_v42, %v3077_v31 }
 0x2ea   :  { %v565_v41 = vpop.permute.xlu0 %564 }
 0x2eb   :  { %v721_v35 = vpack.c.bf16 %v3212_v20, %v3212_v20  ;;  %v567_v45 = vmul.f32 %v565_v41, %v3196_v11  ;;  %v837_v15 = vrot.slane %v3212_v20, %v3077_v31 }
 0x2ec   :  { %2733 = vmatpush3.bf16.msra.mxu1 %v3087_v34 }
 0x2ed   :  { %2727 = vmatmul.mubr.msk.bf16.vlgmr.msra.gmra.mrb[8].mxu0 %vm128_vm1, %v721_v35  ;;  %2746 = vmatprep.subr.bf16.mxu1 %v2981_v13  ;;  %v3235_v49 = vadd.f32 %v3106_v40, %v567_v45 }
 0x2ee   :  { %2739 = vmatpush3.bf16.msra.mxu0 %v3115_v43  ;;  %2742 = vmatprep.mubr.msk.bf16.mxu0 %vm2982_vm0, %v2981_v13 }
 0x2ef   :  { %2740 = vmatprep.subr.bf16.mxu0 %v2981_v13  ;;  %v780_v38 = vrot.slane %v3235_v49, %v3077_v31 }
 0x2f2   :  { %2741 = vmatpush3.bf16.msra.mxu0 %v3133_v47 }
 0x2f3   :  { %2754 = vmatprep.subr.bf16.mxu0 %v2981_v13 }
 0x3ba   :  { %v609_v21 = vpop.f32.mrb[4].mxu1 }
 0x3bb   :  { %v615_v22 = vadd.f32 %v609_v21, %v570_v46  ;;  %v2720_v24 = vpop.f32.mrb[5].mxu1 }
 0x3bc   :  { %v612_v25 = vpop.f32.mrb[6].mxu1 }
 0x3bd   :  { %2862 = vtanh.f32 %v615_v22  ;;  %v2721_v26 = vpop.f32.mrb[7].mxu1  ;;  %v2597_v51 = vmul.f32 -1.442695, %v615_v22 }
 0x3c0   :  { %v759_v30 = vpop.f32.mrb[8].mxu0 }
 0x3c1   :  { %v765_v32 = vadd.f32 %v759_v30, %v720_v28  ;;  %v2728_v33 = vpop.f32.mrb[9].mxu0 }
 0x3c2   :  { %v762_v37 = vpop.f32.mrb[10].mxu0 }
 0x3c3   :  { %2864 = vtanh.f32 %v765_v32  ;;  %v2729_v39 = vpop.f32.mrb[11].mxu0  ;;  %v2601_v52 = vmul.f32 -1.442695, %v765_v32 }
 0x3c4   :  { %2866 = vpow2.f32 %v2597_v51 }
 0x3c5   :  { %2868 = vpow2.f32 %v2601_v52 }
 0x3c7   :  { %v2863_v44 = vpop.eup %2862 }
 0x3c8   :  { %636 = vrot.lane.b32.xlu1 %v2863_v44, %s2983_s12 }
 0x3cc   :  { %631 = vrot.lane.b32.xlu1 %v630_v48, %s2983_s12 }
 0x3cd   :  { %v2865_v50 = vpop.eup %2864 }
 0x3ce   :  { %786 = vrot.lane.b32.xlu0 %v2865_v50, %s2983_s12  ;;  %v2867_v53 = vpop.eup %2866 }
 0x3cf   :  { %v619_v54 = vadd.f32 1.0, %v2867_v53  ;;  %v2869_v55 = vpop.eup %2868 }
 0x3d0   :  { %v769_v40 = vadd.f32 1.0, %v2869_v55 }
 0x3d1   :  { %2870 = vrcp.f32 %v619_v54 }
 0x3d2   :  { %781 = vrot.lane.b32.xlu0 %v780_v38, %s2983_s12  ;;  %2872 = vrcp.f32 %v769_v40 }
 0x3db   :  { %v2871_v56 = vpop.eup %2870 }
 0x3dc   :  { %v2873_v59 = vpop.eup %2872 }
 0x43a   :  { %v637_v57 = vpop.permute.xlu1 %636 }
 0x43b   :  { %v639_v58 = vmul.f32 %v2871_v56, %v637_v57 }
 0x43d   :  { %641 = vrot.lane.b32.xlu1 %v639_v58, %s2983_s12 }
 0x43e   :  { %v632_v63 = vpop.permute.xlu1 %631 }
 0x43f   :  { %v634_v0 = vmul.f32 %v2871_v56, %v632_v63 }
 0x440   :  { %v787_v60 = vpop.permute.xlu0 %786 }
 0x441   :  { %v789_v61 = vmul.f32 %v2873_v59, %v787_v60 }
 0x443   :  { %791 = vrot.lane.b32.xlu0 %v789_v61, %s2983_s12 }
 0x444   :  { %v782_v3 = vpop.permute.xlu0 %781 }
 0x445   :  { %v784_v5 = vmul.f32 %v2873_v59, %v782_v3 }
 0x4af   :  { %v642_v1 = vpop.permute.xlu1 %641 }
 0x4b0   :  { %v644_v2 = vadd.f32 %v642_v1, %v634_v0 }
 0x4b2   :  { %2874 = vtanh.f32 %v644_v2  ;;  %v705_v22 = vsub.f32 %v644_v2, %v632_v63 }
 0x4b4   :  { %v713_v28 = vrot.slane %v705_v22, %v3077_v31 }
 0x4b5   :  { %v792_v6 = vpop.permute.xlu0 %791 }
 0x4b6   :  { %v794_v7 = vadd.f32 %v792_v6, %v784_v5 }
 0x4b8   :  { %2876 = vtanh.f32 %v794_v7  ;;  %v855_v30 = vsub.f32 %v794_v7, %v782_v3 }
 0x4ba   :  { %v863_v33 = vrot.slane %v855_v30, %v3077_v31 }
 0x4bc   :  { %v2875_v8 = vpop.eup %2874 }
 0x4bd   :  { %647 = vrot.lane.b32.xlu1 %v2875_v8, %s2983_s12 }
 0x4c1   :  { %688 = vrot.lane.b32.xlu1 %v687_v9, %s2984_s3 }
 0x4c2   :  { %v2877_v10 = vpop.eup %2876 }
 0x4c3   :  { %797 = vrot.lane.b32.xlu0 %v2877_v10, %s2983_s12 }
 0x4c5   :  { %655 = vperm.xlu1 %2835, %v2598_v14  }
 0x4c7   :  { %838 = vrot.lane.b32.xlu0 %v837_v15, %s2984_s3 }
 0x4cb   :  { %805 = vperm.xlu0 %2834, %v2602_v17  }
 0x52f   :  { %v648_v18 = vpop.permute.xlu1 %647 }
 0x530   :  { %v3258_v19 = vmul.f32 %v2871_v56, %v648_v18  ;;  %v1020_v56 = vld [vmem:[#allocation2 + $0x16] sm:$0x3] }
 0x533   :  { %v689_v35 = vpop.permute.xlu1 %688 }
 0x534   :  { %v691_v46 = vsub.f32 %v3258_v19, %v689_v35 }
 0x535   :  { %v798_v21 = vpop.permute.xlu0 %797 }
 0x536   :  { %v699_v24 = vrot.slane %v691_v46, %v3077_v31  ;;  %v3262_v25 = vmul.f32 %v2873_v59, %v798_v21 }
 0x538   :  { %700 = vrot.lane.b32.xlu1 %v699_v24, %s2984_s3 }
 0x539   :  { %v839_v26 = vpop.permute.xlu0 %838 }
 0x53a   :  { %v841_v27 = vsub.f32 %v3262_v25, %v839_v26 }
 0x53c   :  { %v849_v32 = vrot.slane %v841_v27, %v3077_v31  ;;  %714 = vrot.lane.b32.xlu1 %v713_v28, %s2985_s20 }
 0x53e   :  { %850 = vrot.lane.b32.xlu0 %v849_v32, %s2984_s3 }
 0x542   :  { %864 = vrot.lane.b32.xlu0 %v863_v33, %s2985_s20 }
 0x544   :  { %v3272_v36 = vpop.permute.xlu1 %655 }
 0x54a   :  { %v3275_v41 = vpop.permute.xlu0 %805 }
 0x5aa   :  { %v701_v37 = vpop.permute.xlu1 %700 }
 0x5ab   :  { %v703_v39 = vmul.f32 %v701_v37, %v3272_v36 }
 0x5ad   :  { %v3278_v44 = vadd.f32 %v703_v39, %v3202_v16 }
 0x5ae   :  { %v715_v40 = vpop.permute.xlu1 %714 }
 0x5af   :  { %v871_v45 = vpack.c.bf16 %v3278_v44, %v3278_v44  ;;  %v717_v60 = vmul.f32 %v715_v40, %v3272_v36 }
 0x5b0   :  { %v851_v48 = vpop.permute.xlu0 %850 }
 0x5b1   :  { %v853_v50 = vmul.f32 %v851_v48, %v3275_v41  ;;  %2735 = vmatmul.mubr.msk.bf16.vlgmr.msra.gmra.mrb[8].mxu1 %vm128_vm1, %v871_v45  ;;  %v3304_v1 = vadd.f32 %v717_v60, %v3228_v42  ;;  %v987_v45 = vrot.slane %v3278_v44, %v3077_v31 }
 0x5b2   :  { %2747 = vmatpush3.bf16.msra.mxu1 %v3073_v29  ;;  %2750 = vmatprep.mubr.msk.bf16.mxu1 %vm2982_vm0, %v2981_v13 }
 0x5b3   :  { %v3288_v38 = vadd.f32 %v853_v50, %v3212_v20  ;;  %2748 = vmatprep.subr.bf16.mxu1 %v2981_v13  ;;  %v870_v20 = vld [vmem:[#allocation2 + $0x8] sm:$0x3]  ;;  %v930_v5 = vrot.slane %v3304_v1, %v3077_v31  ;;  %v2606_v50 = vld [vmem:[%s3856_s6 + $0x4] sm:$0x3] }
 0x5b4   :  { %v865_v0 = vpop.permute.xlu0 %864 }
 0x5b5   :  { %v1021_v16 = vpack.c.bf16 %v3288_v38, %v3288_v38  ;;  %v867_v3 = vmul.f32 %v865_v0, %v3275_v41 }
 0x5b6   :  { %2749 = vmatpush3.bf16.msra.mxu1 %v3087_v34 }
 0x5b7   :  { %2743 = vmatmul.mubr.msk.bf16.vlgmr.msra.gmra.mrb[12].mxu0 %vm128_vm1, %v1021_v16  ;;  %2762 = vmatprep.subr.bf16.mxu1 %v2981_v13  ;;  %v3311_v6 = vadd.f32 %v867_v3, %v3235_v49  ;;  %v1137_v16 = vrot.slane %v3288_v38, %v3077_v31 }
 0x5b8   :  { %2755 = vmatpush3.bf16.msra.mxu0 %v3115_v43  ;;  %2758 = vmatprep.mubr.msk.bf16.mxu0 %vm2982_vm0, %v2981_v13 }
 0x5b9   :  { %2756 = vmatprep.subr.bf16.mxu0 %v2981_v13  ;;  %v1080_v42 = vrot.slane %v3311_v6, %v3077_v31 }
 0x5bc   :  { %2757 = vmatpush3.bf16.msra.mxu0 %v3133_v47 }
 0x5bd   :  { %2770 = vmatprep.subr.bf16.mxu0 %v2981_v13 }
 0x684   :  { %v909_v51 = vpop.f32.mrb[8].mxu1 }
 0x685   :  { %v915_v52 = vadd.f32 %v909_v51, %v870_v20  ;;  %v2736_v53 = vpop.f32.mrb[9].mxu1  ;;  %v2610_v20 = vld [vmem:[%s3856_s6 + $0xa] sm:$0x3] }
 0x686   :  { %v912_v54 = vpop.f32.mrb[10].mxu1 }
 0x687   :  { %2878 = vtanh.f32 %v915_v52  ;;  %v2737_v55 = vpop.f32.mrb[11].mxu1  ;;  %v2605_v8 = vmul.f32 -1.442695, %v915_v52 }
 0x68a   :  { %v1059_v57 = vpop.f32.mrb[12].mxu0 }
 0x68b   :  { %v1065_v58 = vadd.f32 %v1059_v57, %v1020_v56  ;;  %v2744_v59 = vpop.f32.mrb[13].mxu0 }
 0x68c   :  { %v1062_v61 = vpop.f32.mrb[14].mxu0 }
 0x68d   :  { %2880 = vtanh.f32 %v1065_v58  ;;  %v2745_v63 = vpop.f32.mrb[15].mxu0  ;;  %v2609_v9 = vmul.f32 -1.442695, %v1065_v58 }
 0x68e   :  { %2882 = vpow2.f32 %v2605_v8 }
 0x68f   :  { %2884 = vpow2.f32 %v2609_v9 }
 0x691   :  { %v2879_v2 = vpop.eup %2878 }
 0x692   :  { %936 = vrot.lane.b32.xlu1 %v2879_v2, %s2983_s12 }
 0x696   :  { %931 = vrot.lane.b32.xlu1 %v930_v5, %s2983_s12 }
 0x697   :  { %v2881_v7 = vpop.eup %2880 }
 0x698   :  { %1086 = vrot.lane.b32.xlu0 %v2881_v7, %s2983_s12  ;;  %v2883_v10 = vpop.eup %2882 }
 0x699   :  { %v919_v14 = vadd.f32 1.0, %v2883_v10  ;;  %v2885_v15 = vpop.eup %2884 }
 0x69a   :  { %v1069_v49 = vadd.f32 1.0, %v2885_v15 }
 0x69b   :  { %2886 = vrcp.f32 %v919_v14 }
 0x69c   :  { %1081 = vrot.lane.b32.xlu0 %v1080_v42, %s2983_s12  ;;  %2888 = vrcp.f32 %v1069_v49 }
 0x6a5   :  { %v2887_v17 = vpop.eup %2886 }
 0x6a6   :  { %v2889_v46 = vpop.eup %2888 }
 0x704   :  { %v937_v18 = vpop.permute.xlu1 %936 }
 0x705   :  { %v939_v35 = vmul.f32 %v2887_v17, %v937_v18 }
 0x707   :  { %941 = vrot.lane.b32.xlu1 %v939_v35, %s2983_s12 }
 0x708   :  { %v932_v24 = vpop.permute.xlu1 %931 }
 0x709   :  { %v934_v26 = vmul.f32 %v2887_v17, %v932_v24 }
 0x70a   :  { %v1087_v21 = vpop.permute.xlu0 %1086 }
 0x70b   :  { %v1089_v22 = vmul.f32 %v2889_v46, %v1087_v21  ;;  %v1320_v21 = vld [vmem:[#allocation2 + $0x12] sm:$0x3] }
 0x70d   :  { %1091 = vrot.lane.b32.xlu0 %v1089_v22, %s2983_s12 }
 0x70e   :  { %v1082_v30 = vpop.permute.xlu0 %1081 }
 0x70f   :  { %v1084_v32 = vmul.f32 %v2889_v46, %v1082_v30 }
 0x779   :  { %v942_v27 = vpop.permute.xlu1 %941 }
 0x77a   :  { %v944_v28 = vadd.f32 %v942_v27, %v934_v26 }
 0x77c   :  { %2890 = vtanh.f32 %v944_v28  ;;  %v1005_v40 = vsub.f32 %v944_v28, %v932_v24 }
 0x77e   :  { %v1013_v60 = vrot.slane %v1005_v40, %v3077_v31 }
 0x77f   :  { %v1092_v33 = vpop.permute.xlu0 %1091 }
 0x780   :  { %v1094_v37 = vadd.f32 %v1092_v33, %v1084_v32 }
 0x782   :  { %2892 = vtanh.f32 %v1094_v37  ;;  %v1155_v61 = vsub.f32 %v1094_v37, %v1082_v30 }
 0x784   :  { %v1163_v0 = vrot.slane %v1155_v61, %v3077_v31 }
 0x786   :  { %v2891_v39 = vpop.eup %2890 }
 0x787   :  { %947 = vrot.lane.b32.xlu1 %v2891_v39, %s2983_s12 }
 0x78b   :  { %988 = vrot.lane.b32.xlu1 %v987_v45, %s2984_s3 }
 0x78c   :  { %v2893_v48 = vpop.eup %2892 }
 0x78d   :  { %1097 = vrot.lane.b32.xlu0 %v2893_v48, %s2983_s12 }
 0x78f   :  { %955 = vperm.xlu1 %2835, %v2606_v50  }
 0x791   :  { %1138 = vrot.lane.b32.xlu0 %v1137_v16, %s2984_s3 }
 0x795   :  { %1105 = vperm.xlu0 %2834, %v2610_v20  }
 0x7f9   :  { %v948_v51 = vpop.permute.xlu1 %947 }
 0x7fa   :  { %v3334_v52 = vmul.f32 %v2887_v17, %v948_v51 }
 0x7fd   :  { %v989_v53 = vpop.permute.xlu1 %988 }
 0x7fe   :  { %v991_v54 = vsub.f32 %v3334_v52, %v989_v53 }
 0x7ff   :  { %v1098_v55 = vpop.permute.xlu0 %1097 }
 0x800   :  { %v999_v56 = vrot.slane %v991_v54, %v3077_v31  ;;  %v3338_v57 = vmul.f32 %v2889_v46, %v1098_v55 }
 0x802   :  { %1000 = vrot.lane.b32.xlu1 %v999_v56, %s2984_s3 }
 0x803   :  { %v1139_v58 = vpop.permute.xlu0 %1138 }
 0x804   :  { %v1141_v59 = vsub.f32 %v3338_v57, %v1139_v58 }
 0x806   :  { %v1149_v63 = vrot.slane %v1141_v59, %v3077_v31  ;;  %1014 = vrot.lane.b32.xlu1 %v1013_v60, %s2985_s20 }
 0x808   :  { %1150 = vrot.lane.b32.xlu0 %v1149_v63, %s2984_s3 }
 0x80c   :  { %1164 = vrot.lane.b32.xlu0 %v1163_v0, %s2985_s20 }
 0x80e   :  { %v3348_v2 = vpop.permute.xlu1 %955 }
 0x814   :  { %v3351_v7 = vpop.permute.xlu0 %1105 }
 0x874   :  { %v1001_v3 = vpop.permute.xlu1 %1000 }
 0x875   :  { %v1003_v5 = vmul.f32 %v1001_v3, %v3348_v2 }
 0x877   :  { %v3354_v42 = vadd.f32 %v1003_v5, %v3278_v44 }
 0x878   :  { %v1015_v46 = vpop.permute.xlu1 %1014 }
 0x879   :  { %v1171_v8 = vpack.c.bf16 %v3354_v42, %v3354_v42  ;;  %v1017_v27 = vmul.f32 %v1015_v46, %v3348_v2 }
 0x87a   :  { %v1151_v9 = vpop.permute.xlu0 %1150 }
 0x87b   :  { %v1153_v10 = vmul.f32 %v1151_v9, %v3351_v7  ;;  %2751 = vmatmul.mubr.msk.bf16.vlgmr.msra.gmra.mrb[12].mxu1 %vm128_vm1, %v1171_v8  ;;  %v3380_v33 = vadd.f32 %v1017_v27, %v3304_v1 }
 0x87c   :  { %2763 = vmatpush3.bf16.msra.mxu1 %v3073_v29  ;;  %2766 = vmatprep.mubr.msk.bf16.mxu1 %vm2982_vm0, %v2981_v13 }
 0x87d   :  { %v3364_v14 = vadd.f32 %v1153_v10, %v3288_v38  ;;  %2764 = vmatprep.subr.bf16.mxu1 %v2981_v13  ;;  %v1170_v38 = vld [vmem:[#allocation2 + $0xc] sm:$0x3]  ;;  %v1230_v45 = vrot.slane %v3380_v33, %v3077_v31 }
 0x87e   :  { %v1165_v32 = vpop.permute.xlu0 %1164 }
 0x87f   :  { %v1321_v44 = vpack.c.bf16 %v3364_v14, %v3364_v14  ;;  %v1167_v39 = vmul.f32 %v1165_v32, %v3351_v7 }
 0x880   :  { %2765 = vmatpush3.bf16.msra.mxu1 %v3087_v34 }
 0x881   :  { %2759 = vmatmul.mubr.msk.bf16.vlgmr.msra.gmra.mrb[16].mxu0 %vm128_vm1, %v1321_v44  ;;  %2778 = vmatprep.subr.bf16.mxu1 %v2981_v13  ;;  %v3387_v48 = vadd.f32 %v1167_v39, %v3311_v6 }
 0x882   :  { %2771 = vmatpush3.bf16.msra.mxu0 %v3115_v43  ;;  %2774 = vmatprep.mubr.msk.bf16.mxu0 %vm2982_vm0, %v2981_v13 }
 0x883   :  { %2772 = vmatprep.subr.bf16.mxu0 %v2981_v13  ;;  %v1380_v1 = vrot.slane %v3387_v48, %v3077_v31 }
 0x886   :  { %2773 = vmatpush3.bf16.msra.mxu0 %v3133_v47 }
 0x887   :  { %2786 = vmatprep.subr.bf16.mxu0 %v2981_v13 }
 0x94e   :  { %v1209_v15 = vpop.f32.mrb[12].mxu1 }
 0x94f   :  { %v1215_v49 = vadd.f32 %v1209_v15, %v1170_v38  ;;  %v2752_v17 = vpop.f32.mrb[13].mxu1  ;;  %v1287_v38 = vrot.slane %v3354_v42, %v3077_v31 }
 0x950   :  { %v1212_v18 = vpop.f32.mrb[14].mxu1  ;;  %v1437_v17 = vrot.slane %v3364_v14, %v3077_v31 }
 0x951   :  { %2894 = vtanh.f32 %v1215_v49  ;;  %v2753_v35 = vpop.f32.mrb[15].mxu1  ;;  %v2613_v16 = vmul.f32 -1.442695, %v1215_v49  ;;  %v2614_v49 = vld [vmem:[%s3856_s6 + $0x6] sm:$0x3] }
 0x952   :  { %v2618_v18 = vld [vmem:[%s3856_s6 + $0x8] sm:$0x3] }
 0x954   :  { %v1359_v22 = vpop.f32.mrb[16].mxu0 }
 0x955   :  { %v1365_v24 = vadd.f32 %v1359_v22, %v1320_v21  ;;  %v2760_v26 = vpop.f32.mrb[17].mxu0 }
 0x956   :  { %v1362_v28 = vpop.f32.mrb[18].mxu0 }
 0x957   :  { %2896 = vtanh.f32 %v1365_v24  ;;  %v2761_v30 = vpop.f32.mrb[19].mxu0  ;;  %v2617_v20 = vmul.f32 -1.442695, %v1365_v24 }
 0x958   :  { %2898 = vpow2.f32 %v2613_v16 }
 0x959   :  { %2900 = vpow2.f32 %v2617_v20 }
 0x95b   :  { %v2895_v37 = vpop.eup %2894 }
 0x95c   :  { %1236 = vrot.lane.b32.xlu1 %v2895_v37, %s2983_s12 }
 0x960   :  { %1231 = vrot.lane.b32.xlu1 %v1230_v45, %s2983_s12 }
 0x961   :  { %v2897_v50 = vpop.eup %2896 }
 0x962   :  { %1386 = vrot.lane.b32.xlu0 %v2897_v50, %s2983_s12  ;;  %v2899_v51 = vpop.eup %2898 }
 0x963   :  { %v1219_v53 = vadd.f32 1.0, %v2899_v51  ;;  %v2901_v54 = vpop.eup %2900 }
 0x964   :  { %v1369_v6 = vadd.f32 1.0, %v2901_v54 }
 0x965   :  { %2902 = vrcp.f32 %v1219_v53 }
 0x966   :  { %1381 = vrot.lane.b32.xlu0 %v1380_v1, %s2983_s12  ;;  %2904 = vrcp.f32 %v1369_v6 }
 0x96f   :  { %v2903_v55 = vpop.eup %2902 }
 0x970   :  { %v2905_v58 = vpop.eup %2904 }
 0x9ce   :  { %v1237_v40 = vpop.permute.xlu1 %1236 }
 0x9cf   :  { %v1239_v56 = vmul.f32 %v2903_v55, %v1237_v40 }
 0x9d1   :  { %1241 = vrot.lane.b32.xlu1 %v1239_v56, %s2983_s12 }
 0x9d2   :  { %v1232_v61 = vpop.permute.xlu1 %1231 }
 0x9d3   :  { %v1234_v63 = vmul.f32 %v2903_v55, %v1232_v61 }
 0x9d4   :  { %v1387_v59 = vpop.permute.xlu0 %1386 }
 0x9d5   :  { %v1389_v60 = vmul.f32 %v2905_v58, %v1387_v59 }
 0x9d7   :  { %1391 = vrot.lane.b32.xlu0 %v1389_v60, %s2983_s12 }
 0x9d8   :  { %v1382_v5 = vpop.permute.xlu0 %1381 }
 0x9d9   :  { %v1384_v8 = vmul.f32 %v2905_v58, %v1382_v5 }
 0xa43   :  { %v1242_v0 = vpop.permute.xlu1 %1241 }
 0xa44   :  { %v1244_v3 = vadd.f32 %v1242_v0, %v1234_v63 }
 0xa46   :  { %2906 = vtanh.f32 %v1244_v3  ;;  %v1305_v26 = vsub.f32 %v1244_v3, %v1232_v61  ;;  %v1616_v61 = vld [vmem:[#allocation2 + $0xe] sm:$0x3] }
 0xa48   :  { %v1313_v37 = vrot.slane %v1305_v26, %v3077_v31 }
 0xa49   :  { %v1392_v9 = vpop.permute.xlu0 %1391 }
 0xa4a   :  { %v1394_v10 = vadd.f32 %v1392_v9, %v1384_v8 }
 0xa4c   :  { %2908 = vtanh.f32 %v1394_v10  ;;  %v1455_v39 = vsub.f32 %v1394_v10, %v1382_v5 }
 0xa4e   :  { %v1463_v50 = vrot.slane %v1455_v39, %v3077_v31 }
 0xa50   :  { %v2907_v44 = vpop.eup %2906 }
 0xa51   :  { %1247 = vrot.lane.b32.xlu1 %v2907_v44, %s2983_s12 }
 0xa55   :  { %1288 = vrot.lane.b32.xlu1 %v1287_v38, %s2984_s3 }
 0xa56   :  { %v2909_v15 = vpop.eup %2908 }
 0xa57   :  { %1397 = vrot.lane.b32.xlu0 %v2909_v15, %s2983_s12 }
 0xa59   :  { %1255 = vperm.xlu1 %2835, %v2614_v49  }
 0xa5b   :  { %1438 = vrot.lane.b32.xlu0 %v1437_v17, %s2984_s3 }
 0xa5f   :  { %1405 = vperm.xlu0 %2834, %v2618_v18  }
 0xac3   :  { %v1248_v35 = vpop.permute.xlu1 %1247 }
 0xac4   :  { %v3410_v46 = vmul.f32 %v2903_v55, %v1248_v35 }
 0xac7   :  { %v1289_v21 = vpop.permute.xlu1 %1288 }
 0xac8   :  { %v1291_v22 = vsub.f32 %v3410_v46, %v1289_v21 }
 0xac9   :  { %v1398_v24 = vpop.permute.xlu0 %1397 }
 0xaca   :  { %v1299_v27 = vrot.slane %v1291_v22, %v3077_v31  ;;  %v3414_v28 = vmul.f32 %v2905_v58, %v1398_v24 }
 0xacc   :  { %1300 = vrot.lane.b32.xlu1 %v1299_v27, %s2984_s3 }
 0xacd   :  { %v1439_v30 = vpop.permute.xlu0 %1438 }
 0xace   :  { %v1441_v32 = vsub.f32 %v3414_v28, %v1439_v30 }
 0xad0   :  { %v1449_v45 = vrot.slane %v1441_v32, %v3077_v31  ;;  %1314 = vrot.lane.b32.xlu1 %v1313_v37, %s2985_s20 }
 0xad2   :  { %1450 = vrot.lane.b32.xlu0 %v1449_v45, %s2984_s3 }
 0xad6   :  { %1464 = vrot.lane.b32.xlu0 %v1463_v50, %s2985_s20 }
 0xad8   :  { %v3424_v1 = vpop.permute.xlu1 %1255 }
 0xade   :  { %v3427_v51 = vpop.permute.xlu0 %1405 }
 0xb3e   :  { %v1301_v16 = vpop.permute.xlu1 %1300 }
 0xb3f   :  { %v1303_v20 = vmul.f32 %v1301_v16, %v3424_v1 }
 0xb41   :  { %v3430_v53 = vadd.f32 %v1303_v20, %v3354_v42 }
 0xb42   :  { %v1315_v60 = vpop.permute.xlu1 %1314 }
 0xb43   :  { %v1470_v54 = vpack.c.bf16 %v3430_v53, %v3430_v53  ;;  %v1317_v3 = vmul.f32 %v1315_v60, %v3424_v1 }
 0xb44   :  { %v1451_v6 = vpop.permute.xlu0 %1450 }
 0xb45   :  { %v1453_v55 = vmul.f32 %v1451_v6, %v3427_v51  ;;  %2767 = vmatmul.mubr.msk.bf16.vlgmr.msra.gmra.mrb[16].mxu1 %vm128_vm1, %v1470_v54  ;;  %v3456_v9 = vadd.f32 %v1317_v3, %v3380_v33 }
 0xb46   :  { %2779 = vmatpush3.bf16.msra.mxu1 %v3073_v29  ;;  %2782 = vmatprep.mubr.msk.bf16.mxu1 %vm2982_vm0, %v2981_v13  ;;  %v1469_v29 = vld [vmem:[#allocation2 + $0x10] sm:$0x3] }
 0xb47   :  { %v3440_v40 = vadd.f32 %v1453_v55, %v3364_v14  ;;  %2780 = vmatprep.subr.bf16.mxu1 %v2981_v13  ;;  %v1529_v38 = vrot.slane %v3456_v9, %v3077_v31 }
 0xb49   :  { %v1617_v42 = vpack.c.bf16 %v3440_v40, %v3440_v40 }
 0xb4a   :  { %2781 = vmatpush3.bf16.msra.mxu1 %v3087_v34 }
 0xb4b   :  { %2775 = vmatmul.mubr.msk.bf16.vlgmr.msra.gmra.mrb[20].mxu0 %vm128_vm1, %v1617_v42  ;;  %2794 = vmatprep.subr.bf16.mxu1 %v2981_v13 }
 0xb4c   :  { %2787 = vmatpush3.bf16.msra.mxu0 %v3115_v43  ;;  %2790 = vmatprep.mubr.msk.bf16.mxu0 %vm2982_vm0, %v2981_v13 }
 0xb4d   :  { %2788 = vmatprep.subr.bf16.mxu0 %v2981_v13 }
 0xb50   :  { %2789 = vmatpush3.bf16.msra.mxu0 %v3133_v47  ;;  %v1465_v47 = vpop.permute.xlu0 %1464 }
 0xb51   :  { %2802 = vmatprep.subr.bf16.mxu0 %v2981_v13  ;;  %v1467_v44 = vmul.f32 %v1465_v47, %v3427_v51 }
 0xb53   :  { %v3463_v15 = vadd.f32 %v1467_v44, %v3387_v48 }
 0xb55   :  { %v1676_v33 = vrot.slane %v3463_v15, %v3077_v31 }
 0xc18   :  { %v1508_v14 = vpop.f32.mrb[16].mxu1 }
 0xc19   :  { %v1514_v56 = vadd.f32 %v1508_v14, %v1469_v29  ;;  %v2768_v58 = vpop.f32.mrb[17].mxu1  ;;  %v1584_v29 = vrot.slane %v3430_v53, %v3077_v31 }
 0xc1a   :  { %v1511_v34 = vpop.f32.mrb[18].mxu1  ;;  %v1731_v58 = vrot.slane %v3440_v40, %v3077_v31 }
 0xc1b   :  { %2910 = vtanh.f32 %v1514_v56  ;;  %v2769_v59 = vpop.f32.mrb[19].mxu1  ;;  %v2621_v17 = vmul.f32 -1.442695, %v1514_v56  ;;  %v2622_v56 = vld [vmem:[%s3856_s6 + $0x8] sm:$0x3] }
 0xc1c   :  { %v2626_v34 = vld [vmem:[%s3856_s6 + $0x6] sm:$0x3] }
 0xc1e   :  { %v1655_v63 = vpop.f32.mrb[20].mxu0 }
 0xc1f   :  { %v1661_v43 = vadd.f32 %v1655_v63, %v1616_v61  ;;  %v2776_v0 = vpop.f32.mrb[21].mxu0 }
 0xc20   :  { %v1658_v5 = vpop.f32.mrb[22].mxu0 }
 0xc21   :  { %2912 = vtanh.f32 %v1661_v43  ;;  %v2777_v8 = vpop.f32.mrb[23].mxu0  ;;  %v2625_v18 = vmul.f32 -1.442695, %v1661_v43 }
 0xc22   :  { %2914 = vpow2.f32 %v2621_v17 }
 0xc23   :  { %2916 = vpow2.f32 %v2625_v18 }
 0xc25   :  { %v2911_v10 = vpop.eup %2910 }
 0xc26   :  { %1535 = vrot.lane.b32.xlu1 %v2911_v10, %s2983_s12 }
 0xc2a   :  { %1530 = vrot.lane.b32.xlu1 %v1529_v38, %s2983_s12 }
 0xc2b   :  { %v2913_v49 = vpop.eup %2912 }
 0xc2c   :  { %1682 = vrot.lane.b32.xlu0 %v2913_v49, %s2983_s12  ;;  %v2915_v35 = vpop.eup %2914 }
 0xc2d   :  { %v1518_v21 = vadd.f32 1.0, %v2915_v35  ;;  %v2917_v22 = vpop.eup %2916 }
 0xc2e   :  { %v1665_v48 = vadd.f32 1.0, %v2917_v22 }
 0xc2f   :  { %2918 = vrcp.f32 %v1518_v21 }
 0xc30   :  { %1677 = vrot.lane.b32.xlu0 %v1676_v33, %s2983_s12  ;;  %2920 = vrcp.f32 %v1665_v48 }
 0xc39   :  { %v2919_v24 = vpop.eup %2918 }
 0xc3a   :  { %v2921_v30 = vpop.eup %2920 }
 0xc98   :  { %v1536_v26 = vpop.permute.xlu1 %1535 }
 0xc99   :  { %v1538_v27 = vmul.f32 %v2919_v24, %v1536_v26  ;;  %v3515_v26 = vld [vmem:[%s3852_s2] sm:$0xff]  }
 0xc9b   :  { %1540 = vrot.lane.b32.xlu1 %v1538_v27, %s2983_s12 }
 0xc9c   :  { %v1531_v39 = vpop.permute.xlu1 %1530 }
 0xc9d   :  { %v1533_v45 = vmul.f32 %v2919_v24, %v1531_v39 }
 0xc9e   :  { %v1683_v32 = vpop.permute.xlu0 %1682 }
 0xc9f   :  { %v1685_v37 = vmul.f32 %v2921_v30, %v1683_v32  ;;  %v3546_v32 = vld [vmem:[%s3852_s2 + $0x18] sm:$0xff]  }
 0xca1   :  { %1687 = vrot.lane.b32.xlu0 %v1685_v37, %s2983_s12  ;;  %v1763_v37 = vld [vmem:[#allocation2 + $0x14] sm:$0x3] }
 0xca2   :  { %v1678_v20 = vpop.permute.xlu0 %1677 }
 0xca3   :  { %v1680_v54 = vmul.f32 %v2921_v30, %v1678_v20 }
 0xd0d   :  { %v1541_v50 = vpop.permute.xlu1 %1540 }
 0xd0e   :  { %v1543_v16 = vadd.f32 %v1541_v50, %v1533_v45 }
 0xd10   :  { %2922 = vtanh.f32 %v1543_v16  ;;  %v1602_v0 = vsub.f32 %v1543_v16, %v1531_v39 }
 0xd12   :  { %v1610_v10 = vrot.slane %v1602_v0, %v3077_v31 }
 0xd13   :  { %v1688_v6 = vpop.permute.xlu0 %1687 }
 0xd14   :  { %v1690_v55 = vadd.f32 %v1688_v6, %v1680_v54  ;;  %v1910_v6 = vld [vmem:[#allocation2 + $0xa] sm:$0x3] }
 0xd16   :  { %2924 = vtanh.f32 %v1690_v55  ;;  %v1749_v44 = vsub.f32 %v1690_v55, %v1678_v20 }
 0xd18   :  { %v1757_v49 = vrot.slane %v1749_v44, %v3077_v31 }
 0xd1a   :  { %v2923_v42 = vpop.eup %2922 }
 0xd1b   :  { %1546 = vrot.lane.b32.xlu1 %v2923_v42, %s2983_s12 }
 0xd1f   :  { %1585 = vrot.lane.b32.xlu1 %v1584_v29, %s2984_s3 }
 0xd20   :  { %v2925_v14 = vpop.eup %2924 }
 0xd21   :  { %1693 = vrot.lane.b32.xlu0 %v2925_v14, %s2983_s12 }
 0xd23   :  { %1553 = vperm.xlu1 %2835, %v2622_v56  }
 0xd25   :  { %1732 = vrot.lane.b32.xlu0 %v1731_v58, %s2984_s3 }
 0xd29   :  { %1700 = vperm.xlu0 %2834, %v2626_v34  }
 0xd8d   :  { %v1547_v59 = vpop.permute.xlu1 %1546 }
 0xd8e   :  { %v3486_v60 = vmul.f32 %v2919_v24, %v1547_v59 }
 0xd91   :  { %v1586_v61 = vpop.permute.xlu1 %1585 }
 0xd92   :  { %v1588_v63 = vsub.f32 %v3486_v60, %v1586_v61 }
 0xd93   :  { %v1694_v43 = vpop.permute.xlu0 %1693 }
 0xd94   :  { %v1596_v3 = vrot.slane %v1588_v63, %v3077_v31  ;;  %v3490_v5 = vmul.f32 %v2921_v30, %v1694_v43  ;;  %v3529_v30 = vld [vmem:[%s3852_s2 + $0x8] sm:$0xff]  }
 0xd96   :  { %1597 = vrot.lane.b32.xlu1 %v1596_v3, %s2984_s3 }
 0xd97   :  { %v1733_v8 = vpop.permute.xlu0 %1732 }
 0xd98   :  { %v1735_v47 = vsub.f32 %v3490_v5, %v1733_v8 }
 0xd9a   :  { %v1743_v38 = vrot.slane %v1735_v47, %v3077_v31  ;;  %1611 = vrot.lane.b32.xlu1 %v1610_v10, %s2985_s20 }
 0xd9c   :  { %1744 = vrot.lane.b32.xlu0 %v1743_v38, %s2984_s3 }
 0xda0   :  { %1758 = vrot.lane.b32.xlu0 %v1757_v49, %s2985_s20 }
 0xda2   :  { %v3500_v33 = vpop.permute.xlu1 %1553 }
 0xda8   :  { %v3503_v35 = vpop.permute.xlu0 %1700 }
 0xe08   :  { %v1598_v17 = vpop.permute.xlu1 %1597 }
 0xe09   :  { %v1600_v18 = vmul.f32 %v1598_v17, %v3500_v33 }
 0xe0b   :  { %v3506_v21 = vadd.f32 %v1600_v18, %v3430_v53 }
 0xe0c   :  { %v1612_v54 = vpop.permute.xlu1 %1611 }
 0xe0d   :  { %v1764_v22 = vpack.c.bf16 %v3506_v21, %v3506_v21  ;;  %v1614_v14 = vmul.f32 %v1612_v54, %v3500_v33 }
 0xe0e   :  { %v1745_v48 = vpop.permute.xlu0 %1744 }
 0xe0f   :  { %v1747_v24 = vmul.f32 %v1745_v48, %v3503_v35  ;;  %2783 = vmatmul.mubr.msk.bf16.vlgmr.msra.gmra.mrb[20].mxu1 %vm128_vm1, %v1764_v22  ;;  %v3552_v59 = vadd.f32 %v1614_v14, %v3456_v9 }
 0xe10   :  { %2795 = vmatpush3.bf16.msra.mxu1 %v3515_v26  ;;  %2798 = vmatprep.mubr.msk.bf16.mxu1 %vm2982_vm0, %v2981_v13 }
 0xe11   :  { %v3521_v53 = vadd.f32 %v1747_v24, %v3440_v40  ;;  %2796 = vmatprep.subr.bf16.mxu1 %v2981_v13  ;;  %v3537_v40 = vld [vmem:[%s3852_s2 + $0x10] sm:$0xff]   ;;  %v1823_v43 = vrot.slane %v3552_v59, %v3077_v31 }
 0xe12   :  { %v1759_v34 = vpop.permute.xlu0 %1758 }
 0xe13   :  { %v1911_v27 = vpack.c.bf16 %v3521_v53, %v3521_v53  ;;  %v1761_v63 = vmul.f32 %v1759_v34, %v3503_v35  ;;  %v2025_v14 = vrot.slane %v3521_v53, %v3077_v31 }
 0xe14   :  { %2797 = vmatpush3.bf16.msra.mxu1 %v3529_v30 }
 0xe15   :  { %2791 = vmatmul.mubr.msk.bf16.vlgmr.msra.gmra.mrb[24].mxu0 %vm128_vm1, %v1911_v27  ;;  %2810 = vmatprep.subr.bf16.mxu1 %v2981_v13  ;;  %v3559_v0 = vadd.f32 %v1761_v63, %v3463_v15 }
 0xe16   :  { %2803 = vmatpush3.bf16.msra.mxu0 %v3537_v40  ;;  %2806 = vmatprep.mubr.msk.bf16.mxu0 %vm2982_vm0, %v2981_v13 }
 0xe17   :  { %2804 = vmatprep.subr.bf16.mxu0 %v2981_v13  ;;  %v1970_v9 = vrot.slane %v3559_v0, %v3077_v31 }
 0xe1a   :  { %2805 = vmatpush3.bf16.msra.mxu0 %v3546_v32 }
 0xe1b   :  { %2818 = vmatprep.subr.bf16.mxu0 %v2981_v13 }
 0xee2   :  { %v1802_v39 = vpop.f32.mrb[20].mxu1 }
 0xee3   :  { %v1808_v45 = vadd.f32 %v1802_v39, %v1763_v37  ;;  %v2784_v50 = vpop.f32.mrb[21].mxu1 }
 0xee4   :  { %v1805_v16 = vpop.f32.mrb[22].mxu1 }
 0xee5   :  { %2926 = vtanh.f32 %v1808_v45  ;;  %v2785_v20 = vpop.f32.mrb[23].mxu1  ;;  %v2629_v8 = vmul.f32 -1.442695, %v1808_v45 }
 0xee8   :  { %v1949_v55 = vpop.f32.mrb[24].mxu0 }
 0xee9   :  { %v1955_v42 = vadd.f32 %v1949_v55, %v1910_v6  ;;  %v2792_v29 = vpop.f32.mrb[25].mxu0  ;;  %v1878_v55 = vrot.slane %v3506_v21, %v3077_v31 }
 0xeea   :  { %v1952_v56 = vpop.f32.mrb[26].mxu0  ;;  %v2630_v29 = vld [vmem:[%s3856_s6 + $0xa] sm:$0x3] }
 0xeeb   :  { %2928 = vtanh.f32 %v1955_v42  ;;  %v2793_v58 = vpop.f32.mrb[27].mxu0  ;;  %v2633_v47 = vmul.f32 -1.442695, %v1955_v42  ;;  %v2634_v56 = vld [vmem:[%s3856_s6 + $0x4] sm:$0x3] }
 0xeec   :  { %2930 = vpow2.f32 %v2629_v8 }
 0xeed   :  { %2932 = vpow2.f32 %v2633_v47 }
 0xeef   :  { %v2927_v61 = vpop.eup %2926 }
 0xef0   :  { %1829 = vrot.lane.b32.xlu1 %v2927_v61, %s2983_s12 }
 0xef4   :  { %1824 = vrot.lane.b32.xlu1 %v1823_v43, %s2983_s12 }
 0xef5   :  { %v2929_v3 = vpop.eup %2928 }
 0xef6   :  { %1976 = vrot.lane.b32.xlu0 %v2929_v3, %s2983_s12  ;;  %v2931_v10 = vpop.eup %2930 }
 0xef7   :  { %v1812_v44 = vadd.f32 1.0, %v2931_v10  ;;  %v2933_v38 = vpop.eup %2932 }
 0xef8   :  { %v1959_v15 = vadd.f32 1.0, %v2933_v38 }
 0xef9   :  { %2934 = vrcp.f32 %v1812_v44 }
 0xefa   :  { %1971 = vrot.lane.b32.xlu0 %v1970_v9, %s2983_s12  ;;  %2936 = vrcp.f32 %v1959_v15 }
 0xf03   :  { %v2935_v49 = vpop.eup %2934 }
 0xf04   :  { %v2937_v22 = vpop.eup %2936 }
 0xf62   :  { %v1830_v17 = vpop.permute.xlu1 %1829 }
 0xf63   :  { %v1832_v18 = vmul.f32 %v2935_v49, %v1830_v17 }
 0xf65   :  { %1834 = vrot.lane.b32.xlu1 %v1832_v18, %s2983_s12 }
 0xf66   :  { %v1825_v27 = vpop.permute.xlu1 %1824 }
 0xf67   :  { %v1827_v37 = vmul.f32 %v2935_v49, %v1825_v27 }
 0xf68   :  { %v1977_v48 = vpop.permute.xlu0 %1976 }
 0xf69   :  { %v1979_v24 = vmul.f32 %v2937_v22, %v1977_v48 }
 0xf6b   :  { %1981 = vrot.lane.b32.xlu0 %v1979_v24, %s2983_s12 }
 0xf6c   :  { %v1972_v50 = vpop.permute.xlu0 %1971 }
 0xf6d   :  { %v1974_v16 = vmul.f32 %v2937_v22, %v1972_v50 }
 0xfd7   :  { %v1835_v39 = vpop.permute.xlu1 %1834 }
 0xfd8   :  { %v1837_v45 = vadd.f32 %v1835_v39, %v1827_v37 }
 0xfda   :  { %2938 = vtanh.f32 %v1837_v45  ;;  %v1896_v3 = vsub.f32 %v1837_v45, %v1825_v27 }
 0xfdc   :  { %v1904_v44 = vrot.slane %v1896_v3, %v3077_v31 }
 0xfdd   :  { %v1982_v20 = vpop.permute.xlu0 %1981 }
 0xfde   :  { %v1984_v54 = vadd.f32 %v1982_v20, %v1974_v16 }
 0xfe0   :  { %2940 = vtanh.f32 %v1984_v54  ;;  %v2043_v38 = vsub.f32 %v1984_v54, %v1972_v50 }
 0xfe4   :  { %v2939_v6 = vpop.eup %2938 }
 0xfe5   :  { %1840 = vrot.lane.b32.xlu1 %v2939_v6, %s2983_s12 }
 0xfe9   :  { %1879 = vrot.lane.b32.xlu1 %v1878_v55, %s2984_s3 }
 0xfea   :  { %v2941_v42 = vpop.eup %2940 }
 0xfeb   :  { %1987 = vrot.lane.b32.xlu0 %v2941_v42, %s2983_s12 }
 0xfed   :  { %1847 = vperm.xlu1 %2835, %v2630_v29  }
 0xfef   :  { %2026 = vrot.lane.b32.xlu0 %v2025_v14, %s2984_s3 }
 0xff3   :  { %1994 = vperm.xlu0 %2834, %v2634_v56  }
0x1057   :  { %v1841_v58 = vpop.permute.xlu1 %1840 }
0x1058   :  { %v3582_v34 = vmul.f32 %v2935_v49, %v1841_v58  ;;  %v2051_v49 = vrot.slane %v2043_v38, %v3077_v31 }
0x105b   :  { %v1880_v61 = vpop.permute.xlu1 %1879 }
0x105c   :  { %v1882_v63 = vsub.f32 %v3582_v34, %v1880_v61 }
0x105d   :  { %v1988_v43 = vpop.permute.xlu0 %1987 }
0x105e   :  { %v1890_v9 = vrot.slane %v1882_v63, %v3077_v31  ;;  %v3586_v8 = vmul.f32 %v2937_v22, %v1988_v43 }
0x1060   :  { %1891 = vrot.lane.b32.xlu1 %v1890_v9, %s2984_s3 }
0x1061   :  { %v2027_v47 = vpop.permute.xlu0 %2026 }
0x1062   :  { %v2029_v10 = vsub.f32 %v3586_v8, %v2027_v47 }
0x1064   :  { %v2037_v15 = vrot.slane %v2029_v10, %v3077_v31  ;;  %1905 = vrot.lane.b32.xlu1 %v1904_v44, %s2985_s20 }
0x1066   :  { %2038 = vrot.lane.b32.xlu0 %v2037_v15, %s2984_s3 }
0x106a   :  { %2052 = vrot.lane.b32.xlu0 %v2051_v49, %s2985_s20 }
0x106c   :  { %v3596_v17 = vpop.permute.xlu1 %1847 }
0x1072   :  { %v3599_v48 = vpop.permute.xlu0 %1994 }
0x10d2   :  { %v1892_v18 = vpop.permute.xlu1 %1891 }
0x10d3   :  { %v1894_v22 = vmul.f32 %v1892_v18, %v3596_v17 }
0x10d5   :  { %v3602_v24 = vadd.f32 %v1894_v22, %v3506_v21 }
0x10d6   :  { %v1906_v6 = vpop.permute.xlu1 %1905 }
0x10d7   :  { %v2058_v27 = vpack.c.bf16 %v3602_v24, %v3602_v24 }
0x10d8   :  { %v2039_v37 = vpop.permute.xlu0 %2038 }
0x10d9   :  { %v2041_v39 = vmul.f32 %v2039_v37, %v3599_v48  ;;  %2799 = vmatmul.mubr.msk.bf16.vlgmr.msra.gmra.mrb[24].mxu1 %vm128_vm1, %v2058_v27 }
0x10da   :  { %2811 = vmatpush3.bf16.msra.mxu1 %v3515_v26  ;;  %2814 = vmatprep.mubr.msk.bf16.mxu1 %vm2982_vm0, %v2981_v13  ;;  %v2057_v26 = vld [vmem:[#allocation2 + $0x18] sm:$0x3] }
0x10db   :  { %v3612_v45 = vadd.f32 %v2041_v39, %v3521_v53  ;;  %2812 = vmatprep.subr.bf16.mxu1 %v2981_v13 }
0x10dd   :  { %v2205_v21 = vpack.c.bf16 %v3612_v45, %v3612_v45 }
0x10de   :  { %2813 = vmatpush3.bf16.msra.mxu1 %v3529_v30  ;;  %v2204_v30 = vld [vmem:[#allocation2 + $0x6] sm:$0x3] }
0x10df   :  { %2807 = vmatmul.mubr.msk.bf16.vlgmr.msra.gmra.mrb[28].mxu0 %vm128_vm1, %v2205_v21 }
0x10e0   :  { %2819 = vmatpush3.bf16.msra.mxu0 %v3537_v40  ;;  %2822 = vmatprep.mubr.msk.bf16.mxu0 %vm2982_vm0, %v2981_v13  ;;  %v1908_v40 = vmul.f32 %v1906_v6, %v3596_v17 }
0x10e1   :  { %2820 = vmatprep.subr.bf16.mxu0 %v2981_v13  ;;  %v2053_v13 = vpop.permute.xlu0 %2052 }
0x10e2   :  { %v2055_v61 = vmul.f32 %v2053_v13, %v3599_v48 }
0x10e4   :  { %2821 = vmatpush3.bf16.msra.mxu0 %v3546_v32  ;;  %v3626_v32 = vadd.f32 %v1908_v40, %v3552_v59  ;;  %v3633_v43 = vadd.f32 %v2055_v61, %v3559_v0  ;;  %v2642_v40 = vld [vmem:[%s3856_s6 + $0x2] sm:$0x3] }
0x10e6   :  { %v2117_v63 = vrot.slane %v3626_v32, %v3077_v31  ;;  %v2264_v59 = vrot.slane %v3633_v43, %v3077_v31 }
0x11ac   :  { %v2096_v53 = vpop.f32.mrb[24].mxu1 }
0x11ad   :  { %v2102_v50 = vadd.f32 %v2096_v53, %v2057_v26  ;;  %v2800_v16 = vpop.f32.mrb[25].mxu1 }
0x11ae   :  { %v2099_v20 = vpop.f32.mrb[26].mxu1 }
0x11af   :  { %2942 = vtanh.f32 %v2102_v50  ;;  %v2801_v54 = vpop.f32.mrb[27].mxu1  ;;  %v2637_v9 = vmul.f32 -1.442695, %v2102_v50 }
0x11b2   :  { %v2243_v55 = vpop.f32.mrb[28].mxu0 }
0x11b3   :  { %v2249_v42 = vadd.f32 %v2243_v55, %v2204_v30  ;;  %v2808_v29 = vpop.f32.mrb[29].mxu0  ;;  %v2172_v30 = vrot.slane %v3602_v24, %v3077_v31 }
0x11b4   :  { %v2246_v14 = vpop.f32.mrb[30].mxu0  ;;  %v2319_v29 = vrot.slane %v3612_v45, %v3077_v31 }
0x11b5   :  { %2944 = vtanh.f32 %v2249_v42  ;;  %v2809_v56 = vpop.f32.mrb[31].mxu0  ;;  %v2641_v47 = vmul.f32 -1.442695, %v2249_v42  ;;  %v2638_v42 = vld [vmem:[%s3856_s6 + $0xc] sm:$0x3] }
0x11b6   :  { %2946 = vpow2.f32 %v2637_v9 }
0x11b7   :  { %2948 = vpow2.f32 %v2641_v47 }
0x11b9   :  { %v2943_v58 = vpop.eup %2942 }
0x11ba   :  { %2123 = vrot.lane.b32.xlu1 %v2943_v58, %s2983_s12 }
0x11be   :  { %2118 = vrot.lane.b32.xlu1 %v2117_v63, %s2983_s12 }
0x11bf   :  { %v2945_v3 = vpop.eup %2944 }
0x11c0   :  { %2270 = vrot.lane.b32.xlu0 %v2945_v3, %s2983_s12  ;;  %v2947_v10 = vpop.eup %2946 }
0x11c1   :  { %v2106_v44 = vadd.f32 1.0, %v2947_v10  ;;  %v2949_v38 = vpop.eup %2948 }
0x11c2   :  { %v2253_v0 = vadd.f32 1.0, %v2949_v38 }
0x11c3   :  { %2950 = vrcp.f32 %v2106_v44 }
0x11c4   :  { %2265 = vrot.lane.b32.xlu0 %v2264_v59, %s2983_s12  ;;  %2952 = vrcp.f32 %v2253_v0 }
0x11cd   :  { %v2951_v15 = vpop.eup %2950 }
0x11ce   :  { %v2953_v22 = vpop.eup %2952 }
0x122c   :  { %v2124_v49 = vpop.permute.xlu1 %2123 }
0x122d   :  { %v2126_v18 = vmul.f32 %v2951_v15, %v2124_v49 }
0x122f   :  { %2128 = vrot.lane.b32.xlu1 %v2126_v18, %s2983_s12 }
0x1230   :  { %v2119_v39 = vpop.permute.xlu1 %2118 }
0x1231   :  { %v2121_v21 = vmul.f32 %v2951_v15, %v2119_v39 }
0x1232   :  { %v2271_v27 = vpop.permute.xlu0 %2270 }
0x1233   :  { %v2273_v37 = vmul.f32 %v2953_v22, %v2271_v27 }
0x1235   :  { %2275 = vrot.lane.b32.xlu0 %v2273_v37, %s2983_s12 }
0x1236   :  { %v2266_v50 = vpop.permute.xlu0 %2265 }
0x1237   :  { %v2268_v16 = vmul.f32 %v2953_v22, %v2266_v50 }
0x12a1   :  { %v2129_v26 = vpop.permute.xlu1 %2128 }
0x12a2   :  { %v2131_v53 = vadd.f32 %v2129_v26, %v2121_v21 }
0x12a4   :  { %2954 = vtanh.f32 %v2131_v53  ;;  %v2190_v63 = vsub.f32 %v2131_v53, %v2119_v39 }
0x12a6   :  { %v2198_v47 = vrot.slane %v2190_v63, %v3077_v31 }
0x12a7   :  { %v2276_v20 = vpop.permute.xlu0 %2275 }
0x12a8   :  { %v2278_v54 = vadd.f32 %v2276_v20, %v2268_v16 }
0x12aa   :  { %2956 = vtanh.f32 %v2278_v54  ;;  %v2337_v44 = vsub.f32 %v2278_v54, %v2266_v50  ;;  %v2351_v50 = vld [vmem:[#allocation2 + $0x1c] sm:$0x3] }
0x12ac   :  { %v2345_v0 = vrot.slane %v2337_v44, %v3077_v31 }
0x12ae   :  { %v2955_v6 = vpop.eup %2954 }
0x12af   :  { %2134 = vrot.lane.b32.xlu1 %v2955_v6, %s2983_s12 }
0x12b3   :  { %2173 = vrot.lane.b32.xlu1 %v2172_v30, %s2984_s3 }
0x12b4   :  { %v2957_v55 = vpop.eup %2956 }
0x12b5   :  { %2281 = vrot.lane.b32.xlu0 %v2957_v55, %s2983_s12 }
0x12b7   :  { %2141 = vperm.xlu1 %2835, %v2638_v42  }
0x12b9   :  { %2320 = vrot.lane.b32.xlu0 %v2319_v29, %s2984_s3 }
0x12bd   :  { %2288 = vperm.xlu0 %2834, %v2642_v40  }
0x1321   :  { %v2135_v14 = vpop.permute.xlu1 %2134 }
0x1322   :  { %v3656_v56 = vmul.f32 %v2951_v15, %v2135_v14 }
0x1325   :  { %v2174_v13 = vpop.permute.xlu1 %2173 }
0x1326   :  { %v2176_v58 = vsub.f32 %v3656_v56, %v2174_v13 }
0x1327   :  { %v2282_v61 = vpop.permute.xlu0 %2281 }
0x1328   :  { %v2184_v3 = vrot.slane %v2176_v58, %v3077_v31  ;;  %v3660_v59 = vmul.f32 %v2953_v22, %v2282_v61 }
0x132a   :  { %2185 = vrot.lane.b32.xlu1 %v2184_v3, %s2984_s3 }
0x132b   :  { %v2321_v9 = vpop.permute.xlu0 %2320 }
0x132c   :  { %v2323_v10 = vsub.f32 %v3660_v59, %v2321_v9 }
0x132e   :  { %v2331_v38 = vrot.slane %v2323_v10, %v3077_v31  ;;  %2199 = vrot.lane.b32.xlu1 %v2198_v47, %s2985_s20 }
0x1330   :  { %2332 = vrot.lane.b32.xlu0 %v2331_v38, %s2984_s3 }
0x1334   :  { %2346 = vrot.lane.b32.xlu0 %v2345_v0, %s2985_s20 }
0x1336   :  { %v3670_v15 = vpop.permute.xlu1 %2141 }
0x133c   :  { %v3673_v22 = vpop.permute.xlu0 %2288 }
0x139c   :  { %v2186_v49 = vpop.permute.xlu1 %2185 }
0x139d   :  { %v2188_v18 = vmul.f32 %v2186_v49, %v3670_v15 }
0x139f   :  { %v2189_v27 = vadd.f32 %v2188_v18, %v3602_v24  ;;  %v2459_v24 = vld [vmem:[#allocation2 + $0x2] sm:$0x3] }
0x13a0   :  { %v2200_v55 = vpop.permute.xlu1 %2199 }
0x13a1   :  { %v2352_v37 = vpack.c.bf16 %v2189_v27, %v2189_v27  ;;  %v2202_v14 = vmul.f32 %v2200_v55, %v3670_v15  ;;  %v345_v55 = vmul.f32 %v3198_v12, %v3182_v62  ;;  %v808_v12 = vmul.f32 %v3275_v41, %v3262_v25 }
0x13a2   :  { %v2333_v39 = vpop.permute.xlu0 %2332 }
0x13a3   :  { %v2335_v21 = vmul.f32 %v2333_v39, %v3673_v22  ;;  %2815 = vmatmul.mubr.msk.bf16.vlgmr.msra.gmra.mrb[28].mxu1 %vm128_vm1, %v2352_v37  ;;  %v2203_v61 = vadd.f32 %v2202_v14, %v3626_v32  ;;  %v658_v14 = vmul.f32 %v3272_v36, %v3258_v19  ;;  %v1258_v36 = vmul.f32 %v3424_v1, %v3410_v46 }
0x13a5   :  { %v2336_v26 = vadd.f32 %v2335_v21, %v3612_v45  ;;  %v2411_v9 = vrot.slane %v2203_v61, %v3077_v31  ;;  %v958_v61 = vmul.f32 %v3348_v2, %v3334_v52  ;;  %v1108_v52 = vmul.f32 %v3351_v7, %v3338_v57 }
0x13a6   :  { %v2347_v58 = vpop.permute.xlu0 %2346  ;;  %v1259_v41 = vpack.c.bf16 %v1258_v36, %v1258_v36 }
0x13a7   :  { %v2460_v53 = vpack.c.bf16 %v2336_v26, %v2336_v26  ;;  %v2349_v3 = vmul.f32 %v2347_v58, %v3673_v22  ;;  %v659_v58 = vpack.c.bf16 %v658_v14, %v658_v14  ;;  %v959_v19 = vpack.c.bf16 %v958_v61, %v958_v61 }
0x13a8   :  { %v1267_v7 = vrot.slane %v1259_v41, %v3063_v23 }
0x13a9   :  { %2823 = vmatmul.mubr.msk.bf16.vlgmr.msra.gmra.mrb[32].mxu0 %vm128_vm1, %v2460_v53  ;;  %v2350_v47 = vadd.f32 %v2349_v3, %v3633_v43  ;;  %v667_v3 = vrot.slane %v659_v58, %v3063_v23  ;;  %v967_v25 = vrot.slane %v959_v19, %v3063_v23 }
0x13ab   :  { %v2519_v44 = vrot.slane %v2350_v47, %v3077_v31  ;;  %v2646_v31 = vld [vmem:[%s3856_s6 + $0xe] sm:$0x3]  ;;  %v1556_v47 = vmul.f32 %v3500_v33, %v3486_v60  ;;  %v674_v46 = vrot.slane %v667_v3, %v3063_v23  ;;  %v1850_v60 = vmul.f32 %v3596_v17, %v3582_v34 }
0x13ac   :  { %v974_v33 = vrot.slane %v967_v25, %v3063_v23  ;;  %v2144_v34 = vmul.f32 %v3670_v15, %v3656_v56  ;;  %v1274_v17 = vrot.slane %v1267_v7, %v3063_v23 }
0x1476   :  { %v2390_v16 = vpop.f32.mrb[28].mxu1 }
0x1477   :  { %v2396_v20 = vadd.f32 %v2390_v16, %v2351_v50  ;;  %v2816_v54 = vpop.f32.mrb[29].mxu1  ;;  %v2540_v50 = vld [vmem:[%s3856_s6] sm:$0x3] }
0x1478   :  { %v2393_v6 = vpop.f32.mrb[30].mxu1 }
0x1479   :  { %2958 = vtanh.f32 %v2396_v20  ;;  %v2817_v30 = vpop.f32.mrb[31].mxu1  ;;  %v2645_v38 = vmul.f32 -1.442695, %v2396_v20 }
0x147c   :  { %v2498_v42 = vpop.f32.mrb[32].mxu0 }
0x147d   :  { %v2504_v29 = vadd.f32 %v2498_v42, %v2459_v24  ;;  %v2824_v40 = vpop.f32.mrb[33].mxu0 }
0x147e   :  { %v2501_v13 = vpop.f32.mrb[34].mxu0  ;;  %v346_v40 = vpack.c.bf16 %v345_v55, %v345_v55 }
0x147f   :  { %2960 = vtanh.f32 %v2504_v29  ;;  %v2825_v45 = vpop.f32.mrb[35].mxu0  ;;  %v2649_v32 = vmul.f32 -1.442695, %v2504_v29  ;;  %v507_v13 = vmul.f32 %v3196_v11, %v3186_v4 }
0x1480   :  { %2962 = vpow2.f32 %v2645_v38  ;;  %v354_v45 = vrot.slane %v346_v40, %v3063_v23  ;;  %v1557_v38 = vpack.c.bf16 %v1556_v47, %v1556_v47 }
0x1481   :  { %2964 = vpow2.f32 %v2649_v32  ;;  %v508_v62 = vpack.c.bf16 %v507_v13, %v507_v13 }
0x1482   :  { %v361_v4 = vrot.slane %v354_v45, %v3063_v23 }
0x1483   :  { %v2959_v63 = vpop.eup %2958  ;;  %v516_v11 = vrot.slane %v508_v62, %v3063_v23 }
0x1484   :  { %2417 = vrot.lane.b32.xlu1 %v2959_v63, %s2983_s12 }
0x1485   :  { %v523_v57 = vrot.slane %v516_v11, %v3063_v23 }
0x1488   :  { %2412 = vrot.lane.b32.xlu1 %v2411_v9, %s2983_s12  ;;  %v809_v9 = vpack.c.bf16 %v808_v12, %v808_v12 }
0x1489   :  { %v2961_v10 = vpop.eup %2960 }
0x148a   :  { %2525 = vrot.lane.b32.xlu0 %v2961_v10, %s2983_s12  ;;  %v2963_v0 = vpop.eup %2962  ;;  %v817_v1 = vrot.slane %v809_v9, %v3063_v23  ;;  %v1109_v10 = vpack.c.bf16 %v1108_v52, %v1108_v52 }
0x148b   :  { %v2400_v49 = vadd.f32 1.0, %v2963_v0  ;;  %v2965_v18 = vpop.eup %2964 }
0x148c   :  { %v2508_v27 = vadd.f32 1.0, %v2965_v18  ;;  %v1117_v32 = vrot.slane %v1109_v10, %v3063_v23  ;;  %v1851_v18 = vpack.c.bf16 %v1850_v60, %v1850_v60 }
0x148d   :  { %2966 = vrcp.f32 %v2400_v49  ;;  %v1565_v49 = vrot.slane %v1557_v38, %v3063_v23 }
0x148e   :  { %2520 = vrot.lane.b32.xlu0 %v2519_v44, %s2983_s12  ;;  %2968 = vrcp.f32 %v2508_v27  ;;  %v1408_v44 = vmul.f32 %v3427_v51, %v3414_v28  ;;  %v1703_v28 = vmul.f32 %v3503_v35, %v3490_v5  ;;  %v824_v51 = vrot.slane %v817_v1, %v3063_v23 }
0x148f   :  { %v1997_v5 = vmul.f32 %v3599_v48, %v3586_v8  ;;  %v1124_v35 = vrot.slane %v1117_v32, %v3063_v23  ;;  %v1572_v56 = vrot.slane %v1565_v49, %v3063_v23 }
0x1490   :  { %v1409_v0 = vpack.c.bf16 %v1408_v44, %v1408_v44 }
0x1492   :  { %v1417_v27 = vrot.slane %v1409_v0, %v3063_v23 }
0x1494   :  { %v1424_v8 = vrot.slane %v1417_v27, %v3063_v23 }
0x1497   :  { %v3690_v43 = vpop.eup %2966 }
0x1498   :  { %v3697_v21 = vpop.eup %2968 }
0x14f6   :  { %v2418_v37 = vpop.permute.xlu1 %2417 }
0x14f7   :  { %v2420_v39 = vmul.f32 %v3690_v43, %v2418_v37  ;;  %v1704_v37 = vpack.c.bf16 %v1703_v28, %v1703_v28 }
0x14f9   :  { %2422 = vrot.lane.b32.xlu1 %v2420_v39, %s2983_s12  ;;  %v1859_v39 = vrot.slane %v1851_v18, %v3063_v23  ;;  %v1712_v15 = vrot.slane %v1704_v37, %v3063_v23 }
0x14fa   :  { %v2413_v16 = vpop.permute.xlu1 %2412 }
0x14fb   :  { %v2415_v20 = vmul.f32 %v3690_v43, %v2413_v16 }
0x14fc   :  { %v2526_v26 = vpop.permute.xlu0 %2525 }
0x14fd   :  { %v2528_v53 = vmul.f32 %v3697_v21, %v2526_v26  ;;  %2435 = vperm.xlu1 %2835, %v2646_v31   ;;  %v2145_v31 = vpack.c.bf16 %v2144_v34, %v2144_v34  ;;  %v1998_v26 = vpack.c.bf16 %v1997_v5, %v1997_v5 }
0x14ff   :  { %2530 = vrot.lane.b32.xlu0 %v2528_v53, %s2983_s12  ;;  %v2291_v53 = vmul.f32 %v3673_v22, %v3660_v59  ;;  %v2153_v48 = vrot.slane %v2145_v31, %v3063_v23  ;;  %v2006_v16 = vrot.slane %v1998_v26, %v3063_v23 }
0x1500   :  { %v2521_v30 = vpop.permute.xlu0 %2520 }
0x1501   :  { %v2523_v24 = vmul.f32 %v3697_v21, %v2521_v30  ;;  %v2160_v59 = vrot.slane %v2153_v48, %v3063_v23 }
0x1503   :  { %2543 = vperm.xlu0 %2834, %v2540_v50   ;;  %v1866_v50 = vrot.slane %v1859_v39, %v3063_v23 }
0x156b   :  { %v2423_v54 = vpop.permute.xlu1 %2422 }
0x156c   :  { %v2425_v6 = vadd.f32 %v2423_v54, %v2415_v20  ;;  %v2292_v20 = vpack.c.bf16 %v2291_v53, %v2291_v53  ;;  %v1719_v54 = vrot.slane %v1712_v15, %v3063_v23 }
0x156e   :  { %2970 = vtanh.f32 %v2425_v6  ;;  %v2300_v22 = vrot.slane %v2292_v20, %v3063_v23  ;;  %v2013_v6 = vrot.slane %v2006_v16, %v3063_v23 }
0x1570   :  { %v2307_v30 = vrot.slane %v2300_v22, %v3063_v23 }
0x1571   :  { %v2531_v42 = vpop.permute.xlu0 %2530 }
0x1572   :  { %v2533_v29 = vadd.f32 %v2531_v42, %v2523_v24 }
0x1574   :  { %2972 = vtanh.f32 %v2533_v29 }
0x1578   :  { %v2971_v63 = vpop.eup %2970 }
0x1579   :  { %2428 = vrot.lane.b32.xlu1 %v2971_v63, %s2983_s12 }
0x157c   :  { %v2436_v55 = vpop.permute.xlu1 %2435 }
0x157d   :  { %362 = vrot.lane.b32.xlu1 %v361_v4, %s2984_s3 }
0x157e   :  { %v2973_v2 = vpop.eup %2972 }
0x157f   :  { %2536 = vrot.lane.b32.xlu0 %v2973_v2, %s2983_s12 }
0x1581   :  { %675 = vrot.lane.b32.xlu1 %v674_v46, %s2984_s3 }
0x1582   :  { %v2544_v29 = vpop.permute.xlu0 %2543 }
0x1583   :  { %524 = vrot.lane.b32.xlu0 %v523_v57, %s2985_s20 }
0x1585   :  { %975 = vrot.lane.b32.xlu1 %v974_v33, %s2984_s3 }
0x1587   :  { %825 = vrot.lane.b32.xlu0 %v824_v51, %s2985_s20 }
0x1589   :  { %1275 = vrot.lane.b32.xlu1 %v1274_v17, %s2984_s3 }
0x158b   :  { %1125 = vrot.lane.b32.xlu0 %v1124_v35, %s2985_s20 }
0x158d   :  { %1573 = vrot.lane.b32.xlu1 %v1572_v56, %s2984_s3 }
0x158f   :  { %1425 = vrot.lane.b32.xlu0 %v1424_v8, %s2985_s20 }
0x1591   :  { %1867 = vrot.lane.b32.xlu1 %v1866_v50, %s2984_s3 }
0x1593   :  { %1720 = vrot.lane.b32.xlu0 %v1719_v54, %s2985_s20 }
0x1595   :  { %2161 = vrot.lane.b32.xlu1 %v2160_v59, %s2984_s3 }
0x1597   :  { %2014 = vrot.lane.b32.xlu0 %v2013_v6, %s2985_s20 }
0x159b   :  { %2308 = vrot.lane.b32.xlu0 %v2307_v30, %s2985_s20 }
0x15eb   :  { %v2429_v24 = vpop.permute.xlu1 %2428 }
0x15ec   :  { %v2431_v42 = vmul.f32 %v3690_v43, %v2429_v24 }
0x15ee   :  { %v2438_v40 = vmul.f32 %v2436_v55, %v2431_v42 }
0x15ef   :  { %v363_v14 = vpop.permute.xlu1 %362 }
0x15f0   :  { %v2439_v13 = vpack.c.bf16 %v2438_v40, %v2438_v40  ;;  %366 = vst.msk [vmem:[%s3857_s7] sm:$0x1] %vm365_vm2, %v363_v14 }
0x15f1   :  { %v2537_v45 = vpop.permute.xlu0 %2536 }
0x15f2   :  { %v2447_v58 = vrot.slane %v2439_v13, %v3063_v23  ;;  %v2539_v61 = vmul.f32 %v3697_v21, %v2537_v45 }
0x15f3   :  { %v676_v63 = vpop.permute.xlu1 %675 }
0x15f4   :  { %v2454_v62 = vrot.slane %v2447_v58, %v3063_v23  ;;  %v2546_v43 = vmul.f32 %v2544_v29, %v2539_v61  ;;  %2599 = vst.msk [vmem:[%s3857_s7 + $0x1] sm:$0x1] %vm365_vm2, %v676_v63 }
0x15f5   :  { %v525_v12 = vpop.permute.xlu0 %524 }
0x15f6   :  { %v2547_v3 = vpack.c.bf16 %v2546_v43, %v2546_v43  ;;  %2595 = vst.msk [vmem:[%s3857_s7 + $0x7] sm:$0x1] %vm528_vm3, %v525_v12  ;;  %2455 = vrot.lane.b32.xlu1 %v2454_v62, %s2984_s3 }
0x15f7   :  { %v976_v21 = vpop.permute.xlu1 %975 }
0x15f8   :  { %v2555_v19 = vrot.slane %v2547_v3, %v3063_v23  ;;  %2607 = vst.msk [vmem:[%s3857_s7 + $0x2] sm:$0x1] %vm365_vm2, %v976_v21 }
0x15f9   :  { %v826_v36 = vpop.permute.xlu0 %825 }
0x15fa   :  { %v2562_v4 = vrot.slane %v2555_v19, %v3063_v23  ;;  %2603 = vst.msk [vmem:[%s3857_s7 + $0x6] sm:$0x1] %vm528_vm3, %v826_v36 }
0x15fb   :  { %v1276_v11 = vpop.permute.xlu1 %1275 }
0x15fc   :  { %2615 = vst.msk [vmem:[%s3857_s7 + $0x3] sm:$0x1] %vm365_vm2, %v1276_v11  ;;  %2563 = vrot.lane.b32.xlu0 %v2562_v4, %s2985_s20 }
0x15fd   :  { %v1126_v9 = vpop.permute.xlu0 %1125 }
0x15fe   :  { %2611 = vst.msk [vmem:[%s3857_s7 + $0x5] sm:$0x1] %vm528_vm3, %v1126_v9 }
0x15ff   :  { %v1574_v23 = vpop.permute.xlu1 %1573 }
0x1601   :  { %v1426_v52 = vpop.permute.xlu0 %1425 }
0x1602   :  { %2619 = vst.msk [vmem:[%s3857_s7 + $0x4] sm:$0x1] %vm528_vm3, %v1426_v52 }
0x1603   :  { %2623 = vst.msk [vmem:[%s3857_s7 + $0x4] sm:$0x1] %vm365_vm2, %v1574_v23  ;;  %v1868_v2 = vpop.permute.xlu1 %1867 }
0x1604   :  { %2631 = vst.msk [vmem:[%s3857_s7 + $0x5] sm:$0x1] %vm365_vm2, %v1868_v2 }
0x1605   :  { %v1721_v25 = vpop.permute.xlu0 %1720 }
0x1606   :  { %2627 = vst.msk [vmem:[%s3857_s7 + $0x3] sm:$0x1] %vm528_vm3, %v1721_v25 }
0x1607   :  { %v2162_v41 = vpop.permute.xlu1 %2161 }
0x1608   :  { %2639 = vst.msk [vmem:[%s3857_s7 + $0x6] sm:$0x1] %vm365_vm2, %v2162_v41 }
0x1609   :  { %v2015_v47 = vpop.permute.xlu0 %2014 }
0x160a   :  { %2635 = vst.msk [vmem:[%s3857_s7 + $0x2] sm:$0x1] %vm528_vm3, %v2015_v47 }
0x160d   :  { %v2309_v46 = vpop.permute.xlu0 %2308 }
0x160e   :  { %2643 = vst.msk [vmem:[%s3857_s7 + $0x1] sm:$0x1] %vm528_vm3, %v2309_v46 }
0x1668   :  { %v2456_v1 = vpop.permute.xlu1 %2455 }
0x1669   :  { %2647 = vst.msk [vmem:[%s3857_s7 + $0x7] sm:$0x1] %vm365_vm2, %v2456_v1 }
0x166e   :  { %v2564_v10 = vpop.permute.xlu0 %2563 }
0x166f   :  { %2566 = vst.msk [vmem:[%s3857_s7] sm:$0x1] %vm528_vm3, %v2564_v10 }

// kernel: lstm_lm_forward_pallas.4
= control target key start
LH: loop header
LB: loop body
LE: loop exit
PB: predicated region body
PF: predicated region fallthrough
CT: control target
= control target key end

     0   :  { %v45_v0 = vlaneseq  ;;  %v3013_v2 = vmov 0   ;;  %v3014_v3 = vmov 1966171168   ;;  %v3015_v7 = vmov 1983009808   ;;  %s3020_s29 = smov 96   ;;  %s3896_s1 = inlined_call_operand.vmem [shape: bf16[64,256], index: 1, kind: input, shape index: {}]   ;;  %s3897_s0 = inlined_call_operand.vmem [shape: bf16[8,2,64], index: 0, kind: input, shape index: {}]   ;;  %s3898_s2 = inlined_call_operand.vmem [shape: bf16[2,32,128], index: 2, kind: input, shape index: {}]   ;;  %s3899_s4 = inlined_call_operand.vmem [shape: f32[2,2,32], index: 4, kind: input, shape index: {}]   ;;  %s3900_s5 = inlined_call_operand.vmem [shape: f32[2,2,32], index: 5, kind: input, shape index: {}]   ;;  %s3901_s3 = inlined_call_operand.vmem [shape: f32[1,256], index: 3, kind: input, shape index: {}]   ;;  %s3902_s6 = inlined_call_operand.vmem [shape: f32[8,2,1], index: 6, kind: input, shape index: {}]   ;;  %s3903_s7 = inlined_call_operand.vmem [shape: bf16[8,2,64], index: 7, kind: output, shape index: {}]  }
   0x1   :  { %v2865_v1 = vld [vmem:[%s3896_s1 + $0x4] ss:$8 sps:$4 sm:$0xff]   ;;  %188 = vmatprep.mubr.bf16.mxu0 %v3013_v2  ;;  %v68_v4 = vunpack.c.l.s4 %v3014_v3  ;;  %2863 = vset.pattern.permute.xlu0 %v3013_v2  ;;  %v2867_v5 = vld [vmem:[%s3896_s1] ss:$8 sps:$4 sm:$0xff]   ;;  %v206_v8 = vunpack.c.l.s4 %v3015_v7  ;;  %v2868_v9 = vld [vmem:[%s3896_s1 + $0x14] ss:$8 sps:$4 sm:$0xff]  }
   0x2   :  { %v3067_v6 = vshrl.u32 %v45_v0, 7  ;;  %2864 = vset.pattern.permute.xlu1 %v3013_v2  ;;  %156 = vmatprep.subr.bf16.mxu0 %v2865_v1  ;;  %v3016_v11 = vmov 0.0   ;;  %v2870_v12 = vld [vmem:[%s3896_s1 + $0x10] ss:$8 sps:$4 sm:$0xff]   ;;  %vm3017_vm0 = vmmov 0   ;;  %v3118_v31 = vld [vmem:[%s3898_s2] sm:$0xff]  }
   0x3   :  { %v69_v10 = vunpack.c.0.s8 %v68_v4  ;;  %2727 = vmatprep.subr.bf16.mxu1 %v3016_v11  ;;  %157 = vmatpush1.bf16.msra.mxu0 %v2867_v5  ;;  %v2871_v13 = vld [vmem:[%s3896_s1 + $0x24] ss:$8 sps:$4 sm:$0xff]   ;;  %v2873_v15 = vld [vmem:[%s3896_s1 + $0x20] ss:$8 sps:$4 sm:$0xff]   ;;  %v207_v18 = vunpack.c.0.s8 %v206_v8  ;;  %v2874_v19 = vld [vmem:[%s3896_s1 + $0x34] ss:$8 sps:$4 sm:$0xff]  }
   0x4   :  { %2731 = vmatprep.mubr.msk.bf16.mxu1 %vm3017_vm0, %v3016_v11  ;;  %158 = vmatprep.subr.bf16.mxu0 %v2868_v9  ;;  %v27_v16 = vld [vmem:[%s3897_s0] sm:$0x1]  ;;  %v28_v17 = vld [vmem:[%s3897_s0 + $0x1] sm:$0x1]  ;;  %v29_v20 = vld [vmem:[%s3897_s0 + $0x2] sm:$0x1] }
   0x5   :  { %v3082_v14 = vsub.s32 %v69_v10, %v3067_v6  ;;  %v30_v21 = vld [vmem:[%s3897_s0 + $0x3] sm:$0x1]  ;;  %v31_v22 = vld [vmem:[%s3897_s0 + $0x4] sm:$0x1]  ;;  %v63_v23 = vcombine.low %v27_v16, %v28_v17  ;;  %v32_v24 = vld [vmem:[%s3897_s0 + $0x5] sm:$0x1]  ;;  %v3122_v33 = vsub.s32 %v207_v18, %v3067_v6  ;;  %2728 = vmatpush3.bf16.msra.mxu1 %v3118_v31 }
   0x6   :  { %v33_v25 = vld [vmem:[%s3897_s0 + $0x6] sm:$0x1]  ;;  %v34_v26 = vld [vmem:[%s3897_s0 + $0x7] sm:$0x1]  ;;  %v64_v27 = vcombine.low %v29_v20, %v30_v21  ;;  %v65_v28 = vcombine.low %v31_v22, %v32_v24  ;;  %v3130_v36 = vld [vmem:[%s3898_s2 + $0x8] sm:$0xff]   ;;  %2729 = vmatprep.subr.bf16.mxu1 %v3016_v11  ;;  %vm284_vm1 = vcmask 261120  }
   0x7   :  { %159 = vmatpush1.bf16.msra.mxu0 %v2870_v12  ;;  %v66_v29 = vcombine.low %v33_v25, %v34_v26  ;;  %v73_v30 = vrot.slane %v63_v23, %v3082_v14  ;;  %v3135_v37 = vld [vmem:[%s3899_s4] sm:$0x3]  ;;  %v2876_v38 = vld [vmem:[%s3896_s1 + $0x30] ss:$8 sps:$4 sm:$0xff]   ;;  %v3152_v44 = vld [vmem:[%s3900_s5 + $0x2] sm:$0x3] }
   0x8   :  { %160 = vmatprep.subr.bf16.mxu0 %v2871_v13  ;;  %v80_v32 = vrot.slane %v64_v27, %v3082_v14  ;;  %v87_v34 = vrot.slane %v65_v28, %v3082_v14  ;;  %v3144_v41 = vld [vmem:[%s3900_s5] sm:$0x3]  ;;  %v271_v43 = vpack.c.bf16 %v3135_v37, %v3135_v37  ;;  %v3161_v47 = vld [vmem:[%s3898_s2 + $0x10] sm:$0xff]   ;;  %vm152_vm2 = vcmask 523264   ;;  %s3018_s5 = smov 32   ;;  %v3178_v51 = vld [vmem:[%s3898_s2 + $0x18] sm:$0xff]  }
   0x9   :  { %v94_v35 = vrot.slane %v66_v29, %v3082_v14  ;;  %v343_v45 = vrot.slane %v3144_v41, %v3122_v33  ;;  %2730 = vmatpush3.bf16.msra.mxu1 %v3130_v36  ;;  %v504_v49 = vrot.slane %v3152_v44, %v3122_v33  ;;  %v3172_v50 = vld [vmem:[%s3899_s4 + $0x2] sm:$0x3]  ;;  %v47_v53 = vsub.s32 0, %v3067_v6  ;;  %v43_v54 = vld [vmem:[%s3901_s3] sm:$0x3]  ;;  %s3019_s3 = smov 64  }
   0xa   :  { %v95_v39 = vcombine.low %v73_v30, %v80_v32  ;;  %2735 = vmatprep.subr.bf16.mxu1 %v3016_v11  ;;  %v433_v52 = vpack.c.bf16 %v3172_v50, %v3172_v50  ;;  %v51_v55 = vsub.s32 1, %v3067_v6  ;;  %vm390_vm3 = vcmask 253952  }
   0xb   :  { %161 = vmatpush1.bf16.msra.mxu0 %v2873_v15  ;;  %v96_v40 = vcombine.low %v87_v34, %v94_v35  ;;  %344 = vrot.lane.b32.xlu1 %v343_v45, %s3018_s5  ;;  %v48_v56 = vrot.slane %v43_v54, %v47_v53  ;;  %vm553_vm4 = vcmask 516352  }
   0xc   :  { %162 = vmatprep.subr.bf16.mxu0 %v2874_v19  ;;  %v103_v42 = vrot.slane %v95_v39, %v3082_v14  ;;  %2732 = vmatmul.mubr.msk.bf16.vlgmr.msra.gmra.mrb[0].mxu1 %vm284_vm1, %v271_v43  ;;  %v52_v57 = vrot.slane %v43_v54, %v51_v55 }
   0xd   :  { %v110_v46 = vrot.slane %v96_v40, %v3082_v14  ;;  %2736 = vmatpush3.bf16.msra.mxu1 %v3161_v47  ;;  %2739 = vmatprep.mubr.msk.bf16.mxu1 %vm3017_vm0, %v3016_v11 }
   0xe   :  { %2737 = vmatprep.subr.bf16.mxu1 %v3016_v11 }
   0xf   :  { %163 = vmatpush1.bf16.msra.mxu0 %v2876_v38  ;;  %v111_v48 = vcombine.low %v103_v42, %v110_v46  ;;  %505 = vrot.lane.b32.xlu1 %v504_v49, %s3018_s5 }
  0x10   :  { %2743 = vmatprep.subr.bf16.mxu0 %v3016_v11 }
  0x11   :  { %2738 = vmatpush3.bf16.msra.mxu1 %v3178_v51 }
  0x12   :  { %2604 = vmatmul.mubr.msk.bf16.vlgmr.msra.gmra.mrb[0].mxu0 %vm152_vm2, %v111_v48  ;;  %2751 = vmatprep.subr.bf16.mxu1 %v3016_v11 }
  0x13   :  { %2744 = vmatpush3.bf16.msra.mxu0 %v3118_v31  ;;  %2747 = vmatprep.mubr.msk.bf16.mxu0 %vm3017_vm0, %v3016_v11 }
  0x14   :  { %2745 = vmatprep.subr.bf16.mxu0 %v3016_v11  ;;  %2740 = vmatmul.mubr.msk.bf16.vlgmr.msra.gmra.mrb[4].mxu1 %vm284_vm1, %v433_v52 }
  0x15   :  { %2752 = vmatpush3.bf16.msra.mxu1 %v3161_v47  ;;  %2755 = vmatprep.mubr.msk.bf16.mxu1 %vm3017_vm0, %v3016_v11 }
  0x16   :  { %2753 = vmatprep.subr.bf16.mxu1 %v3016_v11 }
  0x17   :  { %2746 = vmatpush3.bf16.msra.mxu0 %v3130_v36 }
  0x18   :  { %2759 = vmatprep.subr.bf16.mxu0 %v3016_v11 }
  0x19   :  { %2754 = vmatpush3.bf16.msra.mxu1 %v3178_v51 }
  0x1a   :  { %2767 = vmatprep.subr.bf16.mxu1 %v3016_v11 }
  0x7d   :  { %v345_v49 = vpop.permute.xlu1 %344 }
  0x81   :  { %v506_v55 = vpop.permute.xlu1 %505 }
  0xdf   :  { %v322_v58 = vpop.f32.mrb[0].mxu1 }
  0xe0   :  { %v2733_v60 = vpop.f32.mrb[1].mxu1 }
  0xe1   :  { %v325_v63 = vpop.f32.mrb[2].mxu1  ;;  %v399_v60 = vrot.slane %v3135_v37, %v3122_v33 }
  0xe2   :  { %v2734_v2 = vpop.f32.mrb[3].mxu1  ;;  %v562_v63 = vrot.slane %v3172_v50, %v3122_v33 }
  0xe5   :  { %v190_v59 = vpop.f32.mrb[0].mxu0 }
  0xe6   :  { %v191_v61 = vadd.f32 %v190_v59, %v48_v56  ;;  %v192_v62 = vpop.f32.mrb[1].mxu0 }
  0xe7   :  { %v193_v0 = vadd.f32 %v192_v62, %v52_v57  ;;  %v194_v1 = vpop.f32.mrb[2].mxu0  ;;  %v483_v13 = vpop.f32.mrb[4].mxu1  ;;  %v364_v62 = vld [vmem:[%s3902_s6] sm:$0x3] }
  0xe8   :  { %v195_v3 = vadd.f32 %v194_v1, %v48_v56  ;;  %v196_v4 = vpop.f32.mrb[3].mxu0  ;;  %v2741_v19 = vpop.f32.mrb[5].mxu1 }
  0xe9   :  { %v203_v5 = vcombine.low %v191_v61, %v193_v0  ;;  %v204_v7 = vcombine.high %v191_v61, %v193_v0  ;;  %v197_v8 = vadd.f32 %v196_v4, %v52_v57  ;;  %v486_v20 = vpop.f32.mrb[6].mxu1  ;;  %v2623_v0 = vld [vmem:[%s3902_s6 + $0xe] sm:$0x3] }
  0xea   :  { %v2742_v23 = vpop.f32.mrb[7].mxu1 }
  0xeb   :  { %v211_v9 = vrot.slane %v203_v5, %v3122_v33  ;;  %v218_v6 = vrot.slane %v204_v7, %v3122_v33  ;;  %2605 = vst.sshfl [vmem:[#allocation2] sm:$0x33 pattern:$0x76325410] %v203_v5  ;;  %v221_v10 = vcombine.low %v195_v3, %v197_v8  ;;  %v222_v12 = vcombine.high %v195_v3, %v197_v8 }
  0xec   :  { %2606 = vst.sshfl [vmem:[#allocation2 + $0x8] sm:$0x33 pattern:$0x76325410] %v204_v7 }
  0xed   :  { %v219_v15 = vcombine.high %v211_v9, %v211_v9  ;;  %v220_v16 = vcombine.high %v218_v6, %v218_v6  ;;  %v229_v17 = vrot.slane %v221_v10, %v3122_v33  ;;  %v236_v18 = vrot.slane %v222_v12, %v3122_v33  ;;  %2607 = vst.sshfl [vmem:[#allocation2 + $0x10] sm:$0x33 pattern:$0x76325410] %v221_v10 }
  0xee   :  { %2608 = vst.sshfl [vmem:[#allocation2 + $0x18] sm:$0x33 pattern:$0x76325410] %v222_v12 }
  0xef   :  { %248 = vst [vmem:[#allocation2 + $0x4] sm:$0xf] %v219_v15  ;;  %250 = vst [vmem:[#allocation2 + $0xc] sm:$0xf] %v220_v16  ;;  %v237_v21 = vcombine.high %v229_v17, %v229_v17  ;;  %v238_v22 = vcombine.high %v236_v18, %v236_v18 }
  0xf1   :  { %252 = vst [vmem:[#allocation2 + $0x14] sm:$0xf] %v237_v21  ;;  %254 = vst [vmem:[#allocation2 + $0x1c] sm:$0xf] %v238_v22 }
  0xf2   :  { %v270_v24 = vld [vmem:[#allocation2] sm:$0x3] }
  0xf3   :  { %v328_v25 = vadd.f32 %v322_v58, %v270_v24 }
  0xf5   :  { %2881 = vtanh.f32 %v328_v25  ;;  %v2618_v30 = vmul.f32 -1.442695, %v328_v25 }
  0xf8   :  { %v432_v26 = vld [vmem:[#allocation2 + $0x1e] sm:$0x3] }
  0xf9   :  { %v489_v27 = vadd.f32 %v483_v13, %v432_v26 }
  0xfb   :  { %2883 = vtanh.f32 %v489_v27  ;;  %v2622_v32 = vmul.f32 -1.442695, %v489_v27 }
  0xfc   :  { %2885 = vpow2.f32 %v2618_v30 }
  0xfd   :  { %2887 = vpow2.f32 %v2622_v32 }
  0xff   :  { %v2882_v28 = vpop.eup %2881 }
 0x100   :  { %349 = vrot.lane.b32.xlu0 %v2882_v28, %s3018_s5 }
 0x105   :  { %v2884_v29 = vpop.eup %2883 }
 0x106   :  { %510 = vrot.lane.b32.xlu0 %v2884_v29, %s3018_s5  ;;  %v2886_v34 = vpop.eup %2885 }
 0x107   :  { %v332_v35 = vadd.f32 1.0, %v2886_v34  ;;  %v2888_v38 = vpop.eup %2887  ;;  %v745_v34 = vld [vmem:[#allocation2 + $0x1a] sm:$0x3] }
 0x108   :  { %v493_v39 = vadd.f32 1.0, %v2888_v38 }
 0x109   :  { %2889 = vrcp.f32 %v332_v35 }
 0x10a   :  { %2891 = vrcp.f32 %v493_v39 }
 0x113   :  { %v2890_v40 = vpop.eup %2889 }
 0x114   :  { %v2892_v45 = vpop.eup %2891  ;;  %v347_v52 = vmul.f32 %v2890_v40, %v345_v49 }
 0x115   :  { %v508_v56 = vmul.f32 %v2892_v45, %v506_v55 }
 0x172   :  { %v350_v42 = vpop.permute.xlu0 %349 }
 0x173   :  { %v352_v43 = vmul.f32 %v2890_v40, %v350_v42 }
 0x175   :  { %354 = vrot.lane.b32.xlu0 %v352_v43, %s3018_s5 }
 0x178   :  { %v511_v46 = vpop.permute.xlu0 %510 }
 0x179   :  { %v513_v48 = vmul.f32 %v2892_v45, %v511_v46 }
 0x17b   :  { %515 = vrot.lane.b32.xlu1 %v513_v48, %s3018_s5 }
 0x1e7   :  { %v355_v53 = vpop.permute.xlu0 %354 }
 0x1e8   :  { %v357_v54 = vadd.f32 %v355_v53, %v347_v52 }
 0x1ea   :  { %2893 = vtanh.f32 %v357_v54  ;;  %v417_v7 = vsub.f32 %v357_v54, %v345_v49 }
 0x1ec   :  { %v425_v12 = vrot.slane %v417_v7, %v3122_v33 }
 0x1ed   :  { %v516_v57 = vpop.permute.xlu1 %515 }
 0x1ee   :  { %v518_v58 = vadd.f32 %v516_v57, %v508_v56 }
 0x1f0   :  { %2895 = vtanh.f32 %v518_v58  ;;  %v580_v13 = vsub.f32 %v518_v58, %v506_v55 }
 0x1f2   :  { %v588_v16 = vrot.slane %v580_v13, %v3122_v33 }
 0x1f4   :  { %v2894_v59 = vpop.eup %2893 }
 0x1f5   :  { %360 = vrot.lane.b32.xlu0 %v2894_v59, %s3018_s5 }
 0x1f9   :  { %400 = vrot.lane.b32.xlu0 %v399_v60, %s3019_s3 }
 0x1fa   :  { %v2896_v61 = vpop.eup %2895 }
 0x1fb   :  { %521 = vrot.lane.b32.xlu1 %v2896_v61, %s3018_s5 }
 0x1fd   :  { %367 = vperm.xlu0 %2863, %v364_v62  }
 0x1ff   :  { %563 = vrot.lane.b32.xlu1 %v562_v63, %s3019_s3 }
 0x203   :  { %529 = vperm.xlu1 %2864, %v2623_v0  }
 0x267   :  { %v361_v1 = vpop.permute.xlu0 %360 }
 0x268   :  { %v3228_v2 = vmul.f32 %v2890_v40, %v361_v1 }
 0x26b   :  { %v401_v3 = vpop.permute.xlu0 %400 }
 0x26c   :  { %v403_v4 = vsub.f32 %v3228_v2, %v401_v3 }
 0x26d   :  { %v522_v5 = vpop.permute.xlu1 %521 }
 0x26e   :  { %v411_v8 = vrot.slane %v403_v4, %v3122_v33  ;;  %v3232_v9 = vmul.f32 %v2892_v45, %v522_v5 }
 0x270   :  { %412 = vrot.lane.b32.xlu1 %v411_v8, %s3019_s3 }
 0x271   :  { %v564_v6 = vpop.permute.xlu1 %563 }
 0x272   :  { %v566_v10 = vsub.f32 %v3232_v9, %v564_v6 }
 0x274   :  { %v574_v15 = vrot.slane %v566_v10, %v3122_v33  ;;  %426 = vrot.lane.b32.xlu1 %v425_v12, %s3020_s29 }
 0x276   :  { %575 = vrot.lane.b32.xlu0 %v574_v15, %s3019_s3 }
 0x27a   :  { %589 = vrot.lane.b32.xlu0 %v588_v16, %s3020_s29 }
 0x27c   :  { %v3244_v18 = vpop.permute.xlu0 %367 }
 0x282   :  { %v3242_v17 = vpop.permute.xlu1 %529 }
 0x2e2   :  { %v413_v19 = vpop.permute.xlu1 %412 }
 0x2e3   :  { %v415_v20 = vmul.f32 %v413_v19, %v3244_v18  ;;  %v2627_v19 = vld [vmem:[%s3902_s6 + $0x2] sm:$0x3] }
 0x2e5   :  { %v3248_v21 = vadd.f32 %v415_v20, %v3135_v37 }
 0x2e6   :  { %v427_v32 = vpop.permute.xlu1 %426 }
 0x2e7   :  { %v596_v22 = vpack.c.bf16 %v3248_v21, %v3248_v21  ;;  %v429_v40 = vmul.f32 %v427_v32, %v3244_v18  ;;  %v712_v15 = vrot.slane %v3248_v21, %v3122_v33 }
 0x2e8   :  { %v576_v23 = vpop.permute.xlu0 %575 }
 0x2e9   :  { %v578_v24 = vmul.f32 %v576_v23, %v3242_v17  ;;  %2748 = vmatmul.mubr.msk.bf16.vlgmr.msra.gmra.mrb[4].mxu0 %vm284_vm1, %v596_v22  ;;  %v3274_v46 = vadd.f32 %v429_v40, %v3144_v41  ;;  %v2631_v22 = vld [vmem:[%s3902_s6 + $0xc] sm:$0x3] }
 0x2ea   :  { %2760 = vmatpush3.bf16.msra.mxu0 %v3118_v31  ;;  %2763 = vmatprep.mubr.msk.bf16.mxu0 %vm3017_vm0, %v3016_v11 }
 0x2eb   :  { %v3258_v25 = vadd.f32 %v3172_v50, %v578_v24  ;;  %2761 = vmatprep.subr.bf16.mxu0 %v3016_v11  ;;  %v595_v50 = vld [vmem:[#allocation2 + $0x4] sm:$0x3]  ;;  %v655_v52 = vrot.slane %v3274_v46, %v3122_v33 }
 0x2ec   :  { %v590_v45 = vpop.permute.xlu0 %589 }
 0x2ed   :  { %v746_v37 = vpack.c.bf16 %v3258_v25, %v3258_v25  ;;  %v592_v49 = vmul.f32 %v590_v45, %v3242_v17  ;;  %v862_v20 = vrot.slane %v3258_v25, %v3122_v33 }
 0x2ee   :  { %2762 = vmatpush3.bf16.msra.mxu0 %v3130_v36 }
 0x2ef   :  { %2756 = vmatmul.mubr.msk.bf16.vlgmr.msra.gmra.mrb[8].mxu1 %vm284_vm1, %v746_v37  ;;  %2775 = vmatprep.subr.bf16.mxu0 %v3016_v11  ;;  %v3281_v53 = vadd.f32 %v3152_v44, %v592_v49 }
 0x2f0   :  { %2768 = vmatpush3.bf16.msra.mxu1 %v3161_v47  ;;  %2771 = vmatprep.mubr.msk.bf16.mxu1 %vm3017_vm0, %v3016_v11 }
 0x2f1   :  { %2769 = vmatprep.subr.bf16.mxu1 %v3016_v11  ;;  %v805_v41 = vrot.slane %v3281_v53, %v3122_v33 }
 0x2f4   :  { %2770 = vmatpush3.bf16.msra.mxu1 %v3178_v51 }
 0x2f5   :  { %2783 = vmatprep.subr.bf16.mxu1 %v3016_v11 }
 0x3bc   :  { %v634_v26 = vpop.f32.mrb[4].mxu0 }
 0x3bd   :  { %v640_v27 = vadd.f32 %v634_v26, %v595_v50  ;;  %v2749_v28 = vpop.f32.mrb[5].mxu0 }
 0x3be   :  { %v637_v29 = vpop.f32.mrb[6].mxu0 }
 0x3bf   :  { %2897 = vtanh.f32 %v640_v27  ;;  %v2750_v30 = vpop.f32.mrb[7].mxu0  ;;  %v2626_v55 = vmul.f32 -1.442695, %v640_v27 }
 0x3c2   :  { %v784_v35 = vpop.f32.mrb[8].mxu1 }
 0x3c3   :  { %v790_v38 = vadd.f32 %v784_v35, %v745_v34  ;;  %v2757_v39 = vpop.f32.mrb[9].mxu1 }
 0x3c4   :  { %v787_v42 = vpop.f32.mrb[10].mxu1 }
 0x3c5   :  { %2899 = vtanh.f32 %v790_v38  ;;  %v2758_v43 = vpop.f32.mrb[11].mxu1  ;;  %v2630_v56 = vmul.f32 -1.442695, %v790_v38 }
 0x3c6   :  { %2901 = vpow2.f32 %v2626_v55 }
 0x3c7   :  { %2903 = vpow2.f32 %v2630_v56 }
 0x3c9   :  { %v2898_v48 = vpop.eup %2897 }
 0x3ca   :  { %661 = vrot.lane.b32.xlu1 %v2898_v48, %s3018_s5 }
 0x3ce   :  { %656 = vrot.lane.b32.xlu1 %v655_v52, %s3018_s5 }
 0x3cf   :  { %v2900_v54 = vpop.eup %2899 }
 0x3d0   :  { %811 = vrot.lane.b32.xlu0 %v2900_v54, %s3018_s5  ;;  %v2902_v57 = vpop.eup %2901 }
 0x3d1   :  { %v644_v58 = vadd.f32 1.0, %v2902_v57  ;;  %v2904_v59 = vpop.eup %2903 }
 0x3d2   :  { %v794_v44 = vadd.f32 1.0, %v2904_v59 }
 0x3d3   :  { %2905 = vrcp.f32 %v644_v58 }
 0x3d4   :  { %806 = vrot.lane.b32.xlu0 %v805_v41, %s3018_s5  ;;  %2907 = vrcp.f32 %v794_v44 }
 0x3dd   :  { %v2906_v60 = vpop.eup %2905 }
 0x3de   :  { %v2908_v63 = vpop.eup %2907 }
 0x43c   :  { %v662_v61 = vpop.permute.xlu1 %661 }
 0x43d   :  { %v664_v62 = vmul.f32 %v2906_v60, %v662_v61 }
 0x43f   :  { %666 = vrot.lane.b32.xlu1 %v664_v62, %s3018_s5 }
 0x440   :  { %v657_v3 = vpop.permute.xlu1 %656 }
 0x441   :  { %v659_v4 = vmul.f32 %v2906_v60, %v657_v3 }
 0x442   :  { %v812_v0 = vpop.permute.xlu0 %811 }
 0x443   :  { %v814_v1 = vmul.f32 %v2908_v63, %v812_v0 }
 0x445   :  { %816 = vrot.lane.b32.xlu0 %v814_v1, %s3018_s5 }
 0x446   :  { %v807_v8 = vpop.permute.xlu0 %806 }
 0x447   :  { %v809_v6 = vmul.f32 %v2908_v63, %v807_v8 }
 0x4b1   :  { %v667_v5 = vpop.permute.xlu1 %666 }
 0x4b2   :  { %v669_v7 = vadd.f32 %v667_v5, %v659_v4 }
 0x4b4   :  { %2909 = vtanh.f32 %v669_v7  ;;  %v730_v27 = vsub.f32 %v669_v7, %v657_v3 }
 0x4b6   :  { %v738_v34 = vrot.slane %v730_v27, %v3122_v33 }
 0x4b7   :  { %v817_v10 = vpop.permute.xlu0 %816 }
 0x4b8   :  { %v819_v12 = vadd.f32 %v817_v10, %v809_v6 }
 0x4ba   :  { %2911 = vtanh.f32 %v819_v12  ;;  %v880_v35 = vsub.f32 %v819_v12, %v807_v8 }
 0x4bc   :  { %v888_v39 = vrot.slane %v880_v35, %v3122_v33 }
 0x4be   :  { %v2910_v13 = vpop.eup %2909 }
 0x4bf   :  { %672 = vrot.lane.b32.xlu1 %v2910_v13, %s3018_s5 }
 0x4c3   :  { %713 = vrot.lane.b32.xlu1 %v712_v15, %s3019_s3 }
 0x4c4   :  { %v2912_v16 = vpop.eup %2911 }
 0x4c5   :  { %822 = vrot.lane.b32.xlu0 %v2912_v16, %s3018_s5 }
 0x4c7   :  { %680 = vperm.xlu1 %2864, %v2627_v19  }
 0x4c9   :  { %863 = vrot.lane.b32.xlu0 %v862_v20, %s3019_s3 }
 0x4cd   :  { %830 = vperm.xlu0 %2863, %v2631_v22  }
 0x531   :  { %v673_v23 = vpop.permute.xlu1 %672 }
 0x532   :  { %v3304_v24 = vmul.f32 %v2906_v60, %v673_v23  ;;  %v1045_v60 = vld [vmem:[#allocation2 + $0x16] sm:$0x3] }
 0x535   :  { %v714_v37 = vpop.permute.xlu1 %713 }
 0x536   :  { %v716_v50 = vsub.f32 %v3304_v24, %v714_v37 }
 0x537   :  { %v823_v26 = vpop.permute.xlu0 %822 }
 0x538   :  { %v724_v28 = vrot.slane %v716_v50, %v3122_v33  ;;  %v3308_v29 = vmul.f32 %v2908_v63, %v823_v26 }
 0x53a   :  { %725 = vrot.lane.b32.xlu1 %v724_v28, %s3019_s3 }
 0x53b   :  { %v864_v30 = vpop.permute.xlu0 %863 }
 0x53c   :  { %v866_v32 = vsub.f32 %v3308_v29, %v864_v30 }
 0x53e   :  { %v874_v38 = vrot.slane %v866_v32, %v3122_v33  ;;  %739 = vrot.lane.b32.xlu1 %v738_v34, %s3020_s29 }
 0x540   :  { %875 = vrot.lane.b32.xlu0 %v874_v38, %s3019_s3 }
 0x544   :  { %889 = vrot.lane.b32.xlu0 %v888_v39, %s3020_s29 }
 0x546   :  { %v3318_v40 = vpop.permute.xlu1 %680 }
 0x54c   :  { %v3321_v45 = vpop.permute.xlu0 %830 }
 0x5ac   :  { %v726_v42 = vpop.permute.xlu1 %725 }
 0x5ad   :  { %v728_v43 = vmul.f32 %v726_v42, %v3318_v40 }
 0x5af   :  { %v3324_v48 = vadd.f32 %v728_v43, %v3248_v21 }
 0x5b0   :  { %v740_v44 = vpop.permute.xlu1 %739 }
 0x5b1   :  { %v896_v49 = vpack.c.bf16 %v3324_v48, %v3324_v48  ;;  %v742_v0 = vmul.f32 %v740_v44, %v3318_v40 }
 0x5b2   :  { %v876_v52 = vpop.permute.xlu0 %875 }
 0x5b3   :  { %v878_v54 = vmul.f32 %v876_v52, %v3321_v45  ;;  %2764 = vmatmul.mubr.msk.bf16.vlgmr.msra.gmra.mrb[8].mxu0 %vm284_vm1, %v896_v49  ;;  %v3350_v5 = vadd.f32 %v742_v0, %v3274_v46  ;;  %v1012_v49 = vrot.slane %v3324_v48, %v3122_v33 }
 0x5b4   :  { %2776 = vmatpush3.bf16.msra.mxu0 %v3118_v31  ;;  %2779 = vmatprep.mubr.msk.bf16.mxu0 %vm3017_vm0, %v3016_v11 }
 0x5b5   :  { %v3334_v41 = vadd.f32 %v878_v54, %v3258_v25  ;;  %2777 = vmatprep.subr.bf16.mxu0 %v3016_v11  ;;  %v895_v25 = vld [vmem:[#allocation2 + $0x8] sm:$0x3]  ;;  %v955_v6 = vrot.slane %v3350_v5, %v3122_v33  ;;  %v2635_v54 = vld [vmem:[%s3902_s6 + $0x4] sm:$0x3] }
 0x5b6   :  { %v890_v4 = vpop.permute.xlu0 %889 }
 0x5b7   :  { %v1046_v21 = vpack.c.bf16 %v3334_v41, %v3334_v41  ;;  %v892_v8 = vmul.f32 %v890_v4, %v3321_v45 }
 0x5b8   :  { %2778 = vmatpush3.bf16.msra.mxu0 %v3130_v36 }
 0x5b9   :  { %2772 = vmatmul.mubr.msk.bf16.vlgmr.msra.gmra.mrb[12].mxu1 %vm284_vm1, %v1046_v21  ;;  %2791 = vmatprep.subr.bf16.mxu0 %v3016_v11  ;;  %v3357_v10 = vadd.f32 %v892_v8, %v3281_v53  ;;  %v1162_v21 = vrot.slane %v3334_v41, %v3122_v33 }
 0x5ba   :  { %2784 = vmatpush3.bf16.msra.mxu1 %v3161_v47  ;;  %2787 = vmatprep.mubr.msk.bf16.mxu1 %vm3017_vm0, %v3016_v11 }
 0x5bb   :  { %2785 = vmatprep.subr.bf16.mxu1 %v3016_v11  ;;  %v1105_v46 = vrot.slane %v3357_v10, %v3122_v33 }
 0x5be   :  { %2786 = vmatpush3.bf16.msra.mxu1 %v3178_v51 }
 0x5bf   :  { %2799 = vmatprep.subr.bf16.mxu1 %v3016_v11 }
 0x686   :  { %v934_v55 = vpop.f32.mrb[8].mxu0 }
 0x687   :  { %v940_v56 = vadd.f32 %v934_v55, %v895_v25  ;;  %v2765_v57 = vpop.f32.mrb[9].mxu0  ;;  %v2639_v25 = vld [vmem:[%s3902_s6 + $0xa] sm:$0x3] }
 0x688   :  { %v937_v58 = vpop.f32.mrb[10].mxu0 }
 0x689   :  { %2913 = vtanh.f32 %v940_v56  ;;  %v2766_v59 = vpop.f32.mrb[11].mxu0  ;;  %v2634_v13 = vmul.f32 -1.442695, %v940_v56 }
 0x68c   :  { %v1084_v61 = vpop.f32.mrb[12].mxu1 }
 0x68d   :  { %v1090_v62 = vadd.f32 %v1084_v61, %v1045_v60  ;;  %v2773_v63 = vpop.f32.mrb[13].mxu1 }
 0x68e   :  { %v1087_v1 = vpop.f32.mrb[14].mxu1 }
 0x68f   :  { %2915 = vtanh.f32 %v1090_v62  ;;  %v2774_v3 = vpop.f32.mrb[15].mxu1  ;;  %v2638_v15 = vmul.f32 -1.442695, %v1090_v62 }
 0x690   :  { %2917 = vpow2.f32 %v2634_v13 }
 0x691   :  { %2919 = vpow2.f32 %v2638_v15 }
 0x693   :  { %v2914_v7 = vpop.eup %2913 }
 0x694   :  { %961 = vrot.lane.b32.xlu1 %v2914_v7, %s3018_s5 }
 0x698   :  { %956 = vrot.lane.b32.xlu1 %v955_v6, %s3018_s5 }
 0x699   :  { %v2916_v12 = vpop.eup %2915 }
 0x69a   :  { %1111 = vrot.lane.b32.xlu0 %v2916_v12, %s3018_s5  ;;  %v2918_v16 = vpop.eup %2917 }
 0x69b   :  { %v944_v19 = vadd.f32 1.0, %v2918_v16  ;;  %v2920_v20 = vpop.eup %2919 }
 0x69c   :  { %v1094_v53 = vadd.f32 1.0, %v2920_v20 }
 0x69d   :  { %2921 = vrcp.f32 %v944_v19 }
 0x69e   :  { %1106 = vrot.lane.b32.xlu0 %v1105_v46, %s3018_s5  ;;  %2923 = vrcp.f32 %v1094_v53 }
 0x6a7   :  { %v2922_v22 = vpop.eup %2921 }
 0x6a8   :  { %v2924_v50 = vpop.eup %2923 }
 0x706   :  { %v962_v23 = vpop.permute.xlu1 %961 }
 0x707   :  { %v964_v37 = vmul.f32 %v2922_v22, %v962_v23 }
 0x709   :  { %966 = vrot.lane.b32.xlu1 %v964_v37, %s3018_s5 }
 0x70a   :  { %v957_v28 = vpop.permute.xlu1 %956 }
 0x70b   :  { %v959_v30 = vmul.f32 %v2922_v22, %v957_v28 }
 0x70c   :  { %v1112_v26 = vpop.permute.xlu0 %1111 }
 0x70d   :  { %v1114_v27 = vmul.f32 %v2924_v50, %v1112_v26  ;;  %v1345_v26 = vld [vmem:[#allocation2 + $0x12] sm:$0x3] }
 0x70f   :  { %1116 = vrot.lane.b32.xlu0 %v1114_v27, %s3018_s5 }
 0x710   :  { %v1107_v35 = vpop.permute.xlu0 %1106 }
 0x711   :  { %v1109_v38 = vmul.f32 %v2924_v50, %v1107_v35 }
 0x77b   :  { %v967_v32 = vpop.permute.xlu1 %966 }
 0x77c   :  { %v969_v34 = vadd.f32 %v967_v32, %v959_v30 }
 0x77e   :  { %2925 = vtanh.f32 %v969_v34  ;;  %v1030_v44 = vsub.f32 %v969_v34, %v957_v28 }
 0x780   :  { %v1038_v0 = vrot.slane %v1030_v44, %v3122_v33 }
 0x781   :  { %v1117_v39 = vpop.permute.xlu0 %1116 }
 0x782   :  { %v1119_v42 = vadd.f32 %v1117_v39, %v1109_v38 }
 0x784   :  { %2927 = vtanh.f32 %v1119_v42  ;;  %v1180_v1 = vsub.f32 %v1119_v42, %v1107_v35 }
 0x786   :  { %v1188_v4 = vrot.slane %v1180_v1, %v3122_v33 }
 0x788   :  { %v2926_v43 = vpop.eup %2925 }
 0x789   :  { %972 = vrot.lane.b32.xlu1 %v2926_v43, %s3018_s5 }
 0x78d   :  { %1013 = vrot.lane.b32.xlu1 %v1012_v49, %s3019_s3 }
 0x78e   :  { %v2928_v52 = vpop.eup %2927 }
 0x78f   :  { %1122 = vrot.lane.b32.xlu0 %v2928_v52, %s3018_s5 }
 0x791   :  { %980 = vperm.xlu1 %2864, %v2635_v54  }
 0x793   :  { %1163 = vrot.lane.b32.xlu0 %v1162_v21, %s3019_s3 }
 0x797   :  { %1130 = vperm.xlu0 %2863, %v2639_v25  }
 0x7fb   :  { %v973_v55 = vpop.permute.xlu1 %972 }
 0x7fc   :  { %v3380_v56 = vmul.f32 %v2922_v22, %v973_v55 }
 0x7ff   :  { %v1014_v57 = vpop.permute.xlu1 %1013 }
 0x800   :  { %v1016_v58 = vsub.f32 %v3380_v56, %v1014_v57 }
 0x801   :  { %v1123_v59 = vpop.permute.xlu0 %1122 }
 0x802   :  { %v1024_v60 = vrot.slane %v1016_v58, %v3122_v33  ;;  %v3384_v61 = vmul.f32 %v2924_v50, %v1123_v59 }
 0x804   :  { %1025 = vrot.lane.b32.xlu1 %v1024_v60, %s3019_s3 }
 0x805   :  { %v1164_v62 = vpop.permute.xlu0 %1163 }
 0x806   :  { %v1166_v63 = vsub.f32 %v3384_v61, %v1164_v62 }
 0x808   :  { %v1174_v3 = vrot.slane %v1166_v63, %v3122_v33  ;;  %1039 = vrot.lane.b32.xlu1 %v1038_v0, %s3020_s29 }
 0x80a   :  { %1175 = vrot.lane.b32.xlu0 %v1174_v3, %s3019_s3 }
 0x80e   :  { %1189 = vrot.lane.b32.xlu0 %v1188_v4, %s3020_s29 }
 0x810   :  { %v3394_v7 = vpop.permute.xlu1 %980 }
 0x816   :  { %v3397_v12 = vpop.permute.xlu0 %1130 }
 0x876   :  { %v1026_v8 = vpop.permute.xlu1 %1025 }
 0x877   :  { %v1028_v6 = vmul.f32 %v1026_v8, %v3394_v7 }
 0x879   :  { %v3400_v46 = vadd.f32 %v1028_v6, %v3324_v48 }
 0x87a   :  { %v1040_v50 = vpop.permute.xlu1 %1039 }
 0x87b   :  { %v1196_v13 = vpack.c.bf16 %v3400_v46, %v3400_v46  ;;  %v1042_v32 = vmul.f32 %v1040_v50, %v3394_v7 }
 0x87c   :  { %v1176_v15 = vpop.permute.xlu0 %1175 }
 0x87d   :  { %v1178_v16 = vmul.f32 %v1176_v15, %v3397_v12  ;;  %2780 = vmatmul.mubr.msk.bf16.vlgmr.msra.gmra.mrb[12].mxu0 %vm284_vm1, %v1196_v13  ;;  %v3426_v39 = vadd.f32 %v1042_v32, %v3350_v5 }
 0x87e   :  { %2792 = vmatpush3.bf16.msra.mxu0 %v3118_v31  ;;  %2795 = vmatprep.mubr.msk.bf16.mxu0 %vm3017_vm0, %v3016_v11 }
 0x87f   :  { %v3410_v19 = vadd.f32 %v1178_v16, %v3334_v41  ;;  %2793 = vmatprep.subr.bf16.mxu0 %v3016_v11  ;;  %v1195_v41 = vld [vmem:[#allocation2 + $0xc] sm:$0x3]  ;;  %v1255_v49 = vrot.slane %v3426_v39, %v3122_v33 }
 0x880   :  { %v1190_v38 = vpop.permute.xlu0 %1189 }
 0x881   :  { %v1346_v48 = vpack.c.bf16 %v3410_v19, %v3410_v19  ;;  %v1192_v43 = vmul.f32 %v1190_v38, %v3397_v12 }
 0x882   :  { %2794 = vmatpush3.bf16.msra.mxu0 %v3130_v36 }
 0x883   :  { %2788 = vmatmul.mubr.msk.bf16.vlgmr.msra.gmra.mrb[16].mxu1 %vm284_vm1, %v1346_v48  ;;  %2807 = vmatprep.subr.bf16.mxu0 %v3016_v11  ;;  %v3433_v52 = vadd.f32 %v1192_v43, %v3357_v10 }
 0x884   :  { %2800 = vmatpush3.bf16.msra.mxu1 %v3161_v47  ;;  %2803 = vmatprep.mubr.msk.bf16.mxu1 %vm3017_vm0, %v3016_v11 }
 0x885   :  { %2801 = vmatprep.subr.bf16.mxu1 %v3016_v11  ;;  %v1405_v5 = vrot.slane %v3433_v52, %v3122_v33 }
 0x888   :  { %2802 = vmatpush3.bf16.msra.mxu1 %v3178_v51 }
 0x889   :  { %2815 = vmatprep.subr.bf16.mxu1 %v3016_v11 }
 0x950   :  { %v1234_v20 = vpop.f32.mrb[12].mxu0 }
 0x951   :  { %v1240_v53 = vadd.f32 %v1234_v20, %v1195_v41  ;;  %v2781_v22 = vpop.f32.mrb[13].mxu0  ;;  %v1312_v41 = vrot.slane %v3400_v46, %v3122_v33 }
 0x952   :  { %v1237_v23 = vpop.f32.mrb[14].mxu0  ;;  %v1462_v22 = vrot.slane %v3410_v19, %v3122_v33 }
 0x953   :  { %2929 = vtanh.f32 %v1240_v53  ;;  %v2782_v37 = vpop.f32.mrb[15].mxu0  ;;  %v2642_v21 = vmul.f32 -1.442695, %v1240_v53  ;;  %v2643_v53 = vld [vmem:[%s3902_s6 + $0x6] sm:$0x3] }
 0x954   :  { %v2647_v23 = vld [vmem:[%s3902_s6 + $0x8] sm:$0x3] }
 0x956   :  { %v1384_v27 = vpop.f32.mrb[16].mxu1 }
 0x957   :  { %v1390_v28 = vadd.f32 %v1384_v27, %v1345_v26  ;;  %v2789_v30 = vpop.f32.mrb[17].mxu1 }
 0x958   :  { %v1387_v34 = vpop.f32.mrb[18].mxu1 }
 0x959   :  { %2931 = vtanh.f32 %v1390_v28  ;;  %v2790_v35 = vpop.f32.mrb[19].mxu1  ;;  %v2646_v25 = vmul.f32 -1.442695, %v1390_v28 }
 0x95a   :  { %2933 = vpow2.f32 %v2642_v21 }
 0x95b   :  { %2935 = vpow2.f32 %v2646_v25 }
 0x95d   :  { %v2930_v42 = vpop.eup %2929 }
 0x95e   :  { %1261 = vrot.lane.b32.xlu1 %v2930_v42, %s3018_s5 }
 0x962   :  { %1256 = vrot.lane.b32.xlu1 %v1255_v49, %s3018_s5 }
 0x963   :  { %v2932_v54 = vpop.eup %2931 }
 0x964   :  { %1411 = vrot.lane.b32.xlu0 %v2932_v54, %s3018_s5  ;;  %v2934_v55 = vpop.eup %2933 }
 0x965   :  { %v1244_v57 = vadd.f32 1.0, %v2934_v55  ;;  %v2936_v58 = vpop.eup %2935 }
 0x966   :  { %v1394_v10 = vadd.f32 1.0, %v2936_v58 }
 0x967   :  { %2937 = vrcp.f32 %v1244_v57 }
 0x968   :  { %1406 = vrot.lane.b32.xlu0 %v1405_v5, %s3018_s5  ;;  %2939 = vrcp.f32 %v1394_v10 }
 0x971   :  { %v2938_v59 = vpop.eup %2937 }
 0x972   :  { %v2940_v62 = vpop.eup %2939 }
 0x9d0   :  { %v1262_v44 = vpop.permute.xlu1 %1261 }
 0x9d1   :  { %v1264_v60 = vmul.f32 %v2938_v59, %v1262_v44 }
 0x9d3   :  { %1266 = vrot.lane.b32.xlu1 %v1264_v60, %s3018_s5 }
 0x9d4   :  { %v1257_v1 = vpop.permute.xlu1 %1256 }
 0x9d5   :  { %v1259_v3 = vmul.f32 %v2938_v59, %v1257_v1 }
 0x9d6   :  { %v1412_v63 = vpop.permute.xlu0 %1411 }
 0x9d7   :  { %v1414_v0 = vmul.f32 %v2940_v62, %v1412_v63 }
 0x9d9   :  { %1416 = vrot.lane.b32.xlu0 %v1414_v0, %s3018_s5 }
 0x9da   :  { %v1407_v6 = vpop.permute.xlu0 %1406 }
 0x9db   :  { %v1409_v13 = vmul.f32 %v2940_v62, %v1407_v6 }
 0xa45   :  { %v1267_v4 = vpop.permute.xlu1 %1266 }
 0xa46   :  { %v1269_v8 = vadd.f32 %v1267_v4, %v1259_v3 }
 0xa48   :  { %2941 = vtanh.f32 %v1269_v8  ;;  %v1330_v30 = vsub.f32 %v1269_v8, %v1257_v1  ;;  %v1641_v1 = vld [vmem:[#allocation2 + $0xe] sm:$0x3] }
 0xa4a   :  { %v1338_v42 = vrot.slane %v1330_v30, %v3122_v33 }
 0xa4b   :  { %v1417_v15 = vpop.permute.xlu0 %1416 }
 0xa4c   :  { %v1419_v16 = vadd.f32 %v1417_v15, %v1409_v13 }
 0xa4e   :  { %2943 = vtanh.f32 %v1419_v16  ;;  %v1480_v43 = vsub.f32 %v1419_v16, %v1407_v6 }
 0xa50   :  { %v1488_v54 = vrot.slane %v1480_v43, %v3122_v33 }
 0xa52   :  { %v2942_v48 = vpop.eup %2941 }
 0xa53   :  { %1272 = vrot.lane.b32.xlu1 %v2942_v48, %s3018_s5 }
 0xa57   :  { %1313 = vrot.lane.b32.xlu1 %v1312_v41, %s3019_s3 }
 0xa58   :  { %v2944_v20 = vpop.eup %2943 }
 0xa59   :  { %1422 = vrot.lane.b32.xlu0 %v2944_v20, %s3018_s5 }
 0xa5b   :  { %1280 = vperm.xlu1 %2864, %v2643_v53  }
 0xa5d   :  { %1463 = vrot.lane.b32.xlu0 %v1462_v22, %s3019_s3 }
 0xa61   :  { %1430 = vperm.xlu0 %2863, %v2647_v23  }
 0xac5   :  { %v1273_v37 = vpop.permute.xlu1 %1272 }
 0xac6   :  { %v3456_v50 = vmul.f32 %v2938_v59, %v1273_v37 }
 0xac9   :  { %v1314_v26 = vpop.permute.xlu1 %1313 }
 0xaca   :  { %v1316_v27 = vsub.f32 %v3456_v50, %v1314_v26 }
 0xacb   :  { %v1423_v28 = vpop.permute.xlu0 %1422 }
 0xacc   :  { %v1324_v32 = vrot.slane %v1316_v27, %v3122_v33  ;;  %v3460_v34 = vmul.f32 %v2940_v62, %v1423_v28 }
 0xace   :  { %1325 = vrot.lane.b32.xlu1 %v1324_v32, %s3019_s3 }
 0xacf   :  { %v1464_v35 = vpop.permute.xlu0 %1463 }
 0xad0   :  { %v1466_v38 = vsub.f32 %v3460_v34, %v1464_v35 }
 0xad2   :  { %v1474_v49 = vrot.slane %v1466_v38, %v3122_v33  ;;  %1339 = vrot.lane.b32.xlu1 %v1338_v42, %s3020_s29 }
 0xad4   :  { %1475 = vrot.lane.b32.xlu0 %v1474_v49, %s3019_s3 }
 0xad8   :  { %1489 = vrot.lane.b32.xlu0 %v1488_v54, %s3020_s29 }
 0xada   :  { %v3470_v5 = vpop.permute.xlu1 %1280 }
 0xae0   :  { %v3473_v55 = vpop.permute.xlu0 %1430 }
 0xb40   :  { %v1326_v21 = vpop.permute.xlu1 %1325 }
 0xb41   :  { %v1328_v25 = vmul.f32 %v1326_v21, %v3470_v5 }
 0xb43   :  { %v3476_v57 = vadd.f32 %v1328_v25, %v3400_v46 }
 0xb44   :  { %v1340_v0 = vpop.permute.xlu1 %1339 }
 0xb45   :  { %v1495_v58 = vpack.c.bf16 %v3476_v57, %v3476_v57  ;;  %v1342_v8 = vmul.f32 %v1340_v0, %v3470_v5 }
 0xb46   :  { %v1476_v10 = vpop.permute.xlu0 %1475 }
 0xb47   :  { %v1478_v59 = vmul.f32 %v1476_v10, %v3473_v55  ;;  %2796 = vmatmul.mubr.msk.bf16.vlgmr.msra.gmra.mrb[16].mxu0 %vm284_vm1, %v1495_v58  ;;  %v3502_v15 = vadd.f32 %v1342_v8, %v3426_v39 }
 0xb48   :  { %2808 = vmatpush3.bf16.msra.mxu0 %v3118_v31  ;;  %2811 = vmatprep.mubr.msk.bf16.mxu0 %vm3017_vm0, %v3016_v11  ;;  %v1494_v31 = vld [vmem:[#allocation2 + $0x10] sm:$0x3] }
 0xb49   :  { %v3486_v44 = vadd.f32 %v1478_v59, %v3410_v19  ;;  %2809 = vmatprep.subr.bf16.mxu0 %v3016_v11  ;;  %v1554_v41 = vrot.slane %v3502_v15, %v3122_v33 }
 0xb4b   :  { %v1642_v46 = vpack.c.bf16 %v3486_v44, %v3486_v44 }
 0xb4c   :  { %2810 = vmatpush3.bf16.msra.mxu0 %v3130_v36 }
 0xb4d   :  { %2804 = vmatmul.mubr.msk.bf16.vlgmr.msra.gmra.mrb[20].mxu1 %vm284_vm1, %v1642_v46  ;;  %2823 = vmatprep.subr.bf16.mxu0 %v3016_v11 }
 0xb4e   :  { %2816 = vmatpush3.bf16.msra.mxu1 %v3161_v47  ;;  %2819 = vmatprep.mubr.msk.bf16.mxu1 %vm3017_vm0, %v3016_v11 }
 0xb4f   :  { %2817 = vmatprep.subr.bf16.mxu1 %v3016_v11 }
 0xb52   :  { %2818 = vmatpush3.bf16.msra.mxu1 %v3178_v51  ;;  %v1490_v51 = vpop.permute.xlu0 %1489 }
 0xb53   :  { %2831 = vmatprep.subr.bf16.mxu1 %v3016_v11  ;;  %v1492_v48 = vmul.f32 %v1490_v51, %v3473_v55 }
 0xb55   :  { %v3509_v20 = vadd.f32 %v1492_v48, %v3433_v52 }
 0xb57   :  { %v1701_v39 = vrot.slane %v3509_v20, %v3122_v33 }
 0xc1a   :  { %v1533_v19 = vpop.f32.mrb[16].mxu0 }
 0xc1b   :  { %v1539_v60 = vadd.f32 %v1533_v19, %v1494_v31  ;;  %v2797_v62 = vpop.f32.mrb[17].mxu0  ;;  %v1609_v31 = vrot.slane %v3476_v57, %v3122_v33 }
 0xc1c   :  { %v1536_v36 = vpop.f32.mrb[18].mxu0  ;;  %v1756_v62 = vrot.slane %v3486_v44, %v3122_v33 }
 0xc1d   :  { %2945 = vtanh.f32 %v1539_v60  ;;  %v2798_v63 = vpop.f32.mrb[19].mxu0  ;;  %v2650_v22 = vmul.f32 -1.442695, %v1539_v60  ;;  %v2651_v60 = vld [vmem:[%s3902_s6 + $0x8] sm:$0x3] }
 0xc1e   :  { %v2655_v36 = vld [vmem:[%s3902_s6 + $0x6] sm:$0x3] }
 0xc20   :  { %v1680_v3 = vpop.f32.mrb[20].mxu1 }
 0xc21   :  { %v1686_v47 = vadd.f32 %v1680_v3, %v1641_v1  ;;  %v2805_v4 = vpop.f32.mrb[21].mxu1 }
 0xc22   :  { %v1683_v6 = vpop.f32.mrb[22].mxu1 }
 0xc23   :  { %2947 = vtanh.f32 %v1686_v47  ;;  %v2806_v13 = vpop.f32.mrb[23].mxu1  ;;  %v2654_v23 = vmul.f32 -1.442695, %v1686_v47 }
 0xc24   :  { %2949 = vpow2.f32 %v2650_v22 }
 0xc25   :  { %2951 = vpow2.f32 %v2654_v23 }
 0xc27   :  { %v2946_v16 = vpop.eup %2945 }
 0xc28   :  { %1560 = vrot.lane.b32.xlu1 %v2946_v16, %s3018_s5 }
 0xc2c   :  { %1555 = vrot.lane.b32.xlu1 %v1554_v41, %s3018_s5 }
 0xc2d   :  { %v2948_v53 = vpop.eup %2947 }
 0xc2e   :  { %1707 = vrot.lane.b32.xlu0 %v2948_v53, %s3018_s5  ;;  %v2950_v37 = vpop.eup %2949 }
 0xc2f   :  { %v1543_v26 = vadd.f32 1.0, %v2950_v37  ;;  %v2952_v27 = vpop.eup %2951 }
 0xc30   :  { %v1690_v52 = vadd.f32 1.0, %v2952_v27 }
 0xc31   :  { %2953 = vrcp.f32 %v1543_v26 }
 0xc32   :  { %1702 = vrot.lane.b32.xlu0 %v1701_v39, %s3018_s5  ;;  %2955 = vrcp.f32 %v1690_v52 }
 0xc3b   :  { %v2954_v28 = vpop.eup %2953 }
 0xc3c   :  { %v2956_v35 = vpop.eup %2955 }
 0xc9a   :  { %v1561_v30 = vpop.permute.xlu1 %1560 }
 0xc9b   :  { %v1563_v32 = vmul.f32 %v2954_v28, %v1561_v30  ;;  %v3561_v30 = vld [vmem:[%s3898_s2] sm:$0xff]  }
 0xc9d   :  { %1565 = vrot.lane.b32.xlu1 %v1563_v32, %s3018_s5 }
 0xc9e   :  { %v1556_v43 = vpop.permute.xlu1 %1555 }
 0xc9f   :  { %v1558_v49 = vmul.f32 %v2954_v28, %v1556_v43 }
 0xca0   :  { %v1708_v38 = vpop.permute.xlu0 %1707 }
 0xca1   :  { %v1710_v42 = vmul.f32 %v2956_v35, %v1708_v38  ;;  %v3592_v38 = vld [vmem:[%s3898_s2 + $0x18] sm:$0xff]  }
 0xca3   :  { %1712 = vrot.lane.b32.xlu0 %v1710_v42, %s3018_s5  ;;  %v1788_v42 = vld [vmem:[#allocation2 + $0x14] sm:$0x3] }
 0xca4   :  { %v1703_v25 = vpop.permute.xlu0 %1702 }
 0xca5   :  { %v1705_v58 = vmul.f32 %v2956_v35, %v1703_v25 }
 0xd0f   :  { %v1566_v54 = vpop.permute.xlu1 %1565 }
 0xd10   :  { %v1568_v21 = vadd.f32 %v1566_v54, %v1558_v49 }
 0xd12   :  { %2957 = vtanh.f32 %v1568_v21  ;;  %v1627_v4 = vsub.f32 %v1568_v21, %v1556_v43 }
 0xd14   :  { %v1635_v16 = vrot.slane %v1627_v4, %v3122_v33 }
 0xd15   :  { %v1713_v10 = vpop.permute.xlu0 %1712 }
 0xd16   :  { %v1715_v59 = vadd.f32 %v1713_v10, %v1705_v58  ;;  %v1935_v10 = vld [vmem:[#allocation2 + $0xa] sm:$0x3] }
 0xd18   :  { %2959 = vtanh.f32 %v1715_v59  ;;  %v1774_v48 = vsub.f32 %v1715_v59, %v1703_v25 }
 0xd1a   :  { %v1782_v53 = vrot.slane %v1774_v48, %v3122_v33 }
 0xd1c   :  { %v2958_v46 = vpop.eup %2957 }
 0xd1d   :  { %1571 = vrot.lane.b32.xlu1 %v2958_v46, %s3018_s5 }
 0xd21   :  { %1610 = vrot.lane.b32.xlu1 %v1609_v31, %s3019_s3 }
 0xd22   :  { %v2960_v19 = vpop.eup %2959 }
 0xd23   :  { %1718 = vrot.lane.b32.xlu0 %v2960_v19, %s3018_s5 }
 0xd25   :  { %1578 = vperm.xlu1 %2864, %v2651_v60  }
 0xd27   :  { %1757 = vrot.lane.b32.xlu0 %v1756_v62, %s3019_s3 }
 0xd2b   :  { %1725 = vperm.xlu0 %2863, %v2655_v36  }
 0xd8f   :  { %v1572_v63 = vpop.permute.xlu1 %1571 }
 0xd90   :  { %v3532_v0 = vmul.f32 %v2954_v28, %v1572_v63 }
 0xd93   :  { %v1611_v1 = vpop.permute.xlu1 %1610 }
 0xd94   :  { %v1613_v3 = vsub.f32 %v3532_v0, %v1611_v1 }
 0xd95   :  { %v1719_v47 = vpop.permute.xlu0 %1718 }
 0xd96   :  { %v1621_v8 = vrot.slane %v1613_v3, %v3122_v33  ;;  %v3536_v6 = vmul.f32 %v2956_v35, %v1719_v47  ;;  %v3575_v35 = vld [vmem:[%s3898_s2 + $0x8] sm:$0xff]  }
 0xd98   :  { %1622 = vrot.lane.b32.xlu1 %v1621_v8, %s3019_s3 }
 0xd99   :  { %v1758_v13 = vpop.permute.xlu0 %1757 }
 0xd9a   :  { %v1760_v51 = vsub.f32 %v3536_v6, %v1758_v13 }
 0xd9c   :  { %v1768_v41 = vrot.slane %v1760_v51, %v3122_v33  ;;  %1636 = vrot.lane.b32.xlu1 %v1635_v16, %s3020_s29 }
 0xd9e   :  { %1769 = vrot.lane.b32.xlu0 %v1768_v41, %s3019_s3 }
 0xda2   :  { %1783 = vrot.lane.b32.xlu0 %v1782_v53, %s3020_s29 }
 0xda4   :  { %v3546_v39 = vpop.permute.xlu1 %1578 }
 0xdaa   :  { %v3549_v37 = vpop.permute.xlu0 %1725 }
 0xe0a   :  { %v1623_v22 = vpop.permute.xlu1 %1622 }
 0xe0b   :  { %v1625_v23 = vmul.f32 %v1623_v22, %v3546_v39 }
 0xe0d   :  { %v3552_v26 = vadd.f32 %v1625_v23, %v3476_v57 }
 0xe0e   :  { %v1637_v58 = vpop.permute.xlu1 %1636 }
 0xe0f   :  { %v1789_v27 = vpack.c.bf16 %v3552_v26, %v3552_v26  ;;  %v1639_v19 = vmul.f32 %v1637_v58, %v3546_v39 }
 0xe10   :  { %v1770_v52 = vpop.permute.xlu0 %1769 }
 0xe11   :  { %v1772_v28 = vmul.f32 %v1770_v52, %v3549_v37  ;;  %2812 = vmatmul.mubr.msk.bf16.vlgmr.msra.gmra.mrb[20].mxu0 %vm284_vm1, %v1789_v27  ;;  %v3598_v63 = vadd.f32 %v1639_v19, %v3502_v15 }
 0xe12   :  { %2824 = vmatpush3.bf16.msra.mxu0 %v3561_v30  ;;  %2827 = vmatprep.mubr.msk.bf16.mxu0 %vm3017_vm0, %v3016_v11 }
 0xe13   :  { %v3567_v57 = vadd.f32 %v1772_v28, %v3486_v44  ;;  %2825 = vmatprep.subr.bf16.mxu0 %v3016_v11  ;;  %v3583_v44 = vld [vmem:[%s3898_s2 + $0x10] sm:$0xff]   ;;  %v1848_v47 = vrot.slane %v3598_v63, %v3122_v33 }
 0xe14   :  { %v1784_v36 = vpop.permute.xlu0 %1783 }
 0xe15   :  { %v1936_v32 = vpack.c.bf16 %v3567_v57, %v3567_v57  ;;  %v1786_v3 = vmul.f32 %v1784_v36, %v3549_v37  ;;  %v2050_v19 = vrot.slane %v3567_v57, %v3122_v33 }
 0xe16   :  { %2826 = vmatpush3.bf16.msra.mxu0 %v3575_v35 }
 0xe17   :  { %2820 = vmatmul.mubr.msk.bf16.vlgmr.msra.gmra.mrb[24].mxu1 %vm284_vm1, %v1936_v32  ;;  %2839 = vmatprep.subr.bf16.mxu0 %v3016_v11  ;;  %v3605_v4 = vadd.f32 %v1786_v3, %v3509_v20 }
 0xe18   :  { %2832 = vmatpush3.bf16.msra.mxu1 %v3583_v44  ;;  %2835 = vmatprep.mubr.msk.bf16.mxu1 %vm3017_vm0, %v3016_v11 }
 0xe19   :  { %2833 = vmatprep.subr.bf16.mxu1 %v3016_v11  ;;  %v1995_v15 = vrot.slane %v3605_v4, %v3122_v33 }
 0xe1c   :  { %2834 = vmatpush3.bf16.msra.mxu1 %v3592_v38 }
 0xe1d   :  { %2847 = vmatprep.subr.bf16.mxu1 %v3016_v11 }
 0xee4   :  { %v1827_v43 = vpop.f32.mrb[20].mxu0 }
 0xee5   :  { %v1833_v49 = vadd.f32 %v1827_v43, %v1788_v42  ;;  %v2813_v54 = vpop.f32.mrb[21].mxu0 }
 0xee6   :  { %v1830_v21 = vpop.f32.mrb[22].mxu0 }
 0xee7   :  { %2961 = vtanh.f32 %v1833_v49  ;;  %v2814_v25 = vpop.f32.mrb[23].mxu0  ;;  %v2658_v13 = vmul.f32 -1.442695, %v1833_v49 }
 0xeea   :  { %v1974_v59 = vpop.f32.mrb[24].mxu1 }
 0xeeb   :  { %v1980_v46 = vadd.f32 %v1974_v59, %v1935_v10  ;;  %v2821_v31 = vpop.f32.mrb[25].mxu1  ;;  %v1903_v59 = vrot.slane %v3552_v26, %v3122_v33 }
 0xeec   :  { %v1977_v60 = vpop.f32.mrb[26].mxu1  ;;  %v2659_v31 = vld [vmem:[%s3902_s6 + $0xa] sm:$0x3] }
 0xeed   :  { %2963 = vtanh.f32 %v1980_v46  ;;  %v2822_v62 = vpop.f32.mrb[27].mxu1  ;;  %v2662_v51 = vmul.f32 -1.442695, %v1980_v46  ;;  %v2663_v60 = vld [vmem:[%s3902_s6 + $0x4] sm:$0x3] }
 0xeee   :  { %2965 = vpow2.f32 %v2658_v13 }
 0xeef   :  { %2967 = vpow2.f32 %v2662_v51 }
 0xef1   :  { %v2962_v1 = vpop.eup %2961 }
 0xef2   :  { %1854 = vrot.lane.b32.xlu1 %v2962_v1, %s3018_s5 }
 0xef6   :  { %1849 = vrot.lane.b32.xlu1 %v1848_v47, %s3018_s5 }
 0xef7   :  { %v2964_v8 = vpop.eup %2963 }
 0xef8   :  { %2001 = vrot.lane.b32.xlu0 %v2964_v8, %s3018_s5  ;;  %v2966_v16 = vpop.eup %2965 }
 0xef9   :  { %v1837_v48 = vadd.f32 1.0, %v2966_v16  ;;  %v2968_v41 = vpop.eup %2967 }
 0xefa   :  { %v1984_v20 = vadd.f32 1.0, %v2968_v41 }
 0xefb   :  { %2969 = vrcp.f32 %v1837_v48 }
 0xefc   :  { %1996 = vrot.lane.b32.xlu0 %v1995_v15, %s3018_s5  ;;  %2971 = vrcp.f32 %v1984_v20 }
 0xf05   :  { %v2970_v53 = vpop.eup %2969 }
 0xf06   :  { %v2972_v27 = vpop.eup %2971 }
 0xf64   :  { %v1855_v22 = vpop.permute.xlu1 %1854 }
 0xf65   :  { %v1857_v23 = vmul.f32 %v2970_v53, %v1855_v22 }
 0xf67   :  { %1859 = vrot.lane.b32.xlu1 %v1857_v23, %s3018_s5 }
 0xf68   :  { %v1850_v32 = vpop.permute.xlu1 %1849 }
 0xf69   :  { %v1852_v42 = vmul.f32 %v2970_v53, %v1850_v32 }
 0xf6a   :  { %v2002_v52 = vpop.permute.xlu0 %2001 }
 0xf6b   :  { %v2004_v28 = vmul.f32 %v2972_v27, %v2002_v52 }
 0xf6d   :  { %2006 = vrot.lane.b32.xlu0 %v2004_v28, %s3018_s5 }
 0xf6e   :  { %v1997_v54 = vpop.permute.xlu0 %1996 }
 0xf6f   :  { %v1999_v21 = vmul.f32 %v2972_v27, %v1997_v54 }
 0xfd9   :  { %v1860_v43 = vpop.permute.xlu1 %1859 }
 0xfda   :  { %v1862_v49 = vadd.f32 %v1860_v43, %v1852_v42 }
 0xfdc   :  { %2973 = vtanh.f32 %v1862_v49  ;;  %v1921_v8 = vsub.f32 %v1862_v49, %v1850_v32 }
 0xfde   :  { %v1929_v48 = vrot.slane %v1921_v8, %v3122_v33 }
 0xfdf   :  { %v2007_v25 = vpop.permute.xlu0 %2006 }
 0xfe0   :  { %v2009_v58 = vadd.f32 %v2007_v25, %v1999_v21 }
 0xfe2   :  { %2975 = vtanh.f32 %v2009_v58  ;;  %v2068_v41 = vsub.f32 %v2009_v58, %v1997_v54 }
 0xfe6   :  { %v2974_v10 = vpop.eup %2973 }
 0xfe7   :  { %1865 = vrot.lane.b32.xlu1 %v2974_v10, %s3018_s5 }
 0xfeb   :  { %1904 = vrot.lane.b32.xlu1 %v1903_v59, %s3019_s3 }
 0xfec   :  { %v2976_v46 = vpop.eup %2975 }
 0xfed   :  { %2012 = vrot.lane.b32.xlu0 %v2976_v46, %s3018_s5 }
 0xfef   :  { %1872 = vperm.xlu1 %2864, %v2659_v31  }
 0xff1   :  { %2051 = vrot.lane.b32.xlu0 %v2050_v19, %s3019_s3 }
 0xff5   :  { %2019 = vperm.xlu0 %2863, %v2663_v60  }
0x1059   :  { %v1866_v62 = vpop.permute.xlu1 %1865 }
0x105a   :  { %v3628_v36 = vmul.f32 %v2970_v53, %v1866_v62  ;;  %v2076_v53 = vrot.slane %v2068_v41, %v3122_v33 }
0x105d   :  { %v1905_v1 = vpop.permute.xlu1 %1904 }
0x105e   :  { %v1907_v3 = vsub.f32 %v3628_v36, %v1905_v1 }
0x105f   :  { %v2013_v47 = vpop.permute.xlu0 %2012 }
0x1060   :  { %v1915_v15 = vrot.slane %v1907_v3, %v3122_v33  ;;  %v3632_v13 = vmul.f32 %v2972_v27, %v2013_v47 }
0x1062   :  { %1916 = vrot.lane.b32.xlu1 %v1915_v15, %s3019_s3 }
0x1063   :  { %v2052_v51 = vpop.permute.xlu0 %2051 }
0x1064   :  { %v2054_v16 = vsub.f32 %v3632_v13, %v2052_v51 }
0x1066   :  { %v2062_v20 = vrot.slane %v2054_v16, %v3122_v33  ;;  %1930 = vrot.lane.b32.xlu1 %v1929_v48, %s3020_s29 }
0x1068   :  { %2063 = vrot.lane.b32.xlu0 %v2062_v20, %s3019_s3 }
0x106c   :  { %2077 = vrot.lane.b32.xlu0 %v2076_v53, %s3020_s29 }
0x106e   :  { %v3642_v22 = vpop.permute.xlu1 %1872 }
0x1074   :  { %v3645_v52 = vpop.permute.xlu0 %2019 }
0x10d4   :  { %v1917_v23 = vpop.permute.xlu1 %1916 }
0x10d5   :  { %v1919_v27 = vmul.f32 %v1917_v23, %v3642_v22 }
0x10d7   :  { %v3648_v28 = vadd.f32 %v1919_v27, %v3552_v26 }
0x10d8   :  { %v1931_v10 = vpop.permute.xlu1 %1930 }
0x10d9   :  { %v2083_v32 = vpack.c.bf16 %v3648_v28, %v3648_v28 }
0x10da   :  { %v2064_v42 = vpop.permute.xlu0 %2063 }
0x10db   :  { %v2066_v43 = vmul.f32 %v2064_v42, %v3645_v52  ;;  %2828 = vmatmul.mubr.msk.bf16.vlgmr.msra.gmra.mrb[24].mxu0 %vm284_vm1, %v2083_v32 }
0x10dc   :  { %2840 = vmatpush3.bf16.msra.mxu0 %v3561_v30  ;;  %2843 = vmatprep.mubr.msk.bf16.mxu0 %vm3017_vm0, %v3016_v11  ;;  %v2082_v30 = vld [vmem:[#allocation2 + $0x18] sm:$0x3] }
0x10dd   :  { %v3658_v49 = vadd.f32 %v2066_v43, %v3567_v57  ;;  %2841 = vmatprep.subr.bf16.mxu0 %v3016_v11 }
0x10df   :  { %v2230_v26 = vpack.c.bf16 %v3658_v49, %v3658_v49 }
0x10e0   :  { %2842 = vmatpush3.bf16.msra.mxu0 %v3575_v35  ;;  %v2229_v35 = vld [vmem:[#allocation2 + $0x6] sm:$0x3] }
0x10e1   :  { %2836 = vmatmul.mubr.msk.bf16.vlgmr.msra.gmra.mrb[28].mxu1 %vm284_vm1, %v2230_v26 }
0x10e2   :  { %2848 = vmatpush3.bf16.msra.mxu1 %v3583_v44  ;;  %2851 = vmatprep.mubr.msk.bf16.mxu1 %vm3017_vm0, %v3016_v11  ;;  %v1933_v44 = vmul.f32 %v1931_v10, %v3642_v22 }
0x10e3   :  { %2849 = vmatprep.subr.bf16.mxu1 %v3016_v11  ;;  %v2078_v11 = vpop.permute.xlu0 %2077 }
0x10e4   :  { %v2080_v1 = vmul.f32 %v2078_v11, %v3645_v52 }
0x10e6   :  { %2850 = vmatpush3.bf16.msra.mxu1 %v3592_v38  ;;  %v3672_v38 = vadd.f32 %v1933_v44, %v3598_v63  ;;  %v3679_v47 = vadd.f32 %v2080_v1, %v3605_v4  ;;  %v2671_v44 = vld [vmem:[%s3902_s6 + $0x2] sm:$0x3] }
0x10e8   :  { %v2142_v3 = vrot.slane %v3672_v38, %v3122_v33  ;;  %v2289_v63 = vrot.slane %v3679_v47, %v3122_v33 }
0x11ae   :  { %v2121_v57 = vpop.f32.mrb[24].mxu0 }
0x11af   :  { %v2127_v54 = vadd.f32 %v2121_v57, %v2082_v30  ;;  %v2829_v21 = vpop.f32.mrb[25].mxu0 }
0x11b0   :  { %v2124_v25 = vpop.f32.mrb[26].mxu0 }
0x11b1   :  { %2977 = vtanh.f32 %v2127_v54  ;;  %v2830_v58 = vpop.f32.mrb[27].mxu0  ;;  %v2666_v15 = vmul.f32 -1.442695, %v2127_v54 }
0x11b4   :  { %v2268_v59 = vpop.f32.mrb[28].mxu1 }
0x11b5   :  { %v2274_v46 = vadd.f32 %v2268_v59, %v2229_v35  ;;  %v2837_v31 = vpop.f32.mrb[29].mxu1  ;;  %v2197_v35 = vrot.slane %v3648_v28, %v3122_v33 }
0x11b6   :  { %v2271_v19 = vpop.f32.mrb[30].mxu1  ;;  %v2344_v31 = vrot.slane %v3658_v49, %v3122_v33 }
0x11b7   :  { %2979 = vtanh.f32 %v2274_v46  ;;  %v2838_v60 = vpop.f32.mrb[31].mxu1  ;;  %v2670_v51 = vmul.f32 -1.442695, %v2274_v46  ;;  %v2667_v46 = vld [vmem:[%s3902_s6 + $0xc] sm:$0x3] }
0x11b8   :  { %2981 = vpow2.f32 %v2666_v15 }
0x11b9   :  { %2983 = vpow2.f32 %v2670_v51 }
0x11bb   :  { %v2978_v62 = vpop.eup %2977 }
0x11bc   :  { %2148 = vrot.lane.b32.xlu1 %v2978_v62, %s3018_s5 }
0x11c0   :  { %2143 = vrot.lane.b32.xlu1 %v2142_v3, %s3018_s5 }
0x11c1   :  { %v2980_v8 = vpop.eup %2979 }
0x11c2   :  { %2295 = vrot.lane.b32.xlu0 %v2980_v8, %s3018_s5  ;;  %v2982_v16 = vpop.eup %2981 }
0x11c3   :  { %v2131_v48 = vadd.f32 1.0, %v2982_v16  ;;  %v2984_v41 = vpop.eup %2983 }
0x11c4   :  { %v2278_v4 = vadd.f32 1.0, %v2984_v41 }
0x11c5   :  { %2985 = vrcp.f32 %v2131_v48 }
0x11c6   :  { %2290 = vrot.lane.b32.xlu0 %v2289_v63, %s3018_s5  ;;  %2987 = vrcp.f32 %v2278_v4 }
0x11cf   :  { %v2986_v20 = vpop.eup %2985 }
0x11d0   :  { %v2988_v27 = vpop.eup %2987 }
0x122e   :  { %v2149_v53 = vpop.permute.xlu1 %2148 }
0x122f   :  { %v2151_v23 = vmul.f32 %v2986_v20, %v2149_v53 }
0x1231   :  { %2153 = vrot.lane.b32.xlu1 %v2151_v23, %s3018_s5 }
0x1232   :  { %v2144_v43 = vpop.permute.xlu1 %2143 }
0x1233   :  { %v2146_v26 = vmul.f32 %v2986_v20, %v2144_v43 }
0x1234   :  { %v2296_v32 = vpop.permute.xlu0 %2295 }
0x1235   :  { %v2298_v42 = vmul.f32 %v2988_v27, %v2296_v32 }
0x1237   :  { %2300 = vrot.lane.b32.xlu0 %v2298_v42, %s3018_s5 }
0x1238   :  { %v2291_v54 = vpop.permute.xlu0 %2290 }
0x1239   :  { %v2293_v21 = vmul.f32 %v2988_v27, %v2291_v54 }
0x12a3   :  { %v2154_v30 = vpop.permute.xlu1 %2153 }
0x12a4   :  { %v2156_v57 = vadd.f32 %v2154_v30, %v2146_v26 }
0x12a6   :  { %2989 = vtanh.f32 %v2156_v57  ;;  %v2215_v3 = vsub.f32 %v2156_v57, %v2144_v43 }
0x12a8   :  { %v2223_v51 = vrot.slane %v2215_v3, %v3122_v33 }
0x12a9   :  { %v2301_v25 = vpop.permute.xlu0 %2300 }
0x12aa   :  { %v2303_v58 = vadd.f32 %v2301_v25, %v2293_v21 }
0x12ac   :  { %2991 = vtanh.f32 %v2303_v58  ;;  %v2362_v48 = vsub.f32 %v2303_v58, %v2291_v54  ;;  %v2376_v54 = vld [vmem:[#allocation2 + $0x1c] sm:$0x3] }
0x12ae   :  { %v2370_v4 = vrot.slane %v2362_v48, %v3122_v33 }
0x12b0   :  { %v2990_v10 = vpop.eup %2989 }
0x12b1   :  { %2159 = vrot.lane.b32.xlu1 %v2990_v10, %s3018_s5 }
0x12b5   :  { %2198 = vrot.lane.b32.xlu1 %v2197_v35, %s3019_s3 }
0x12b6   :  { %v2992_v59 = vpop.eup %2991 }
0x12b7   :  { %2306 = vrot.lane.b32.xlu0 %v2992_v59, %s3018_s5 }
0x12b9   :  { %2166 = vperm.xlu1 %2864, %v2667_v46  }
0x12bb   :  { %2345 = vrot.lane.b32.xlu0 %v2344_v31, %s3019_s3 }
0x12bf   :  { %2313 = vperm.xlu0 %2863, %v2671_v44  }
0x1323   :  { %v2160_v19 = vpop.permute.xlu1 %2159 }
0x1324   :  { %v3702_v60 = vmul.f32 %v2986_v20, %v2160_v19 }
0x1327   :  { %v2199_v11 = vpop.permute.xlu1 %2198 }
0x1328   :  { %v2201_v62 = vsub.f32 %v3702_v60, %v2199_v11 }
0x1329   :  { %v2307_v1 = vpop.permute.xlu0 %2306 }
0x132a   :  { %v2209_v8 = vrot.slane %v2201_v62, %v3122_v33  ;;  %v3706_v63 = vmul.f32 %v2988_v27, %v2307_v1 }
0x132c   :  { %2210 = vrot.lane.b32.xlu1 %v2209_v8, %s3019_s3 }
0x132d   :  { %v2346_v15 = vpop.permute.xlu0 %2345 }
0x132e   :  { %v2348_v16 = vsub.f32 %v3706_v63, %v2346_v15 }
0x1330   :  { %v2356_v41 = vrot.slane %v2348_v16, %v3122_v33  ;;  %2224 = vrot.lane.b32.xlu1 %v2223_v51, %s3020_s29 }
0x1332   :  { %2357 = vrot.lane.b32.xlu0 %v2356_v41, %s3019_s3 }
0x1336   :  { %2371 = vrot.lane.b32.xlu0 %v2370_v4, %s3020_s29 }
0x1338   :  { %v3716_v20 = vpop.permute.xlu1 %2166 }
0x133e   :  { %v3719_v27 = vpop.permute.xlu0 %2313 }
0x139e   :  { %v2211_v53 = vpop.permute.xlu1 %2210 }
0x139f   :  { %v2213_v23 = vmul.f32 %v2211_v53, %v3716_v20 }
0x13a1   :  { %v2214_v32 = vadd.f32 %v2213_v23, %v3648_v28  ;;  %v2484_v28 = vld [vmem:[#allocation2 + $0x2] sm:$0x3] }
0x13a2   :  { %v2225_v59 = vpop.permute.xlu1 %2224 }
0x13a3   :  { %v2377_v42 = vpack.c.bf16 %v2214_v32, %v2214_v32  ;;  %v2227_v19 = vmul.f32 %v2225_v59, %v3716_v20  ;;  %v370_v59 = vmul.f32 %v3244_v18, %v3228_v2  ;;  %v833_v18 = vmul.f32 %v3321_v45, %v3308_v29 }
0x13a4   :  { %v2358_v43 = vpop.permute.xlu0 %2357 }
0x13a5   :  { %v2360_v26 = vmul.f32 %v2358_v43, %v3719_v27  ;;  %2844 = vmatmul.mubr.msk.bf16.vlgmr.msra.gmra.mrb[28].mxu0 %vm284_vm1, %v2377_v42  ;;  %v2228_v1 = vadd.f32 %v2227_v19, %v3672_v38  ;;  %v683_v19 = vmul.f32 %v3318_v40, %v3304_v24  ;;  %v1283_v40 = vmul.f32 %v3470_v5, %v3456_v50 }
0x13a7   :  { %v2361_v30 = vadd.f32 %v2360_v26, %v3658_v49  ;;  %v2436_v15 = vrot.slane %v2228_v1, %v3122_v33  ;;  %v983_v1 = vmul.f32 %v3394_v7, %v3380_v56  ;;  %v1133_v56 = vmul.f32 %v3397_v12, %v3384_v61 }
0x13a8   :  { %v2372_v62 = vpop.permute.xlu0 %2371  ;;  %v1284_v45 = vpack.c.bf16 %v1283_v40, %v1283_v40 }
0x13a9   :  { %v2485_v57 = vpack.c.bf16 %v2361_v30, %v2361_v30  ;;  %v2374_v8 = vmul.f32 %v2372_v62, %v3719_v27  ;;  %v684_v62 = vpack.c.bf16 %v683_v19, %v683_v19  ;;  %v984_v24 = vpack.c.bf16 %v983_v1, %v983_v1 }
0x13aa   :  { %v1292_v12 = vrot.slane %v1284_v45, %v3082_v14 }
0x13ab   :  { %2852 = vmatmul.mubr.msk.bf16.vlgmr.msra.gmra.mrb[32].mxu1 %vm284_vm1, %v2485_v57  ;;  %v2375_v51 = vadd.f32 %v2374_v8, %v3679_v47  ;;  %v692_v8 = vrot.slane %v684_v62, %v3082_v14  ;;  %v992_v29 = vrot.slane %v984_v24, %v3082_v14 }
0x13ad   :  { %v2544_v48 = vrot.slane %v2375_v51, %v3122_v33  ;;  %v2675_v33 = vld [vmem:[%s3902_s6 + $0xe] sm:$0x3]  ;;  %v1581_v51 = vmul.f32 %v3546_v39, %v3532_v0  ;;  %v699_v50 = vrot.slane %v692_v8, %v3082_v14  ;;  %v1875_v0 = vmul.f32 %v3642_v22, %v3628_v36 }
0x13ae   :  { %v999_v39 = vrot.slane %v992_v29, %v3082_v14  ;;  %v2169_v36 = vmul.f32 %v3716_v20, %v3702_v60  ;;  %v1299_v22 = vrot.slane %v1292_v12, %v3082_v14 }
0x1478   :  { %v2415_v21 = vpop.f32.mrb[28].mxu0 }
0x1479   :  { %v2421_v25 = vadd.f32 %v2415_v21, %v2376_v54  ;;  %v2845_v58 = vpop.f32.mrb[29].mxu0  ;;  %v2565_v54 = vld [vmem:[%s3902_s6] sm:$0x3] }
0x147a   :  { %v2418_v10 = vpop.f32.mrb[30].mxu0 }
0x147b   :  { %2993 = vtanh.f32 %v2421_v25  ;;  %v2846_v35 = vpop.f32.mrb[31].mxu0  ;;  %v2674_v41 = vmul.f32 -1.442695, %v2421_v25 }
0x147e   :  { %v2523_v46 = vpop.f32.mrb[32].mxu1 }
0x147f   :  { %v2529_v31 = vadd.f32 %v2523_v46, %v2484_v28  ;;  %v2853_v44 = vpop.f32.mrb[33].mxu1 }
0x1480   :  { %v2526_v11 = vpop.f32.mrb[34].mxu1  ;;  %v371_v44 = vpack.c.bf16 %v370_v59, %v370_v59 }
0x1481   :  { %2995 = vtanh.f32 %v2529_v31  ;;  %v2854_v49 = vpop.f32.mrb[35].mxu1  ;;  %v2678_v38 = vmul.f32 -1.442695, %v2529_v31  ;;  %v532_v11 = vmul.f32 %v3242_v17, %v3232_v9 }
0x1482   :  { %2997 = vpow2.f32 %v2674_v41  ;;  %v379_v49 = vrot.slane %v371_v44, %v3082_v14  ;;  %v1582_v41 = vpack.c.bf16 %v1581_v51, %v1581_v51 }
0x1483   :  { %2999 = vpow2.f32 %v2678_v38  ;;  %v533_v2 = vpack.c.bf16 %v532_v11, %v532_v11 }
0x1484   :  { %v386_v9 = vrot.slane %v379_v49, %v3082_v14 }
0x1485   :  { %v2994_v3 = vpop.eup %2993  ;;  %v541_v17 = vrot.slane %v533_v2, %v3082_v14 }
0x1486   :  { %2442 = vrot.lane.b32.xlu1 %v2994_v3, %s3018_s5 }
0x1487   :  { %v548_v61 = vrot.slane %v541_v17, %v3082_v14 }
0x148a   :  { %2437 = vrot.lane.b32.xlu1 %v2436_v15, %s3018_s5  ;;  %v834_v15 = vpack.c.bf16 %v833_v18, %v833_v18 }
0x148b   :  { %v2996_v16 = vpop.eup %2995 }
0x148c   :  { %2550 = vrot.lane.b32.xlu0 %v2996_v16, %s3018_s5  ;;  %v2998_v4 = vpop.eup %2997  ;;  %v842_v5 = vrot.slane %v834_v15, %v3082_v14  ;;  %v1134_v16 = vpack.c.bf16 %v1133_v56, %v1133_v56 }
0x148d   :  { %v2425_v53 = vadd.f32 1.0, %v2998_v4  ;;  %v3000_v23 = vpop.eup %2999 }
0x148e   :  { %v2533_v32 = vadd.f32 1.0, %v3000_v23  ;;  %v1142_v38 = vrot.slane %v1134_v16, %v3082_v14  ;;  %v1876_v23 = vpack.c.bf16 %v1875_v0, %v1875_v0 }
0x148f   :  { %3001 = vrcp.f32 %v2425_v53  ;;  %v1590_v53 = vrot.slane %v1582_v41, %v3082_v14 }
0x1490   :  { %2545 = vrot.lane.b32.xlu0 %v2544_v48, %s3018_s5  ;;  %3003 = vrcp.f32 %v2533_v32  ;;  %v1433_v48 = vmul.f32 %v3473_v55, %v3460_v34  ;;  %v1728_v34 = vmul.f32 %v3549_v37, %v3536_v6  ;;  %v849_v55 = vrot.slane %v842_v5, %v3082_v14 }
0x1491   :  { %v2022_v6 = vmul.f32 %v3645_v52, %v3632_v13  ;;  %v1149_v37 = vrot.slane %v1142_v38, %v3082_v14  ;;  %v1597_v60 = vrot.slane %v1590_v53, %v3082_v14 }
0x1492   :  { %v1434_v4 = vpack.c.bf16 %v1433_v48, %v1433_v48 }
0x1494   :  { %v1442_v32 = vrot.slane %v1434_v4, %v3082_v14 }
0x1496   :  { %v1449_v13 = vrot.slane %v1442_v32, %v3082_v14 }
0x1499   :  { %v3736_v47 = vpop.eup %3001 }
0x149a   :  { %v3743_v26 = vpop.eup %3003 }
0x14f8   :  { %v2443_v42 = vpop.permute.xlu1 %2442 }
0x14f9   :  { %v2445_v43 = vmul.f32 %v3736_v47, %v2443_v42  ;;  %v1729_v42 = vpack.c.bf16 %v1728_v34, %v1728_v34 }
0x14fb   :  { %2447 = vrot.lane.b32.xlu1 %v2445_v43, %s3018_s5  ;;  %v1884_v43 = vrot.slane %v1876_v23, %v3082_v14  ;;  %v1737_v20 = vrot.slane %v1729_v42, %v3082_v14 }
0x14fc   :  { %v2438_v21 = vpop.permute.xlu1 %2437 }
0x14fd   :  { %v2440_v25 = vmul.f32 %v3736_v47, %v2438_v21 }
0x14fe   :  { %v2551_v30 = vpop.permute.xlu0 %2550 }
0x14ff   :  { %v2553_v57 = vmul.f32 %v3743_v26, %v2551_v30  ;;  %2460 = vperm.xlu1 %2864, %v2675_v33   ;;  %v2170_v33 = vpack.c.bf16 %v2169_v36, %v2169_v36  ;;  %v2023_v30 = vpack.c.bf16 %v2022_v6, %v2022_v6 }
0x1501   :  { %2555 = vrot.lane.b32.xlu0 %v2553_v57, %s3018_s5  ;;  %v2316_v57 = vmul.f32 %v3719_v27, %v3706_v63  ;;  %v2178_v52 = vrot.slane %v2170_v33, %v3082_v14  ;;  %v2031_v21 = vrot.slane %v2023_v30, %v3082_v14 }
0x1502   :  { %v2546_v35 = vpop.permute.xlu0 %2545 }
0x1503   :  { %v2548_v28 = vmul.f32 %v3743_v26, %v2546_v35  ;;  %v2185_v63 = vrot.slane %v2178_v52, %v3082_v14 }
0x1505   :  { %2568 = vperm.xlu0 %2863, %v2565_v54   ;;  %v1891_v54 = vrot.slane %v1884_v43, %v3082_v14 }
0x156d   :  { %v2448_v58 = vpop.permute.xlu1 %2447 }
0x156e   :  { %v2450_v10 = vadd.f32 %v2448_v58, %v2440_v25  ;;  %v2317_v25 = vpack.c.bf16 %v2316_v57, %v2316_v57  ;;  %v1744_v58 = vrot.slane %v1737_v20, %v3082_v14 }
0x1570   :  { %3005 = vtanh.f32 %v2450_v10  ;;  %v2325_v27 = vrot.slane %v2317_v25, %v3082_v14  ;;  %v2038_v10 = vrot.slane %v2031_v21, %v3082_v14 }
0x1572   :  { %v2332_v35 = vrot.slane %v2325_v27, %v3082_v14 }
0x1573   :  { %v2556_v46 = vpop.permute.xlu0 %2555 }
0x1574   :  { %v2558_v31 = vadd.f32 %v2556_v46, %v2548_v28 }
0x1576   :  { %3007 = vtanh.f32 %v2558_v31 }
0x157a   :  { %v3006_v3 = vpop.eup %3005 }
0x157b   :  { %2453 = vrot.lane.b32.xlu1 %v3006_v3, %s3018_s5 }
0x157e   :  { %v2461_v59 = vpop.permute.xlu1 %2460 }
0x157f   :  { %387 = vrot.lane.b32.xlu1 %v386_v9, %s3019_s3 }
0x1580   :  { %v3008_v7 = vpop.eup %3007 }
0x1581   :  { %2561 = vrot.lane.b32.xlu0 %v3008_v7, %s3018_s5 }
0x1583   :  { %700 = vrot.lane.b32.xlu1 %v699_v50, %s3019_s3 }
0x1584   :  { %v2569_v31 = vpop.permute.xlu0 %2568 }
0x1585   :  { %549 = vrot.lane.b32.xlu0 %v548_v61, %s3020_s29 }
0x1587   :  { %1000 = vrot.lane.b32.xlu1 %v999_v39, %s3019_s3 }
0x1589   :  { %850 = vrot.lane.b32.xlu0 %v849_v55, %s3020_s29 }
0x158b   :  { %1300 = vrot.lane.b32.xlu1 %v1299_v22, %s3019_s3 }
0x158d   :  { %1150 = vrot.lane.b32.xlu0 %v1149_v37, %s3020_s29 }
0x158f   :  { %1598 = vrot.lane.b32.xlu1 %v1597_v60, %s3019_s3 }
0x1591   :  { %1450 = vrot.lane.b32.xlu0 %v1449_v13, %s3020_s29 }
0x1593   :  { %1892 = vrot.lane.b32.xlu1 %v1891_v54, %s3019_s3 }
0x1595   :  { %1745 = vrot.lane.b32.xlu0 %v1744_v58, %s3020_s29 }
0x1597   :  { %2186 = vrot.lane.b32.xlu1 %v2185_v63, %s3019_s3 }
0x1599   :  { %2039 = vrot.lane.b32.xlu0 %v2038_v10, %s3020_s29 }
0x159d   :  { %2333 = vrot.lane.b32.xlu0 %v2332_v35, %s3020_s29 }
0x15ed   :  { %v2454_v28 = vpop.permute.xlu1 %2453 }
0x15ee   :  { %v2456_v46 = vmul.f32 %v3736_v47, %v2454_v28 }
0x15f0   :  { %v2463_v44 = vmul.f32 %v2461_v59, %v2456_v46 }
0x15f1   :  { %v388_v19 = vpop.permute.xlu1 %387 }
0x15f2   :  { %v2464_v11 = vpack.c.bf16 %v2463_v44, %v2463_v44  ;;  %391 = vst.msk [vmem:[%s3903_s7] sm:$0x1] %vm390_vm3, %v388_v19 }
0x15f3   :  { %v2562_v49 = vpop.permute.xlu0 %2561 }
0x15f4   :  { %v2472_v62 = vrot.slane %v2464_v11, %v3082_v14  ;;  %v2564_v1 = vmul.f32 %v3743_v26, %v2562_v49 }
0x15f5   :  { %v701_v3 = vpop.permute.xlu1 %700 }
0x15f6   :  { %v2479_v2 = vrot.slane %v2472_v62, %v3082_v14  ;;  %v2571_v47 = vmul.f32 %v2569_v31, %v2564_v1  ;;  %2628 = vst.msk [vmem:[%s3903_s7 + $0x1] sm:$0x1] %vm390_vm3, %v701_v3 }
0x15f7   :  { %v550_v18 = vpop.permute.xlu0 %549 }
0x15f8   :  { %v2572_v8 = vpack.c.bf16 %v2571_v47, %v2571_v47  ;;  %2624 = vst.msk [vmem:[%s3903_s7 + $0x7] sm:$0x1] %vm553_vm4, %v550_v18  ;;  %2480 = vrot.lane.b32.xlu1 %v2479_v2, %s3019_s3 }
0x15f9   :  { %v1001_v26 = vpop.permute.xlu1 %1000 }
0x15fa   :  { %v2580_v24 = vrot.slane %v2572_v8, %v3082_v14  ;;  %2636 = vst.msk [vmem:[%s3903_s7 + $0x2] sm:$0x1] %vm390_vm3, %v1001_v26 }
0x15fb   :  { %v851_v40 = vpop.permute.xlu0 %850 }
0x15fc   :  { %v2587_v9 = vrot.slane %v2580_v24, %v3082_v14  ;;  %2632 = vst.msk [vmem:[%s3903_s7 + $0x6] sm:$0x1] %vm553_vm4, %v851_v40 }
0x15fd   :  { %v1301_v17 = vpop.permute.xlu1 %1300 }
0x15fe   :  { %2644 = vst.msk [vmem:[%s3903_s7 + $0x3] sm:$0x1] %vm390_vm3, %v1301_v17  ;;  %2588 = vrot.lane.b32.xlu0 %v2587_v9, %s3020_s29 }
0x15ff   :  { %v1151_v15 = vpop.permute.xlu0 %1150 }
0x1600   :  { %2640 = vst.msk [vmem:[%s3903_s7 + $0x5] sm:$0x1] %vm553_vm4, %v1151_v15 }
0x1601   :  { %v1599_v14 = vpop.permute.xlu1 %1598 }
0x1603   :  { %v1451_v56 = vpop.permute.xlu0 %1450 }
0x1604   :  { %2648 = vst.msk [vmem:[%s3903_s7 + $0x4] sm:$0x1] %vm553_vm4, %v1451_v56 }
0x1605   :  { %2652 = vst.msk [vmem:[%s3903_s7 + $0x4] sm:$0x1] %vm390_vm3, %v1599_v14  ;;  %v1893_v7 = vpop.permute.xlu1 %1892 }
0x1606   :  { %2660 = vst.msk [vmem:[%s3903_s7 + $0x5] sm:$0x1] %vm390_vm3, %v1893_v7 }
0x1607   :  { %v1746_v29 = vpop.permute.xlu0 %1745 }
0x1608   :  { %2656 = vst.msk [vmem:[%s3903_s7 + $0x3] sm:$0x1] %vm553_vm4, %v1746_v29 }
0x1609   :  { %v2187_v45 = vpop.permute.xlu1 %2186 }
0x160a   :  { %2668 = vst.msk [vmem:[%s3903_s7 + $0x6] sm:$0x1] %vm390_vm3, %v2187_v45 }
0x160b   :  { %v2040_v51 = vpop.permute.xlu0 %2039 }
0x160c   :  { %2664 = vst.msk [vmem:[%s3903_s7 + $0x2] sm:$0x1] %vm553_vm4, %v2040_v51 }
0x160f   :  { %v2334_v50 = vpop.permute.xlu0 %2333 }
0x1610   :  { %2672 = vst.msk [vmem:[%s3903_s7 + $0x1] sm:$0x1] %vm553_vm4, %v2334_v50 }
0x166a   :  { %v2481_v5 = vpop.permute.xlu1 %2480 }
0x166b   :  { %2676 = vst.msk [vmem:[%s3903_s7 + $0x7] sm:$0x1] %vm390_vm3, %v2481_v5 }
0x1670   :  { %v2589_v16 = vpop.permute.xlu0 %2588 }
0x1671   :  { %2591 = vst.msk [vmem:[%s3903_s7] sm:$0x1] %vm553_vm4, %v2589_v16 }

</bundles_post_ra>
